<compile_context>
chip_gen: v7x
topology: tpu7x:2x2x1
jax: 0.10.0
libtpu: 0.0.40
codegen_flags: <defaults>
</compile_context>

<pallas_src>
import functools

import jax
import jax.numpy as jnp
from jax import lax
from jax.experimental import pallas as pl
from jax.experimental.pallas import tpu as pltpu


def _round_up(x, m):
    return ((x + m - 1) // m) * m


# --------------------------------------------------------------------------- #
# Stage 0: graph layernorm + ent_fc projection + attention scores (eh / et)
# --------------------------------------------------------------------------- #

def _proj_kernel(x_ref, g_ref, b_ref, w_ref, ahc_ref, at_ref,
                 h_ref, featT_ref, eh_ref, et_ref, *, num_heads, head_dim):
    # x_ref   : (tN, F)        raw node features (row tile)
    # w_ref   : (F, H*Dh)      ent_fc weight (bf16, transposed vs torch)
    # ahc_ref : (H*Dh, 1)      attn_h as a sublane column vector
    # at_ref  : (H, Dh)        attn_t (lane-major rows)
    # h_ref   : (tN, F)        post-layernorm features (residual source)
    # featT   : (H, Dh, tN)    feature-major projected features
    # eh_ref  : (H, 1, tN)     source scores  (lane-major over nodes)
    # et_ref  : (H, tN, 1)     dest scores    (sublane-major over nodes)
    x = x_ref[...].astype(jnp.float32)
    mean = jnp.mean(x, axis=-1, keepdims=True)
    var = jnp.mean((x - mean) ** 2, axis=-1, keepdims=True)
    xn = (x - mean) * lax.rsqrt(var + 1e-5) * g_ref[...] + b_ref[...]
    h_ref[...] = xn.astype(h_ref.dtype)

    # projection on the MXU in bf16, f32 accumulate
    y = jnp.dot(xn.astype(jnp.bfloat16), w_ref[...],
                preferred_element_type=jnp.float32)            # (tN, H*Dh)

    for hh in range(num_heads):
        f_h = y[:, hh * head_dim:(hh + 1) * head_dim]          # (tN, Dh)
        f_hT = f_h.T                                           # (Dh, tN)
        featT_ref[hh, :, :] = f_hT
        ah_col = ahc_ref[hh * head_dim:(hh + 1) * head_dim, :] # (Dh, 1)
        eh_ref[hh, :, :] = jnp.sum(f_hT * ah_col.astype(jnp.float32),
                                   axis=0, keepdims=True)      # (1, tN)
        at_row = at_ref[hh:hh + 1, :].astype(jnp.float32)      # (1, Dh)
        et_ref[hh, :, :] = jnp.sum(f_h * at_row,
                                   axis=-1, keepdims=True)     # (tN, 1)


def _project_and_score(x_pad, gamma, beta, w_fc, attn_h_col, attn_t,
                       *, num_heads, head_dim, tile_n):
    n_pad, f = x_pad.shape
    hd = num_heads * head_dim
    grid = (n_pad // tile_n,)
    kernel = functools.partial(_proj_kernel, num_heads=num_heads,
                               head_dim=head_dim)
    out_shape = (
        jax.ShapeDtypeStruct((n_pad, f), jnp.float32),
        jax.ShapeDtypeStruct((num_heads, head_dim, n_pad), jnp.float32),
        jax.ShapeDtypeStruct((num_heads, 1, n_pad), jnp.float32),
        jax.ShapeDtypeStruct((num_heads, n_pad, 1), jnp.float32),
    )
    return pl.pallas_call(
        kernel,
        out_shape=out_shape,
        grid=grid,
        in_specs=[
            pl.BlockSpec((tile_n, f), lambda i: (i, 0)),
            pl.BlockSpec((1, f), lambda i: (0, 0)),
            pl.BlockSpec((1, f), lambda i: (0, 0)),
            pl.BlockSpec((f, hd), lambda i: (0, 0)),
            pl.BlockSpec((hd, 1), lambda i: (0, 0)),
            pl.BlockSpec((num_heads, head_dim), lambda i: (0, 0)),
        ],
        out_specs=(
            pl.BlockSpec((tile_n, f), lambda i: (i, 0)),
            pl.BlockSpec((num_heads, head_dim, tile_n), lambda i: (0, 0, i)),
            pl.BlockSpec((num_heads, 1, tile_n), lambda i: (0, 0, i)),
            pl.BlockSpec((num_heads, tile_n, 1), lambda i: (0, i, 0)),
        ),
        compiler_params=pltpu.CompilerParams(
            dimension_semantics=("parallel",)),
    )(x_pad, gamma, beta, w_fc, attn_h_col, attn_t)


# --------------------------------------------------------------------------- #
# Stage A: leaky-relu scores + edge softmax, grid over (head, dst row tile)
# --------------------------------------------------------------------------- #

def _attn_kernel(eh_ref, et_ref, adj_ref, a_ref, *, negative_slope):
    # eh_ref : (1, 1, Np)  source scores for this head
    # et_ref : (1, tV, 1)  dest scores for this dst tile
    # adj    : (tV, Np)    adjacency mask rows (dst tile x all src)
    # a_ref  : (1, tV, Np) normalized attention (bf16)
    eh = eh_ref[0]                                   # (1, Np)
    et = et_ref[0]                                   # (tV, 1)
    scores = et + eh                                 # (tV, Np)  e = eh[u] + et[v]
    scores = jnp.where(scores > 0, scores, negative_slope * scores)

    mask = adj_ref[...] > 0.0
    scores = jnp.where(mask, scores, jnp.float32(-1e30))

    m = jnp.max(scores, axis=-1, keepdims=True)
    p = jnp.where(mask, jnp.exp(scores - m), 0.0)
    denom = jnp.sum(p, axis=-1, keepdims=True)
    # guard zero-in-degree (and padded) destination rows -> attention row of zeros
    inv = pl.reciprocal(jnp.where(denom > 0.0, denom, 1.0), approx=True)
    a_ref[0] = (p * inv).astype(a_ref.dtype)


def _edge_softmax(eh, et, adj_pad, *, tile_v, negative_slope):
    num_heads = eh.shape[0]
    n_pad = adj_pad.shape[0]
    grid = (num_heads, n_pad // tile_v)
    kernel = functools.partial(_attn_kernel, negative_slope=negative_slope)
    # TODO(synk): for sparse graphs, add a scalar-prefetch block mask
    # (PrefetchScalarGridSpec) and skip all-zero adjacency tiles with pl.when.
    return pl.pallas_call(
        kernel,
        out_shape=jax.ShapeDtypeStruct((num_heads, n_pad, n_pad), jnp.bfloat16),
        grid=grid,
        in_specs=[
            pl.BlockSpec((1, 1, n_pad), lambda h, j: (h, 0, 0)),
            pl.BlockSpec((1, tile_v, 1), lambda h, j: (h, j, 0)),
            pl.BlockSpec((tile_v, n_pad), lambda h, j: (j, 0)),
        ],
        out_specs=pl.BlockSpec((1, tile_v, n_pad), lambda h, j: (h, j, 0)),
        compiler_params=pltpu.CompilerParams(
            dimension_semantics=("parallel", "parallel")),
    )(eh, et, adj_pad)


# --------------------------------------------------------------------------- #
# Stage B: one PPR diffusion hop = tiled (attention @ features) matmul
# --------------------------------------------------------------------------- #

def _ppr_hop_kernel(a_ref, cur_ref, f0_ref, o_ref, acc_ref, *, alpha):
    # a_ref  : (1, tV, tU) bf16 attention block (dst tile x src tile)
    # cur    : (1, Dh, tU) f32  current features (feature-major, src tile)
    # f0     : (1, Dh, tV) f32  feat_0 at the dst tile
    # o_ref  : (1, Dh, tV) f32  next features at the dst tile
    k = pl.program_id(2)

    @pl.when(k == 0)
    def _():
        acc_ref[...] = jnp.zeros_like(acc_ref)

    cur = cur_ref[0].astype(jnp.bfloat16)            # (Dh, tU)
    a = a_ref[0]                                     # (tV, tU)
    # agg[d, v] = sum_u cur[d, u] * a[v, u]  -> lane dim of the result is the node tile
    acc_ref[...] += lax.dot_general(
        cur, a, (((1,), (1,)), ((), ())),
        preferred_element_type=jnp.float32)          # (Dh, tV)

    @pl.when(k == pl.num_programs(2) - 1)
    def _():
        o_ref[0] = ((1.0 - alpha) * acc_ref[...]
                    + alpha * f0_ref[0]).astype(o_ref.dtype)


def _ppr_hop(attn, cur, feat0, *, alpha, tile_v, tile_u):
    num_heads, head_dim, n_pad = cur.shape
    grid = (num_heads, n_pad // tile_v, n_pad // tile_u)
    kernel = functools.partial(_ppr_hop_kernel, alpha=alpha)
    return pl.pallas_call(
        kernel,
        out_shape=jax.ShapeDtypeStruct(cur.shape, jnp.float32),
        grid=grid,
        in_specs=[
            pl.BlockSpec((1, tile_v, tile_u), lambda h, j, k: (h, j, k)),
            pl.BlockSpec((1, head_dim, tile_u), lambda h, j, k: (h, 0, k)),
            pl.BlockSpec((1, head_dim, tile_v), lambda h, j, k: (h, 0, j)),
        ],
        out_specs=pl.BlockSpec((1, head_dim, tile_v), lambda h, j, k: (h, 0, j)),
        scratch_shapes=[pltpu.VMEM((head_dim, tile_v), jnp.float32)],
        compiler_params=pltpu.CompilerParams(
            dimension_semantics=("parallel", "parallel", "arbitrary")),
    )(attn, cur, feat0)


# --------------------------------------------------------------------------- #
# Stage C: residual + ff layernorm + w1/relu/w2 + final residual (fused)
# --------------------------------------------------------------------------- #

def _ffn_kernel(rstT_ref, h_ref, g_ref, b_ref, w1_ref, b1_ref, w2_ref, b2_ref,
                o_ref, acc_ref, xln_ref, *, num_heads, head_dim):
    # rstT_ref: (H, Dh, tN)  diffused features (feature-major)
    # h_ref   : (tN, F)      post-graph-layernorm features (residual, matches
    #                        res_fc_ent = Identity applied to ent_tail)
    # w1/w2   : bf16 weight chunks along the hidden dim; acc_ref accumulates the
    #           FFN output plus the residual base.
    c = pl.program_id(1)

    @pl.when(c == 0)
    def _():
        parts = [rstT_ref[hh].T for hh in range(num_heads)]    # H x (tN, Dh)
        rst = jnp.concatenate(parts, axis=1) + h_ref[...]      # (tN, F)
        acc_ref[...] = rst                                     # residual base
        mean = jnp.mean(rst, axis=-1, keepdims=True)
        var = jnp.mean((rst - mean) ** 2, axis=-1, keepdims=True)
        xln_ref[...] = (rst - mean) * lax.rsqrt(var + 1e-5) * g_ref[...] + b_ref[...]

    x = xln_ref[...].astype(jnp.bfloat16)                      # (tN, F)
    hcol = jnp.dot(x, w1_ref[...], preferred_element_type=jnp.float32)
    hcol = jnp.maximum(hcol + b1_ref[...], 0.0)                # (tN, tC)
    acc_ref[...] += jnp.dot(hcol.astype(jnp.bfloat16), w2_ref[...],
                            preferred_element_type=jnp.float32)

    @pl.when(c == pl.num_programs(1) - 1)
    def _():
        o_ref[...] = (acc_ref[...] + b2_ref[...]).astype(o_ref.dtype)


def _ffn_residual(rstT, h_res, gamma, beta, w1, b1, w2, b2,
                  *, num_heads, head_dim, tile_n, tile_c):
    n_pad, f = h_res.shape
    d_hidden = w1.shape[1]
    grid = (n_pad // tile_n, d_hidden // tile_c)
    kernel = functools.partial(_ffn_kernel, num_heads=num_heads,
                               head_dim=head_dim)
    # TODO(synk): for very large model widths also tile the contraction (F) axis
    # of w1/w2 instead of keeping full-F weight columns resident per step.
    return pl.pallas_call(
        kernel,
        out_shape=jax.ShapeDtypeStruct((n_pad, f), jnp.float32),
        grid=grid,
        in_specs=[
            pl.BlockSpec((num_heads, head_dim, tile_n), lambda i, c: (0, 0, i)),
            pl.BlockSpec((tile_n, f), lambda i, c: (i, 0)),
            pl.BlockSpec((1, f), lambda i, c: (0, 0)),
            pl.BlockSpec((1, f), lambda i, c: (0, 0)),
            pl.BlockSpec((f, tile_c), lambda i, c: (0, c)),
            pl.BlockSpec((1, tile_c), lambda i, c: (0, c)),
            pl.BlockSpec((tile_c, f), lambda i, c: (c, 0)),
            pl.BlockSpec((1, f), lambda i, c: (0, 0)),
        ],
        out_specs=pl.BlockSpec((tile_n, f), lambda i, c: (i, 0)),
        scratch_shapes=[pltpu.VMEM((tile_n, f), jnp.float32),
                        pltpu.VMEM((tile_n, f), jnp.float32)],
        compiler_params=pltpu.CompilerParams(
            dimension_semantics=("parallel", "arbitrary")),
    )(rstT, h_res, gamma, beta, w1, b1, w2, b2)


# ----------------------------- parameter init ------------------------------- #

def small_init_gain(d_in, d_out):
    return 2.0 / (d_in + 4.0 * d_out)


def xavier_normal(key, shape, fan_in, fan_out, gain):
    std = gain * (2.0 / (fan_in + fan_out)) ** 0.5
    return std * jax.random.normal(key, shape, jnp.float32)


def init_gdt_params(key, in_feats, out_feats, num_heads):
    head_dim = out_feats // num_heads
    ks = jax.random.split(key, 5)
    gain_fc = small_init_gain(in_feats, in_feats)
    return {
        'ln_g_gamma': jnp.ones((in_feats,), jnp.float32),
        'ln_g_beta': jnp.zeros((in_feats,), jnp.float32),
        # _ent_fc weight stored transposed: (in, H*Dh)
        'w_fc': xavier_normal(ks[0], (in_feats, num_heads * head_dim),
                              in_feats, num_heads * head_dim, gain_fc),
        # attn_h / attn_t stored as (H, Dh)
        'attn_h': xavier_normal(ks[1], (num_heads, head_dim),
                                num_heads * head_dim, head_dim, gain_fc),
        'attn_t': xavier_normal(ks[2], (num_heads, head_dim),
                                num_heads * head_dim, head_dim, gain_fc),
        'ln_ff_gamma': jnp.ones((out_feats,), jnp.float32),
        'ln_ff_beta': jnp.zeros((out_feats,), jnp.float32),
        'w1': xavier_normal(ks[3], (out_feats, 4 * out_feats),
                            out_feats, 4 * out_feats,
                            small_init_gain(out_feats, 4 * out_feats)),
        'b1': jnp.zeros((4 * out_feats,), jnp.float32),
        'w2': xavier_normal(ks[4], (4 * out_feats, out_feats),
                            4 * out_feats, out_feats,
                            small_init_gain(4 * out_feats, out_feats)),
        'b2': jnp.zeros((out_feats,), jnp.float32),
    }


# ------------------------------- forward pass -------------------------------- #

def gdt_layer_forward(ent_feat, adj, params, *, num_heads, head_dim, hop_num,
                      alpha=0.15, negative_slope=0.2, node_tile=128):
    """GDTLayer.forward (residual=True, in_feats == out_feats, ppr_diff=True,
    activation=None; dropouts are eval-mode identities)."""
    n, f = ent_feat.shape
    n_pad = _round_up(n, node_tile)
    d_hidden = params['w1'].shape[1]
    tile_c = 128 if d_hidden % 128 == 0 else d_hidden

    # pad node axis to a lane-aligned multiple of 128; padded nodes have no edges
    x_pad = jnp.zeros((n_pad, f), jnp.float32).at[:n, :].set(ent_feat)
    adj_pad = jnp.zeros((n_pad, n_pad), jnp.float32).at[:n, :n].set(adj)

    # cast MXU weights to bf16 once, outside the kernels
    w_fc = params['w_fc'].astype(jnp.bfloat16)
    w1 = params['w1'].astype(jnp.bfloat16)
    w2 = params['w2'].astype(jnp.bfloat16)

    # stage 0: layernorm + projection + attention scores
    h_res, featT, eh, et = _project_and_score(
        x_pad,
        params['ln_g_gamma'].reshape(1, -1), params['ln_g_beta'].reshape(1, -1),
        w_fc, params['attn_h'].reshape(-1, 1), params['attn_t'],
        num_heads=num_heads, head_dim=head_dim, tile_n=node_tile)

    # stage A: edge softmax -> dense per-head attention (bf16)
    attn = _edge_softmax(eh, et, adj_pad, tile_v=node_tile,
                         negative_slope=negative_slope)

    # stage B: PPR diffusion, one tiled-matmul pallas_call per hop
    cur = featT
    for _ in range(hop_num):
        cur = _ppr_hop(attn, cur, featT, alpha=alpha,
                       tile_v=node_tile, tile_u=node_tile)

    # stage C: residual + FFN sub-layer (fused)
    out = _ffn_residual(
        cur, h_res,
        params['ln_ff_gamma'].reshape(1, -1), params['ln_ff_beta'].reshape(1, -1),
        w1, params['b1'].reshape(1, -1), w2, params['b2'].reshape(1, -1),
        num_heads=num_heads, head_dim=head_dim,
        tile_n=node_tile, tile_c=tile_c)

    return out[:n]


# ----------------------------------- main ------------------------------------ #

if __name__ == "__main__":
    N = 200            # number of graph nodes (padded to 256 internally)
    IN_FEATS = 64      # in_ent_feats == out_ent_feats (Identity residual)
    NUM_HEADS = 4
    HEAD_DIM = IN_FEATS // NUM_HEADS
    HOP_NUM = 3
    ALPHA = 0.15
    NEG_SLOPE = 0.2

    key = jax.random.PRNGKey(0)
    k_feat, k_params = jax.random.split(key)

    ent_feat = jax.random.normal(k_feat, (N, IN_FEATS), jnp.float32)

    # dense adjacency mask adj[dst, src]: self-loops plus two ring neighbours,
    # so every node has in-degree >= 1 (matches DGL's zero-in-degree check).
    idx = jnp.arange(N)
    adj = jnp.eye(N, dtype=jnp.float32)
    adj = adj.at[idx, (idx - 1) % N].set(1.0)
    adj = adj.at[idx, (idx + 2) % N].set(1.0)

    params = init_gdt_params(k_params, IN_FEATS, IN_FEATS, NUM_HEADS)

    fwd = jax.jit(functools.partial(gdt_layer_forward,
                                    num_heads=NUM_HEADS, head_dim=HEAD_DIM,
                                    hop_num=HOP_NUM, alpha=ALPHA,
                                    negative_slope=NEG_SLOPE))
    out = jax.block_until_ready(fwd(ent_feat, adj, params))

    assert out.shape == (N, NUM_HEADS * HEAD_DIM)
    assert bool(jnp.all(jnp.isfinite(out)))
    print("KERNEL_OK")
</pallas_src>

<mosaic_0001>
module attributes {stable_mosaic.version = 11 : i64} {
  func.func @_ppr_hop_kernel(%arg0: i32, %arg1: i32, %arg2: i32, %arg3: memref<1x128x128xbf16, #tpu.memory_space<vmem>>, %arg4: memref<1x16x128xf32, #tpu.memory_space<vmem>>, %arg5: memref<1x16x128xf32, #tpu.memory_space<vmem>>, %arg6: memref<1x16x128xf32, #tpu.memory_space<vmem>>, %arg7: memref<16x128xf32, #tpu.memory_space<vmem>>) attributes {dimension_semantics = [#tpu.dimension_semantics<parallel>, #tpu.dimension_semantics<parallel>, #tpu.dimension_semantics<arbitrary>], iteration_bounds = array<i64: 4, 2, 2>, scalar_prefetch = 0 : i64, scratch_operands = 1 : i64, tpu.core_type = #tpu.core_type<tc>, window_params = [{transform_indices = @transform_0, window_bounds = array<i64: 1, 128, 128>}, {transform_indices = @transform_1, window_bounds = array<i64: 1, 16, 128>}, {transform_indices = @transform_2, window_bounds = array<i64: 1, 16, 128>}, {transform_indices = @transform_3, window_bounds = array<i64: 1, 16, 128>}]} {
    %c0_i32 = arith.constant 0 : i32
    %0 = arith.cmpi eq, %arg2, %c0_i32 : i32
    %1 = arith.extui %0 : i1 to i32
    %c0_i32_0 = arith.constant 0 : i32
    %2 = arith.cmpi ne, %1, %c0_i32_0 : i32
    scf.if %2 {
      %cst_11 = arith.constant 0.000000e+00 : f32
      %15 = vector.broadcast %cst_11 : f32 to vector<16x128xf32>
      %c0_12 = arith.constant 0 : index
      %c0_13 = arith.constant 0 : index
      %16 = vector.load %arg7[%c0_12, %c0_13] : memref<16x128xf32, #tpu.memory_space<vmem>>, vector<16x128xf32>
      tpu.vector_store %arg7[%c0_12, %c0_13], %15 {strides = array<i32>} : memref<16x128xf32, #tpu.memory_space<vmem>>, vector<16x128xf32>,
    } else {
    }
    %c0 = arith.constant 0 : index
    %c0_1 = arith.constant 0 : index
    %c0_2 = arith.constant 0 : index
    %3 = vector.load %arg4[%c0, %c0_1, %c0_2] : memref<1x16x128xf32, #tpu.memory_space<vmem>>, vector<1x16x128xf32>
    %4 = vector.shape_cast %3 : vector<1x16x128xf32> to vector<16x128xf32>
    %5 = arith.truncf %4 : vector<16x128xf32> to vector<16x128xbf16>
    %c0_3 = arith.constant 0 : index
    %c0_4 = arith.constant 0 : index
    %c0_5 = arith.constant 0 : index
    %6 = vector.load %arg3[%c0_3, %c0_4, %c0_5] : memref<1x128x128xbf16, #tpu.memory_space<vmem>>, vector<1x128x128xbf16>
    %7 = vector.shape_cast %6 : vector<1x128x128xbf16> to vector<128x128xbf16>
    %c0_6 = arith.constant 0 : index
    %c0_7 = arith.constant 0 : index
    %8 = vector.load %arg7[%c0_6, %c0_7] : memref<16x128xf32, #tpu.memory_space<vmem>>, vector<16x128xf32>
    %cst = arith.constant dense<0.000000e+00> : vector<16x128xf32>
    %9 = tpu.matmul %5, %7, %cst {dimension_numbers = #tpu.dot_dimension_numbers<[1], [1], [0], [0], [0, 0, 1, 0], [], []>} : vector<16x128xbf16>, vector<128x128xbf16>, vector<16x128xf32> -> vector<16x128xf32>
    %10 = arith.addf %8, %9 : vector<16x128xf32>
    %c0_8 = arith.constant 0 : index
    %c0_9 = arith.constant 0 : index
    %11 = vector.load %arg7[%c0_8, %c0_9] : memref<16x128xf32, #tpu.memory_space<vmem>>, vector<16x128xf32>
    tpu.vector_store %arg7[%c0_8, %c0_9], %10 {strides = array<i32>} : memref<16x128xf32, #tpu.memory_space<vmem>>, vector<16x128xf32>,
    %c1_i32 = arith.constant 1 : i32
    %12 = arith.cmpi eq, %arg2, %c1_i32 : i32
    %13 = arith.extui %12 : i1 to i32
    %c0_i32_10 = arith.constant 0 : i32
    %14 = arith.cmpi ne, %13, %c0_i32_10 : i32
    scf.if %14 {
      %c0_11 = arith.constant 0 : index
      %c0_12 = arith.constant 0 : index
      %15 = vector.load %arg7[%c0_11, %c0_12] : memref<16x128xf32, #tpu.memory_space<vmem>>, vector<16x128xf32>
      %cst_13 = arith.constant 8.500000e-01 : f32
      %16 = vector.broadcast %cst_13 : f32 to vector<16x128xf32>
      %17 = arith.mulf %16, %15 : vector<16x128xf32>
      %c0_14 = arith.constant 0 : index
      %c0_15 = arith.constant 0 : index
      %c0_16 = arith.constant 0 : index
      %18 = vector.load %arg5[%c0_14, %c0_15, %c0_16] : memref<1x16x128xf32, #tpu.memory_space<vmem>>, vector<1x16x128xf32>
      %19 = vector.shape_cast %18 : vector<1x16x128xf32> to vector<16x128xf32>
      %cst_17 = arith.constant 1.500000e-01 : f32
      %20 = vector.broadcast %cst_17 : f32 to vector<16x128xf32>
      %21 = arith.mulf %20, %19 : vector<16x128xf32>
      %22 = arith.addf %17, %21 : vector<16x128xf32>
      %c0_18 = arith.constant 0 : index
      %c0_19 = arith.constant 0 : index
      %c0_20 = arith.constant 0 : index
      %23 = vector.load %arg6[%c0_18, %c0_19, %c0_20] : memref<1x16x128xf32, #tpu.memory_space<vmem>>, vector<1x16x128xf32>
      %24 = vector.shape_cast %23 : vector<1x16x128xf32> to vector<16x128xf32>
      %25 = vector.shape_cast %22 : vector<16x128xf32> to vector<1x16x128xf32>
      tpu.vector_store %arg6[%c0_18, %c0_19, %c0_20], %25 {strides = array<i32>} : memref<1x16x128xf32, #tpu.memory_space<vmem>>, vector<1x16x128xf32>,
    } else {
    }
    return
  }
  func.func @transform_0(%arg0: i32, %arg1: i32, %arg2: i32) -> (i32, i32, i32) {
    %c0_i32 = arith.constant 0 : i32
    return %arg0, %arg1, %arg2 : i32, i32, i32
  }
  func.func @transform_1(%arg0: i32, %arg1: i32, %arg2: i32) -> (i32, i32, i32) {
    %c0_i32 = arith.constant 0 : i32
    %c0_i32_0 = arith.constant 0 : i32
    return %arg0, %c0_i32, %arg2 : i32, i32, i32
  }
  func.func @transform_2(%arg0: i32, %arg1: i32, %arg2: i32) -> (i32, i32, i32) {
    %c0_i32 = arith.constant 0 : i32
    %c0_i32_0 = arith.constant 0 : i32
    return %arg0, %c0_i32, %arg1 : i32, i32, i32
  }
  func.func @transform_3(%arg0: i32, %arg1: i32, %arg2: i32) -> (i32, i32, i32) {
    %c0_i32 = arith.constant 0 : i32
    %c0_i32_0 = arith.constant 0 : i32
    return %arg0, %c0_i32, %arg1 : i32, i32, i32
  }
}

module attributes {stable_mosaic.version = 11 : i64} {
  func.func @_attn_kernel(%arg0: i32, %arg1: i32, %arg2: memref<1x1x256xf32, #tpu.memory_space<vmem>>, %arg3: memref<1x128x1xf32, #tpu.memory_space<vmem>>, %arg4: memref<128x256xf32, #tpu.memory_space<vmem>>, %arg5: memref<1x128x256xbf16, #tpu.memory_space<vmem>>) attributes {dimension_semantics = [#tpu.dimension_semantics<parallel>, #tpu.dimension_semantics<parallel>], iteration_bounds = array<i64: 4, 2>, scalar_prefetch = 0 : i64, scratch_operands = 0 : i64, tpu.core_type = #tpu.core_type<tc>, window_params = [{transform_indices = @transform_0, window_bounds = array<i64: 1, 1, 256>}, {transform_indices = @transform_1, window_bounds = array<i64: 1, 128, 1>}, {transform_indices = @transform_2, window_bounds = array<i64: 128, 256>}, {transform_indices = @transform_3, window_bounds = array<i64: 1, 128, 256>}]} {
    %c0 = arith.constant 0 : index
    %c0_0 = arith.constant 0 : index
    %c0_1 = arith.constant 0 : index
    %0 = vector.load %arg2[%c0, %c0_0, %c0_1] : memref<1x1x256xf32, #tpu.memory_space<vmem>>, vector<1x1x256xf32>
    %1 = vector.shape_cast %0 : vector<1x1x256xf32> to vector<1x256xf32>
    %c0_2 = arith.constant 0 : index
    %c0_3 = arith.constant 0 : index
    %c0_4 = arith.constant 0 : index
    %2 = vector.load %arg3[%c0_2, %c0_3, %c0_4] : memref<1x128x1xf32, #tpu.memory_space<vmem>>, vector<1x128x1xf32>
    %3 = vector.shape_cast %2 : vector<1x128x1xf32> to vector<128x1xf32>
    %4 = vector.broadcast %3 : vector<128x1xf32> to vector<128x256xf32>
    %5 = vector.broadcast %1 : vector<1x256xf32> to vector<128x256xf32>
    %6 = arith.addf %4, %5 : vector<128x256xf32>
    %cst = arith.constant 0.000000e+00 : f32
    %7 = vector.broadcast %cst : f32 to vector<128x256xf32>
    %8 = arith.cmpf ogt, %6, %7 : vector<128x256xf32>
    %cst_5 = arith.constant 2.000000e-01 : f32
    %9 = vector.broadcast %cst_5 : f32 to vector<128x256xf32>
    %10 = arith.mulf %9, %6 : vector<128x256xf32>
    %11 = arith.select %8, %6, %10 : vector<128x256xi1>, vector<128x256xf32>
    %c0_6 = arith.constant 0 : index
    %c0_7 = arith.constant 0 : index
    %12 = vector.load %arg4[%c0_6, %c0_7] : memref<128x256xf32, #tpu.memory_space<vmem>>, vector<128x256xf32>
    %cst_8 = arith.constant 0.000000e+00 : f32
    %13 = vector.broadcast %cst_8 : f32 to vector<128x256xf32>
    %14 = arith.cmpf ogt, %12, %13 : vector<128x256xf32>
    %cst_9 = arith.constant -1.000000e+30 : f32
    %15 = vector.broadcast %cst_9 : f32 to vector<128x256xf32>
    %16 = arith.select %14, %11, %15 : vector<128x256xi1>, vector<128x256xf32>
    %cst_10 = arith.constant dense<0xFF800000> : vector<128xf32>
    %17 = vector.multi_reduction <maximumf>, %16, %cst_10 [1] : vector<128x256xf32> to vector<128xf32>
    %18 = vector.shape_cast %17 : vector<128xf32> to vector<128x1xf32>
    %19 = vector.broadcast %18 : vector<128x1xf32> to vector<128x256xf32>
    %20 = arith.subf %16, %19 : vector<128x256xf32>
    %21 = math.exp %20 : vector<128x256xf32>
    %cst_11 = arith.constant 0.000000e+00 : f32
    %22 = vector.broadcast %cst_11 : f32 to vector<128x256xf32>
    %23 = arith.select %14, %21, %22 : vector<128x256xi1>, vector<128x256xf32>
    %cst_12 = arith.constant dense<0.000000e+00> : vector<128xf32>
    %24 = vector.multi_reduction <add>, %23, %cst_12 [1] : vector<128x256xf32> to vector<128xf32>
    %25 = vector.shape_cast %24 : vector<128xf32> to vector<128x1xf32>
    %cst_13 = arith.constant 0.000000e+00 : f32
    %26 = vector.broadcast %cst_13 : f32 to vector<128x1xf32>
    %27 = arith.cmpf ogt, %25, %26 : vector<128x1xf32>
    %cst_14 = arith.constant 1.000000e+00 : f32
    %28 = vector.broadcast %cst_14 : f32 to vector<128x1xf32>
    %29 = arith.select %27, %25, %28 : vector<128x1xi1>, vector<128x1xf32>
    %30 = tpu.reciprocal %29 {approx = true} : vector<128x1xf32> -> vector<128x1xf32>
    %31 = vector.broadcast %30 : vector<128x1xf32> to vector<128x256xf32>
    %32 = arith.mulf %23, %31 : vector<128x256xf32>
    %33 = arith.truncf %32 : vector<128x256xf32> to vector<128x256xbf16>
    %c0_15 = arith.constant 0 : index
    %c0_16 = arith.constant 0 : index
    %c0_17 = arith.constant 0 : index
    %34 = vector.load %arg5[%c0_15, %c0_16, %c0_17] : memref<1x128x256xbf16, #tpu.memory_space<vmem>>, vector<1x128x256xbf16>
    %35 = vector.shape_cast %34 : vector<1x128x256xbf16> to vector<128x256xbf16>
    %36 = vector.shape_cast %33 : vector<128x256xbf16> to vector<1x128x256xbf16>
    tpu.vector_store %arg5[%c0_15, %c0_16, %c0_17], %36 {strides = array<i32>} : memref<1x128x256xbf16, #tpu.memory_space<vmem>>, vector<1x128x256xbf16>,
    return
  }
  func.func @transform_0(%arg0: i32, %arg1: i32) -> (i32, i32, i32) {
    %c0_i32 = arith.constant 0 : i32
    %c0_i32_0 = arith.constant 0 : i32
    %c0_i32_1 = arith.constant 0 : i32
    return %arg0, %c0_i32, %c0_i32_0 : i32, i32, i32
  }
  func.func @transform_1(%arg0: i32, %arg1: i32) -> (i32, i32, i32) {
    %c0_i32 = arith.constant 0 : i32
    %c0_i32_0 = arith.constant 0 : i32
    return %arg0, %arg1, %c0_i32 : i32, i32, i32
  }
  func.func @transform_2(%arg0: i32, %arg1: i32) -> (i32, i32) {
    %c0_i32 = arith.constant 0 : i32
    %c0_i32_0 = arith.constant 0 : i32
    return %arg1, %c0_i32 : i32, i32
  }
  func.func @transform_3(%arg0: i32, %arg1: i32) -> (i32, i32, i32) {
    %c0_i32 = arith.constant 0 : i32
    %c0_i32_0 = arith.constant 0 : i32
    return %arg0, %arg1, %c0_i32 : i32, i32, i32
  }
}

module attributes {stable_mosaic.version = 11 : i64} {
  func.func @_proj_kernel(%arg0: i32, %arg1: memref<128x64xf32, #tpu.memory_space<vmem>>, %arg2: memref<1x64xf32, #tpu.memory_space<vmem>>, %arg3: memref<1x64xf32, #tpu.memory_space<vmem>>, %arg4: memref<64x64xbf16, #tpu.memory_space<vmem>>, %arg5: memref<64x1xf32, #tpu.memory_space<vmem>>, %arg6: memref<4x16xf32, #tpu.memory_space<vmem>>, %arg7: memref<128x64xf32, #tpu.memory_space<vmem>>, %arg8: memref<4x16x128xf32, #tpu.memory_space<vmem>>, %arg9: memref<4x1x128xf32, #tpu.memory_space<vmem>>, %arg10: memref<4x128x1xf32, #tpu.memory_space<vmem>>) attributes {dimension_semantics = [#tpu.dimension_semantics<parallel>], iteration_bounds = array<i64: 2>, scalar_prefetch = 0 : i64, scratch_operands = 0 : i64, tpu.core_type = #tpu.core_type<tc>, window_params = [{transform_indices = @transform_0, window_bounds = array<i64: 128, 64>}, {pipeline_mode = #tpu.pipeline_mode<synchronous>, transform_indices = @transform_1, window_bounds = array<i64: 1, 64>}, {pipeline_mode = #tpu.pipeline_mode<synchronous>, transform_indices = @transform_2, window_bounds = array<i64: 1, 64>}, {pipeline_mode = #tpu.pipeline_mode<synchronous>, transform_indices = @transform_3, window_bounds = array<i64: 64, 64>}, {pipeline_mode = #tpu.pipeline_mode<synchronous>, transform_indices = @transform_4, window_bounds = array<i64: 64, 1>}, {pipeline_mode = #tpu.pipeline_mode<synchronous>, transform_indices = @transform_5, window_bounds = array<i64: 4, 16>}, {transform_indices = @transform_6, window_bounds = array<i64: 128, 64>}, {transform_indices = @transform_7, window_bounds = array<i64: 4, 16, 128>}, {transform_indices = @transform_8, window_bounds = array<i64: 4, 1, 128>}, {transform_indices = @transform_9, window_bounds = array<i64: 4, 128, 1>}]} {
    %c0 = arith.constant 0 : index
    %c0_0 = arith.constant 0 : index
    %0 = vector.load %arg1[%c0, %c0_0] : memref<128x64xf32, #tpu.memory_space<vmem>>, vector<128x64xf32>
    %cst = arith.constant dense<0.000000e+00> : vector<128xf32>
    %1 = vector.multi_reduction <add>, %0, %cst [1] : vector<128x64xf32> to vector<128xf32>
    %2 = vector.shape_cast %1 : vector<128xf32> to vector<128x1xf32>
    %cst_1 = arith.constant 6.400000e+01 : f32
    %3 = vector.broadcast %cst_1 : f32 to vector<128x1xf32>
    %4 = arith.divf %2, %3 : vector<128x1xf32>
    %5 = vector.broadcast %4 : vector<128x1xf32> to vector<128x64xf32>
    %6 = arith.subf %0, %5 : vector<128x64xf32>
    %7 = arith.mulf %6, %6 : vector<128x64xf32>
    %cst_2 = arith.constant dense<0.000000e+00> : vector<128xf32>
    %8 = vector.multi_reduction <add>, %7, %cst_2 [1] : vector<128x64xf32> to vector<128xf32>
    %9 = vector.shape_cast %8 : vector<128xf32> to vector<128x1xf32>
    %cst_3 = arith.constant 6.400000e+01 : f32
    %10 = vector.broadcast %cst_3 : f32 to vector<128x1xf32>
    %11 = arith.divf %9, %10 : vector<128x1xf32>
    %12 = vector.broadcast %4 : vector<128x1xf32> to vector<128x64xf32>
    %13 = arith.subf %0, %12 : vector<128x64xf32>
    %cst_4 = arith.constant 9.99999974E-6 : f32
    %14 = vector.broadcast %cst_4 : f32 to vector<128x1xf32>
    %15 = arith.addf %11, %14 : vector<128x1xf32>
    %16 = math.rsqrt %15 : vector<128x1xf32>
    %17 = vector.broadcast %16 : vector<128x1xf32> to vector<128x64xf32>
    %18 = arith.mulf %13, %17 : vector<128x64xf32>
    %c0_5 = arith.constant 0 : index
    %c0_6 = arith.constant 0 : index
    %19 = vector.load %arg2[%c0_5, %c0_6] : memref<1x64xf32, #tpu.memory_space<vmem>>, vector<1x64xf32>
    %20 = vector.broadcast %19 : vector<1x64xf32> to vector<128x64xf32>
    %21 = arith.mulf %18, %20 : vector<128x64xf32>
    %c0_7 = arith.constant 0 : index
    %c0_8 = arith.constant 0 : index
    %22 = vector.load %arg3[%c0_7, %c0_8] : memref<1x64xf32, #tpu.memory_space<vmem>>, vector<1x64xf32>
    %23 = vector.broadcast %22 : vector<1x64xf32> to vector<128x64xf32>
    %24 = arith.addf %21, %23 : vector<128x64xf32>
    %c0_9 = arith.constant 0 : index
    %c0_10 = arith.constant 0 : index
    %25 = vector.load %arg7[%c0_9, %c0_10] : memref<128x64xf32, #tpu.memory_space<vmem>>, vector<128x64xf32>
    tpu.vector_store %arg7[%c0_9, %c0_10], %24 {strides = array<i32>} : memref<128x64xf32, #tpu.memory_space<vmem>>, vector<128x64xf32>,
    %26 = arith.truncf %24 : vector<128x64xf32> to vector<128x64xbf16>
    %c0_11 = arith.constant 0 : index
    %c0_12 = arith.constant 0 : index
    %27 = vector.load %arg4[%c0_11, %c0_12] : memref<64x64xbf16, #tpu.memory_space<vmem>>, vector<64x64xbf16>
    %cst_13 = arith.constant dense<0.000000e+00> : vector<128x64xf32>
    %28 = tpu.matmul %26, %27, %cst_13 {dimension_numbers = #tpu.dot_dimension_numbers<[1], [0], [0], [1], [0, 0, 1, 1], [], []>} : vector<128x64xbf16>, vector<64x64xbf16>, vector<128x64xf32> -> vector<128x64xf32>
    %29 = vector.extract_strided_slice %28 {offsets = [0, 0], sizes = [128, 16], strides = [1, 1]} : vector<128x64xf32> to vector<128x16xf32>
    %30 = tpu.transpose %29, [1, 0] : vector<128x16xf32> -> vector<16x128xf32>
    %c0_14 = arith.constant 0 : index
    %c0_15 = arith.constant 0 : index
    %c0_16 = arith.constant 0 : index
    %31 = vector.load %arg8[%c0_14, %c0_15, %c0_16] : memref<4x16x128xf32, #tpu.memory_space<vmem>>, vector<1x16x128xf32>
    %32 = vector.shape_cast %31 : vector<1x16x128xf32> to vector<16x128xf32>
    %33 = vector.shape_cast %30 : vector<16x128xf32> to vector<1x16x128xf32>
    tpu.vector_store %arg8[%c0_14, %c0_15, %c0_16], %33 {strides = array<i32>} : memref<4x16x128xf32, #tpu.memory_space<vmem>>, vector<1x16x128xf32>,
    %c0_17 = arith.constant 0 : index
    %c0_18 = arith.constant 0 : index
    %34 = vector.load %arg5[%c0_17, %c0_18] : memref<64x1xf32, #tpu.memory_space<vmem>>, vector<16x1xf32>
    %35 = vector.broadcast %34 : vector<16x1xf32> to vector<16x128xf32>
    %36 = arith.mulf %30, %35 : vector<16x128xf32>
    %cst_19 = arith.constant dense<0.000000e+00> : vector<128xf32>
    %37 = vector.multi_reduction <add>, %36, %cst_19 [0] : vector<16x128xf32> to vector<128xf32>
    %38 = vector.shape_cast %37 : vector<128xf32> to vector<1x128xf32>
    %c0_20 = arith.constant 0 : index
    %c0_21 = arith.constant 0 : index
    %c0_22 = arith.constant 0 : index
    %39 = vector.load %arg9[%c0_20, %c0_21, %c0_22] : memref<4x1x128xf32, #tpu.memory_space<vmem>>, vector<1x1x128xf32>
    %40 = vector.shape_cast %39 : vector<1x1x128xf32> to vector<1x128xf32>
    %41 = vector.shape_cast %38 : vector<1x128xf32> to vector<1x1x128xf32>
    tpu.vector_store %arg9[%c0_20, %c0_21, %c0_22], %41 {strides = array<i32>} : memref<4x1x128xf32, #tpu.memory_space<vmem>>, vector<1x1x128xf32>,
    %c0_23 = arith.constant 0 : index
    %c0_24 = arith.constant 0 : index
    %42 = vector.load %arg6[%c0_23, %c0_24] : memref<4x16xf32, #tpu.memory_space<vmem>>, vector<1x16xf32>
    %43 = vector.broadcast %42 : vector<1x16xf32> to vector<128x16xf32>
    %44 = arith.mulf %29, %43 : vector<128x16xf32>
    %cst_25 = arith.constant dense<0.000000e+00> : vector<128xf32>
    %45 = vector.multi_reduction <add>, %44, %cst_25 [1] : vector<128x16xf32> to vector<128xf32>
    %46 = vector.shape_cast %45 : vector<128xf32> to vector<128x1xf32>
    %c0_26 = arith.constant 0 : index
    %c0_27 = arith.constant 0 : index
    %c0_28 = arith.constant 0 : index
    %47 = vector.load %arg10[%c0_26, %c0_27, %c0_28] : memref<4x128x1xf32, #tpu.memory_space<vmem>>, vector<1x128x1xf32>
    %48 = vector.shape_cast %47 : vector<1x128x1xf32> to vector<128x1xf32>
    %49 = vector.shape_cast %46 : vector<128x1xf32> to vector<1x128x1xf32>
    tpu.vector_store %arg10[%c0_26, %c0_27, %c0_28], %49 {strides = array<i32>} : memref<4x128x1xf32, #tpu.memory_space<vmem>>, vector<1x128x1xf32>,
    %50 = vector.extract_strided_slice %28 {offsets = [0, 16], sizes = [128, 16], strides = [1, 1]} : vector<128x64xf32> to vector<128x16xf32>
    %51 = tpu.transpose %50, [1, 0] : vector<128x16xf32> -> vector<16x128xf32>
    %c1 = arith.constant 1 : index
    %c0_29 = arith.constant 0 : index
    %c0_30 = arith.constant 0 : index
    %52 = vector.load %arg8[%c1, %c0_29, %c0_30] : memref<4x16x128xf32, #tpu.memory_space<vmem>>, vector<1x16x128xf32>
    %53 = vector.shape_cast %52 : vector<1x16x128xf32> to vector<16x128xf32>
    %54 = vector.shape_cast %51 : vector<16x128xf32> to vector<1x16x128xf32>
    tpu.vector_store %arg8[%c1, %c0_29, %c0_30], %54 {strides = array<i32>} : memref<4x16x128xf32, #tpu.memory_space<vmem>>, vector<1x16x128xf32>,
    %c16 = arith.constant 16 : index
    %c0_31 = arith.constant 0 : index
    %55 = vector.load %arg5[%c16, %c0_31] : memref<64x1xf32, #tpu.memory_space<vmem>>, vector<16x1xf32>
    %56 = vector.broadcast %55 : vector<16x1xf32> to vector<16x128xf32>
    %57 = arith.mulf %51, %56 : vector<16x128xf32>
    %cst_32 = arith.constant dense<0.000000e+00> : vector<128xf32>
    %58 = vector.multi_reduction <add>, %57, %cst_32 [0] : vector<16x128xf32> to vector<128xf32>
    %59 = vector.shape_cast %58 : vector<128xf32> to vector<1x128xf32>
    %c1_33 = arith.constant 1 : index
    %c0_34 = arith.constant 0 : index
    %c0_35 = arith.constant 0 : index
    %60 = vector.load %arg9[%c1_33, %c0_34, %c0_35] : memref<4x1x128xf32, #tpu.memory_space<vmem>>, vector<1x1x128xf32>
    %61 = vector.shape_cast %60 : vector<1x1x128xf32> to vector<1x128xf32>
    %62 = vector.shape_cast %59 : vector<1x128xf32> to vector<1x1x128xf32>
    tpu.vector_store %arg9[%c1_33, %c0_34, %c0_35], %62 {strides = array<i32>} : memref<4x1x128xf32, #tpu.memory_space<vmem>>, vector<1x1x128xf32>,
    %c1_36 = arith.constant 1 : index
    %c0_37 = arith.constant 0 : index
    %63 = vector.load %arg6[%c1_36, %c0_37] : memref<4x16xf32, #tpu.memory_space<vmem>>, vector<1x16xf32>
    %64 = vector.broadcast %63 : vector<1x16xf32> to vector<128x16xf32>
    %65 = arith.mulf %50, %64 : vector<128x16xf32>
    %cst_38 = arith.constant dense<0.000000e+00> : vector<128xf32>
    %66 = vector.multi_reduction <add>, %65, %cst_38 [1] : vector<128x16xf32> to vector<128xf32>
    %67 = vector.shape_cast %66 : vector<128xf32> to vector<128x1xf32>
    %c1_39 = arith.constant 1 : index
    %c0_40 = arith.constant 0 : index
    %c0_41 = arith.constant 0 : index
    %68 = vector.load %arg10[%c1_39, %c0_40, %c0_41] : memref<4x128x1xf32, #tpu.memory_space<vmem>>, vector<1x128x1xf32>
    %69 = vector.shape_cast %68 : vector<1x128x1xf32> to vector<128x1xf32>
    %70 = vector.shape_cast %67 : vector<128x1xf32> to vector<1x128x1xf32>
    tpu.vector_store %arg10[%c1_39, %c0_40, %c0_41], %70 {strides = array<i32>} : memref<4x128x1xf32, #tpu.memory_space<vmem>>, vector<1x128x1xf32>,
    %71 = vector.extract_strided_slice %28 {offsets = [0, 32], sizes = [128, 16], strides = [1, 1]} : vector<128x64xf32> to vector<128x16xf32>
    %72 = tpu.transpose %71, [1, 0] : vector<128x16xf32> -> vector<16x128xf32>
    %c2 = arith.constant 2 : index
    %c0_42 = arith.constant 0 : index
    %c0_43 = arith.constant 0 : index
    %73 = vector.load %arg8[%c2, %c0_42, %c0_43] : memref<4x16x128xf32, #tpu.memory_space<vmem>>, vector<1x16x128xf32>
    %74 = vector.shape_cast %73 : vector<1x16x128xf32> to vector<16x128xf32>
    %75 = vector.shape_cast %72 : vector<16x128xf32> to vector<1x16x128xf32>
    tpu.vector_store %arg8[%c2, %c0_42, %c0_43], %75 {strides = array<i32>} : memref<4x16x128xf32, #tpu.memory_space<vmem>>, vector<1x16x128xf32>,
    %c32 = arith.constant 32 : index
    %c0_44 = arith.constant 0 : index
    %76 = vector.load %arg5[%c32, %c0_44] : memref<64x1xf32, #tpu.memory_space<vmem>>, vector<16x1xf32>
    %77 = vector.broadcast %76 : vector<16x1xf32> to vector<16x128xf32>
    %78 = arith.mulf %72, %77 : vector<16x128xf32>
    %cst_45 = arith.constant dense<0.000000e+00> : vector<128xf32>
    %79 = vector.multi_reduction <add>, %78, %cst_45 [0] : vector<16x128xf32> to vector<128xf32>
    %80 = vector.shape_cast %79 : vector<128xf32> to vector<1x128xf32>
    %c2_46 = arith.constant 2 : index
    %c0_47 = arith.constant 0 : index
    %c0_48 = arith.constant 0 : index
    %81 = vector.load %arg9[%c2_46, %c0_47, %c0_48] : memref<4x1x128xf32, #tpu.memory_space<vmem>>, vector<1x1x128xf32>
    %82 = vector.shape_cast %81 : vector<1x1x128xf32> to vector<1x128xf32>
    %83 = vector.shape_cast %80 : vector<1x128xf32> to vector<1x1x128xf32>
    tpu.vector_store %arg9[%c2_46, %c0_47, %c0_48], %83 {strides = array<i32>} : memref<4x1x128xf32, #tpu.memory_space<vmem>>, vector<1x1x128xf32>,
    %c2_49 = arith.constant 2 : index
    %c0_50 = arith.constant 0 : index
    %84 = vector.load %arg6[%c2_49, %c0_50] : memref<4x16xf32, #tpu.memory_space<vmem>>, vector<1x16xf32>
    %85 = vector.broadcast %84 : vector<1x16xf32> to vector<128x16xf32>
    %86 = arith.mulf %71, %85 : vector<128x16xf32>
    %cst_51 = arith.constant dense<0.000000e+00> : vector<128xf32>
    %87 = vector.multi_reduction <add>, %86, %cst_51 [1] : vector<128x16xf32> to vector<128xf32>
    %88 = vector.shape_cast %87 : vector<128xf32> to vector<128x1xf32>
    %c2_52 = arith.constant 2 : index
    %c0_53 = arith.constant 0 : index
    %c0_54 = arith.constant 0 : index
    %89 = vector.load %arg10[%c2_52, %c0_53, %c0_54] : memref<4x128x1xf32, #tpu.memory_space<vmem>>, vector<1x128x1xf32>
    %90 = vector.shape_cast %89 : vector<1x128x1xf32> to vector<128x1xf32>
    %91 = vector.shape_cast %88 : vector<128x1xf32> to vector<1x128x1xf32>
    tpu.vector_store %arg10[%c2_52, %c0_53, %c0_54], %91 {strides = array<i32>} : memref<4x128x1xf32, #tpu.memory_space<vmem>>, vector<1x128x1xf32>,
    %92 = vector.extract_strided_slice %28 {offsets = [0, 48], sizes = [128, 16], strides = [1, 1]} : vector<128x64xf32> to vector<128x16xf32>
    %93 = tpu.transpose %92, [1, 0] : vector<128x16xf32> -> vector<16x128xf32>
    %c3 = arith.constant 3 : index
    %c0_55 = arith.constant 0 : index
    %c0_56 = arith.constant 0 : index
    %94 = vector.load %arg8[%c3, %c0_55, %c0_56] : memref<4x16x128xf32, #tpu.memory_space<vmem>>, vector<1x16x128xf32>
    %95 = vector.shape_cast %94 : vector<1x16x128xf32> to vector<16x128xf32>
    %96 = vector.shape_cast %93 : vector<16x128xf32> to vector<1x16x128xf32>
    tpu.vector_store %arg8[%c3, %c0_55, %c0_56], %96 {strides = array<i32>} : memref<4x16x128xf32, #tpu.memory_space<vmem>>, vector<1x16x128xf32>,
    %c48 = arith.constant 48 : index
    %c0_57 = arith.constant 0 : index
    %97 = vector.load %arg5[%c48, %c0_57] : memref<64x1xf32, #tpu.memory_space<vmem>>, vector<16x1xf32>
    %98 = vector.broadcast %97 : vector<16x1xf32> to vector<16x128xf32>
    %99 = arith.mulf %93, %98 : vector<16x128xf32>
    %cst_58 = arith.constant dense<0.000000e+00> : vector<128xf32>
    %100 = vector.multi_reduction <add>, %99, %cst_58 [0] : vector<16x128xf32> to vector<128xf32>
    %101 = vector.shape_cast %100 : vector<128xf32> to vector<1x128xf32>
    %c3_59 = arith.constant 3 : index
    %c0_60 = arith.constant 0 : index
    %c0_61 = arith.constant 0 : index
    %102 = vector.load %arg9[%c3_59, %c0_60, %c0_61] : memref<4x1x128xf32, #tpu.memory_space<vmem>>, vector<1x1x128xf32>
    %103 = vector.shape_cast %102 : vector<1x1x128xf32> to vector<1x128xf32>
    %104 = vector.shape_cast %101 : vector<1x128xf32> to vector<1x1x128xf32>
    tpu.vector_store %arg9[%c3_59, %c0_60, %c0_61], %104 {strides = array<i32>} : memref<4x1x128xf32, #tpu.memory_space<vmem>>, vector<1x1x128xf32>,
    %c3_62 = arith.constant 3 : index
    %c0_63 = arith.constant 0 : index
    %105 = vector.load %arg6[%c3_62, %c0_63] : memref<4x16xf32, #tpu.memory_space<vmem>>, vector<1x16xf32>
    %106 = vector.broadcast %105 : vector<1x16xf32> to vector<128x16xf32>
    %107 = arith.mulf %92, %106 : vector<128x16xf32>
    %cst_64 = arith.constant dense<0.000000e+00> : vector<128xf32>
    %108 = vector.multi_reduction <add>, %107, %cst_64 [1] : vector<128x16xf32> to vector<128xf32>
    %109 = vector.shape_cast %108 : vector<128xf32> to vector<128x1xf32>
    %c3_65 = arith.constant 3 : index
    %c0_66 = arith.constant 0 : index
    %c0_67 = arith.constant 0 : index
    %110 = vector.load %arg10[%c3_65, %c0_66, %c0_67] : memref<4x128x1xf32, #tpu.memory_space<vmem>>, vector<1x128x1xf32>
    %111 = vector.shape_cast %110 : vector<1x128x1xf32> to vector<128x1xf32>
    %112 = vector.shape_cast %109 : vector<128x1xf32> to vector<1x128x1xf32>
    tpu.vector_store %arg10[%c3_65, %c0_66, %c0_67], %112 {strides = array<i32>} : memref<4x128x1xf32, #tpu.memory_space<vmem>>, vector<1x128x1xf32>,
    return
  }
  func.func @transform_0(%arg0: i32) -> (i32, i32) {
    %c0_i32 = arith.constant 0 : i32
    %c0_i32_0 = arith.constant 0 : i32
    return %arg0, %c0_i32 : i32, i32
  }
  func.func @transform_1(%arg0: i32) -> (i32, i32) {
    %c0_i32 = arith.constant 0 : i32
    %c0_i32_0 = arith.constant 0 : i32
    %c0_i32_1 = arith.constant 0 : i32
    return %c0_i32, %c0_i32_0 : i32, i32
  }
  func.func @transform_2(%arg0: i32) -> (i32, i32) {
    %c0_i32 = arith.constant 0 : i32
    %c0_i32_0 = arith.constant 0 : i32
    %c0_i32_1 = arith.constant 0 : i32
    return %c0_i32, %c0_i32_0 : i32, i32
  }
  func.func @transform_3(%arg0: i32) -> (i32, i32) {
    %c0_i32 = arith.constant 0 : i32
    %c0_i32_0 = arith.constant 0 : i32
    %c0_i32_1 = arith.constant 0 : i32
    return %c0_i32, %c0_i32_0 : i32, i32
  }
  func.func @transform_4(%arg0: i32) -> (i32, i32) {
    %c0_i32 = arith.constant 0 : i32
    %c0_i32_0 = arith.constant 0 : i32
    %c0_i32_1 = arith.constant 0 : i32
    return %c0_i32, %c0_i32_0 : i32, i32
  }
  func.func @transform_5(%arg0: i32) -> (i32, i32) {
    %c0_i32 = arith.constant 0 : i32
    %c0_i32_0 = arith.constant 0 : i32
    %c0_i32_1 = arith.constant 0 : i32
    return %c0_i32, %c0_i32_0 : i32, i32
  }
  func.func @transform_6(%arg0: i32) -> (i32, i32) {
    %c0_i32 = arith.constant 0 : i32
    %c0_i32_0 = arith.constant 0 : i32
    return %arg0, %c0_i32 : i32, i32
  }
  func.func @transform_7(%arg0: i32) -> (i32, i32, i32) {
    %c0_i32 = arith.constant 0 : i32
    %c0_i32_0 = arith.constant 0 : i32
    %c0_i32_1 = arith.constant 0 : i32
    return %c0_i32, %c0_i32_0, %arg0 : i32, i32, i32
  }
  func.func @transform_8(%arg0: i32) -> (i32, i32, i32) {
    %c0_i32 = arith.constant 0 : i32
    %c0_i32_0 = arith.constant 0 : i32
    %c0_i32_1 = arith.constant 0 : i32
    return %c0_i32, %c0_i32_0, %arg0 : i32, i32, i32
  }
  func.func @transform_9(%arg0: i32) -> (i32, i32, i32) {
    %c0_i32 = arith.constant 0 : i32
    %c0_i32_0 = arith.constant 0 : i32
    %c0_i32_1 = arith.constant 0 : i32
    return %c0_i32, %arg0, %c0_i32_0 : i32, i32, i32
  }
}

module attributes {stable_mosaic.version = 11 : i64} {
  func.func @_ffn_kernel(%arg0: i32, %arg1: i32, %arg2: memref<4x16x128xf32, #tpu.memory_space<vmem>>, %arg3: memref<128x64xf32, #tpu.memory_space<vmem>>, %arg4: memref<1x64xf32, #tpu.memory_space<vmem>>, %arg5: memref<1x64xf32, #tpu.memory_space<vmem>>, %arg6: memref<64x128xbf16, #tpu.memory_space<vmem>>, %arg7: memref<1x128xf32, #tpu.memory_space<vmem>>, %arg8: memref<128x64xbf16, #tpu.memory_space<vmem>>, %arg9: memref<1x64xf32, #tpu.memory_space<vmem>>, %arg10: memref<128x64xf32, #tpu.memory_space<vmem>>, %arg11: memref<128x64xf32, #tpu.memory_space<vmem>>, %arg12: memref<128x64xf32, #tpu.memory_space<vmem>>) attributes {dimension_semantics = [#tpu.dimension_semantics<parallel>, #tpu.dimension_semantics<arbitrary>], iteration_bounds = array<i64: 2, 2>, scalar_prefetch = 0 : i64, scratch_operands = 2 : i64, tpu.core_type = #tpu.core_type<tc>, window_params = [{transform_indices = @transform_0, window_bounds = array<i64: 4, 16, 128>}, {transform_indices = @transform_1, window_bounds = array<i64: 128, 64>}, {pipeline_mode = #tpu.pipeline_mode<synchronous>, transform_indices = @transform_2, window_bounds = array<i64: 1, 64>}, {pipeline_mode = #tpu.pipeline_mode<synchronous>, transform_indices = @transform_3, window_bounds = array<i64: 1, 64>}, {transform_indices = @transform_4, window_bounds = array<i64: 64, 128>}, {transform_indices = @transform_5, window_bounds = array<i64: 1, 128>}, {transform_indices = @transform_6, window_bounds = array<i64: 128, 64>}, {pipeline_mode = #tpu.pipeline_mode<synchronous>, transform_indices = @transform_7, window_bounds = array<i64: 1, 64>}, {transform_indices = @transform_8, window_bounds = array<i64: 128, 64>}]} {
    %c0_i32 = arith.constant 0 : i32
    %0 = arith.cmpi eq, %arg1, %c0_i32 : i32
    %1 = arith.extui %0 : i1 to i32
    %c0_i32_0 = arith.constant 0 : i32
    %2 = arith.cmpi ne, %1, %c0_i32_0 : i32
    scf.if %2 {
      %c0_15 = arith.constant 0 : index
      %c0_16 = arith.constant 0 : index
      %c0_17 = arith.constant 0 : index
      %21 = vector.load %arg2[%c0_15, %c0_16, %c0_17] : memref<4x16x128xf32, #tpu.memory_space<vmem>>, vector<1x16x128xf32>
      %22 = vector.shape_cast %21 : vector<1x16x128xf32> to vector<16x128xf32>
      %23 = tpu.transpose %22, [1, 0] : vector<16x128xf32> -> vector<128x16xf32>
      %c1 = arith.constant 1 : index
      %c0_18 = arith.constant 0 : index
      %c0_19 = arith.constant 0 : index
      %24 = vector.load %arg2[%c1, %c0_18, %c0_19] : memref<4x16x128xf32, #tpu.memory_space<vmem>>, vector<1x16x128xf32>
      %25 = vector.shape_cast %24 : vector<1x16x128xf32> to vector<16x128xf32>
      %26 = tpu.transpose %25, [1, 0] : vector<16x128xf32> -> vector<128x16xf32>
      %c2 = arith.constant 2 : index
      %c0_20 = arith.constant 0 : index
      %c0_21 = arith.constant 0 : index
      %27 = vector.load %arg2[%c2, %c0_20, %c0_21] : memref<4x16x128xf32, #tpu.memory_space<vmem>>, vector<1x16x128xf32>
      %28 = vector.shape_cast %27 : vector<1x16x128xf32> to vector<16x128xf32>
      %29 = tpu.transpose %28, [1, 0] : vector<16x128xf32> -> vector<128x16xf32>
      %c3 = arith.constant 3 : index
      %c0_22 = arith.constant 0 : index
      %c0_23 = arith.constant 0 : index
      %30 = vector.load %arg2[%c3, %c0_22, %c0_23] : memref<4x16x128xf32, #tpu.memory_space<vmem>>, vector<1x16x128xf32>
      %31 = vector.shape_cast %30 : vector<1x16x128xf32> to vector<16x128xf32>
      %32 = tpu.transpose %31, [1, 0] : vector<16x128xf32> -> vector<128x16xf32>
      %33 = tpu.concatenate %23, %26, %29, %32 in 1 : vector<128x16xf32>, vector<128x16xf32>, vector<128x16xf32>, vector<128x16xf32> -> vector<128x64xf32>
      %c0_24 = arith.constant 0 : index
      %c0_25 = arith.constant 0 : index
      %34 = vector.load %arg3[%c0_24, %c0_25] : memref<128x64xf32, #tpu.memory_space<vmem>>, vector<128x64xf32>
      %35 = arith.addf %33, %34 : vector<128x64xf32>
      %c0_26 = arith.constant 0 : index
      %c0_27 = arith.constant 0 : index
      %36 = vector.load %arg11[%c0_26, %c0_27] : memref<128x64xf32, #tpu.memory_space<vmem>>, vector<128x64xf32>
      tpu.vector_store %arg11[%c0_26, %c0_27], %35 {strides = array<i32>} : memref<128x64xf32, #tpu.memory_space<vmem>>, vector<128x64xf32>,
      %cst_28 = arith.constant dense<0.000000e+00> : vector<128xf32>
      %37 = vector.multi_reduction <add>, %35, %cst_28 [1] : vector<128x64xf32> to vector<128xf32>
      %38 = vector.shape_cast %37 : vector<128xf32> to vector<128x1xf32>
      %cst_29 = arith.constant 6.400000e+01 : f32
      %39 = vector.broadcast %cst_29 : f32 to vector<128x1xf32>
      %40 = arith.divf %38, %39 : vector<128x1xf32>
      %41 = vector.broadcast %40 : vector<128x1xf32> to vector<128x64xf32>
      %42 = arith.subf %35, %41 : vector<128x64xf32>
      %43 = arith.mulf %42, %42 : vector<128x64xf32>
      %cst_30 = arith.constant dense<0.000000e+00> : vector<128xf32>
      %44 = vector.multi_reduction <add>, %43, %cst_30 [1] : vector<128x64xf32> to vector<128xf32>
      %45 = vector.shape_cast %44 : vector<128xf32> to vector<128x1xf32>
      %cst_31 = arith.constant 6.400000e+01 : f32
      %46 = vector.broadcast %cst_31 : f32 to vector<128x1xf32>
      %47 = arith.divf %45, %46 : vector<128x1xf32>
      %48 = vector.broadcast %40 : vector<128x1xf32> to vector<128x64xf32>
      %49 = arith.subf %35, %48 : vector<128x64xf32>
      %cst_32 = arith.constant 9.99999974E-6 : f32
      %50 = vector.broadcast %cst_32 : f32 to vector<128x1xf32>
      %51 = arith.addf %47, %50 : vector<128x1xf32>
      %52 = math.rsqrt %51 : vector<128x1xf32>
      %53 = vector.broadcast %52 : vector<128x1xf32> to vector<128x64xf32>
      %54 = arith.mulf %49, %53 : vector<128x64xf32>
      %c0_33 = arith.constant 0 : index
      %c0_34 = arith.constant 0 : index
      %55 = vector.load %arg4[%c0_33, %c0_34] : memref<1x64xf32, #tpu.memory_space<vmem>>, vector<1x64xf32>
      %56 = vector.broadcast %55 : vector<1x64xf32> to vector<128x64xf32>
      %57 = arith.mulf %54, %56 : vector<128x64xf32>
      %c0_35 = arith.constant 0 : index
      %c0_36 = arith.constant 0 : index
      %58 = vector.load %arg5[%c0_35, %c0_36] : memref<1x64xf32, #tpu.memory_space<vmem>>, vector<1x64xf32>
      %59 = vector.broadcast %58 : vector<1x64xf32> to vector<128x64xf32>
      %60 = arith.addf %57, %59 : vector<128x64xf32>
      %c0_37 = arith.constant 0 : index
      %c0_38 = arith.constant 0 : index
      %61 = vector.load %arg12[%c0_37, %c0_38] : memref<128x64xf32, #tpu.memory_space<vmem>>, vector<128x64xf32>
      tpu.vector_store %arg12[%c0_37, %c0_38], %60 {strides = array<i32>} : memref<128x64xf32, #tpu.memory_space<vmem>>, vector<128x64xf32>,
    } else {
    }
    %c0 = arith.constant 0 : index
    %c0_1 = arith.constant 0 : index
    %3 = vector.load %arg12[%c0, %c0_1] : memref<128x64xf32, #tpu.memory_space<vmem>>, vector<128x64xf32>
    %4 = arith.truncf %3 : vector<128x64xf32> to vector<128x64xbf16>
    %c0_2 = arith.constant 0 : index
    %c0_3 = arith.constant 0 : index
    %5 = vector.load %arg6[%c0_2, %c0_3] : memref<64x128xbf16, #tpu.memory_space<vmem>>, vector<64x128xbf16>
    %cst = arith.constant dense<0.000000e+00> : vector<128x128xf32>
    %6 = tpu.matmul %4, %5, %cst {dimension_numbers = #tpu.dot_dimension_numbers<[1], [0], [0], [1], [0, 0, 1, 1], [], []>} : vector<128x64xbf16>, vector<64x128xbf16>, vector<128x128xf32> -> vector<128x128xf32>
    %c0_4 = arith.constant 0 : index
    %c0_5 = arith.constant 0 : index
    %7 = vector.load %arg7[%c0_4, %c0_5] : memref<1x128xf32, #tpu.memory_space<vmem>>, vector<1x128xf32>
    %8 = vector.broadcast %7 : vector<1x128xf32> to vector<128x128xf32>
    %9 = arith.addf %6, %8 : vector<128x128xf32>
    %cst_6 = arith.constant 0.000000e+00 : f32
    %10 = vector.broadcast %cst_6 : f32 to vector<128x128xf32>
    %11 = arith.maximumf %9, %10 : vector<128x128xf32>
    %c0_7 = arith.constant 0 : index
    %c0_8 = arith.constant 0 : index
    %12 = vector.load %arg11[%c0_7, %c0_8] : memref<128x64xf32, #tpu.memory_space<vmem>>, vector<128x64xf32>
    %13 = arith.truncf %11 : vector<128x128xf32> to vector<128x128xbf16>
    %c0_9 = arith.constant 0 : index
    %c0_10 = arith.constant 0 : index
    %14 = vector.load %arg8[%c0_9, %c0_10] : memref<128x64xbf16, #tpu.memory_space<vmem>>, vector<128x64xbf16>
    %cst_11 = arith.constant dense<0.000000e+00> : vector<128x64xf32>
    %15 = tpu.matmul %13, %14, %cst_11 {dimension_numbers = #tpu.dot_dimension_numbers<[1], [0], [0], [1], [0, 0, 1, 1], [], []>} : vector<128x128xbf16>, vector<128x64xbf16>, vector<128x64xf32> -> vector<128x64xf32>
    %16 = arith.addf %12, %15 : vector<128x64xf32>
    %c0_12 = arith.constant 0 : index
    %c0_13 = arith.constant 0 : index
    %17 = vector.load %arg11[%c0_12, %c0_13] : memref<128x64xf32, #tpu.memory_space<vmem>>, vector<128x64xf32>
    tpu.vector_store %arg11[%c0_12, %c0_13], %16 {strides = array<i32>} : memref<128x64xf32, #tpu.memory_space<vmem>>, vector<128x64xf32>,
    %c1_i32 = arith.constant 1 : i32
    %18 = arith.cmpi eq, %arg1, %c1_i32 : i32
    %19 = arith.extui %18 : i1 to i32
    %c0_i32_14 = arith.constant 0 : i32
    %20 = arith.cmpi ne, %19, %c0_i32_14 : i32
    scf.if %20 {
      %c0_15 = arith.constant 0 : index
      %c0_16 = arith.constant 0 : index
      %21 = vector.load %arg11[%c0_15, %c0_16] : memref<128x64xf32, #tpu.memory_space<vmem>>, vector<128x64xf32>
      %c0_17 = arith.constant 0 : index
      %c0_18 = arith.constant 0 : index
      %22 = vector.load %arg9[%c0_17, %c0_18] : memref<1x64xf32, #tpu.memory_space<vmem>>, vector<1x64xf32>
      %23 = vector.broadcast %22 : vector<1x64xf32> to vector<128x64xf32>
      %24 = arith.addf %21, %23 : vector<128x64xf32>
      %c0_19 = arith.constant 0 : index
      %c0_20 = arith.constant 0 : index
      %25 = vector.load %arg10[%c0_19, %c0_20] : memref<128x64xf32, #tpu.memory_space<vmem>>, vector<128x64xf32>
      tpu.vector_store %arg10[%c0_19, %c0_20], %24 {strides = array<i32>} : memref<128x64xf32, #tpu.memory_space<vmem>>, vector<128x64xf32>,
    } else {
    }
    return
  }
  func.func @transform_0(%arg0: i32, %arg1: i32) -> (i32, i32, i32) {
    %c0_i32 = arith.constant 0 : i32
    %c0_i32_0 = arith.constant 0 : i32
    %c0_i32_1 = arith.constant 0 : i32
    return %c0_i32, %c0_i32_0, %arg0 : i32, i32, i32
  }
  func.func @transform_1(%arg0: i32, %arg1: i32) -> (i32, i32) {
    %c0_i32 = arith.constant 0 : i32
    %c0_i32_0 = arith.constant 0 : i32
    return %arg0, %c0_i32 : i32, i32
  }
  func.func @transform_2(%arg0: i32, %arg1: i32) -> (i32, i32) {
    %c0_i32 = arith.constant 0 : i32
    %c0_i32_0 = arith.constant 0 : i32
    %c0_i32_1 = arith.constant 0 : i32
    return %c0_i32, %c0_i32_0 : i32, i32
  }
  func.func @transform_3(%arg0: i32, %arg1: i32) -> (i32, i32) {
    %c0_i32 = arith.constant 0 : i32
    %c0_i32_0 = arith.constant 0 : i32
    %c0_i32_1 = arith.constant 0 : i32
    return %c0_i32, %c0_i32_0 : i32, i32
  }
  func.func @transform_4(%arg0: i32, %arg1: i32) -> (i32, i32) {
    %c0_i32 = arith.constant 0 : i32
    %c0_i32_0 = arith.constant 0 : i32
    return %c0_i32, %arg1 : i32, i32
  }
  func.func @transform_5(%arg0: i32, %arg1: i32) -> (i32, i32) {
    %c0_i32 = arith.constant 0 : i32
    %c0_i32_0 = arith.constant 0 : i32
    return %c0_i32, %arg1 : i32, i32
  }
  func.func @transform_6(%arg0: i32, %arg1: i32) -> (i32, i32) {
    %c0_i32 = arith.constant 0 : i32
    %c0_i32_0 = arith.constant 0 : i32
    return %arg1, %c0_i32 : i32, i32
  }
  func.func @transform_7(%arg0: i32, %arg1: i32) -> (i32, i32) {
    %c0_i32 = arith.constant 0 : i32
    %c0_i32_0 = arith.constant 0 : i32
    %c0_i32_1 = arith.constant 0 : i32
    return %c0_i32, %c0_i32_0 : i32, i32
  }
  func.func @transform_8(%arg0: i32, %arg1: i32) -> (i32, i32) {
    %c0_i32 = arith.constant 0 : i32
    %c0_i32_0 = arith.constant 0 : i32
    return %arg0, %c0_i32 : i32, i32
  }
}

</mosaic_0001>

<bundles_post_ra>
// kernel: gdt_layer_forward.8
= control target key start
LH: loop header
LB: loop body
LE: loop exit
PB: predicated region body
PF: predicated region fallthrough
CT: control target
= control target key end

     0   :  { %s1296_s0 = inlined_call_operand.vmem [shape: bf16[4,256,256], index: 0, kind: input, shape index: {}]   ;;  %s1297_s1 = inlined_call_operand.vmem [shape: f32[4,16,256], index: 1, kind: input, shape index: {}, may-alias: {1,2}]   ;;  %s1298_s2 = inlined_call_operand.vmem [shape: f32[4,16,256], index: 2, kind: input, shape index: {}, may-alias: {1,2}]   ;;  %s1299_s3 = inlined_call_operand.vmem [shape: f32[4,16,256], index: 3, kind: output, shape index: {}]  }
   0x1   :  { %1302 = sst [smem:[#allocation12_spill]] %s1299_s3 }
   0x2   :  { %s1032_s12 = smov 0   ;;  %s1034_s13 = smov 0  }
   0x3   :  { %s1036_s14 = smov 0   ;;  %s1038_s15 = smov 0  }
   0x4   :  { %s1040_s16 = smov 0   ;;  %s1042_s17 = smov 0  }
   0x5   :  { %s1044_s18 = smov 0   ;;  %s1046_s19 = smov 0  }
   0x6   :  { %s1048_s20 = smov 0   ;;  %s1050_s21 = smov 0  }
   0x7   :  { %s1052_s22 = smov 0   ;;  %s1054_s23 = smov 0  }
   0x8   :  { %s1056_s24 = smov 0  }
   0x9 LB: > { %1303 = sst [smem:[#allocation7_spill]] %s983_s18  ;;  %s25_s25 = sadd.s32 1, %s995_s21  ;;  %s1007_s24 = sphi %s1056_s24, %s13_s24   ;;  %s1003_s23 = sphi %s1054_s23, %s1332_s23   ;;  %s999_s22 = sphi %s1052_s22, %s1331_s22   ;;  %s995_s21 = sphi %s1050_s21, %s1330_s21   ;;  %s991_s20 = sphi %s1048_s20, %s1329_s20   ;;  %s987_s19 = sphi %s1046_s19, %s1328_s19   ;;  %s983_s18 = sphi %s1044_s18, %s1327_s18   ;;  %s979_s17 = sphi %s1042_s17, %s1326_s17   ;;  %s975_s16 = sphi %s1040_s16, %s1325_s16   ;;  %s971_s15 = sphi %s1038_s15, %s1324_s15   ;;  %s967_s14 = sphi %s1036_s14, %s1323_s14   ;;  %s963_s13 = sphi %s1034_s13, %s1322_s13   ;;  %s959_s12 = sphi %s1032_s12, %s1321_s12  }
   0xa   : > { %1304 = sst [smem:[#allocation8_spill]] %s987_s19  ;;  %p26_p0 = scmp.ge.s32.totalorder %s25_s25, 2 }
   0xb   : > { %1305 = sst [smem:[#allocation9_spill]] %s991_s20  ;;  %s28_s26 = sadd.s32 1, %s999_s22 }
   0xc   : > { %s725_s27 = sadd.s32 4294967295, %s1007_s24   ;;  %s32_s28 = sadd.s32 1, %s1003_s23 }
   0xd   : > { %s1334_s25 = smov (%p26_p0, %s25_s25), 0  ;;  %s1336_s26 = smov (!%p26_p0, %s28_s26), %s999_s22 }
   0xe   : > { %1306 = sst [smem:[#allocation10_spill]] %s1334_s25  ;;  %s43_s29 = sadd.s32 1, %s979_s17 }
   0xf   : > { %p50_p1 = scmp.ne.s32.totalorder %s979_s17, %s975_s16  ;;  %p30_p2 = scmp.ge.s32.totalorder %s1336_s26, 2 }
  0x10   : > { %p51_p3 = scmp.eq.s32.totalorder %s1007_s24, 0  ;;  %s39_s30 = ssub.s32 %s995_s21, %s1334_s25 }
  0x11   : > { %p78_p4 = scmp.ne.s32.totalorder %s971_s15, %s967_s14  ;;  %s1338_s26 = smov (%p30_p2, %s1336_s26), 0 }
  0x12   : > { %1307 = sst [smem:[#allocation11_spill]] %s1338_s26  ;;  %s1340_s28 = smov (!%p30_p2, %s32_s28), %s1003_s23 }
  0x13   : > { %p1117_p5 = por %p51_p3, %p50_p1  ;;  %s71_s5 = sadd.s32 1, %s971_s15 }
  0x14   : > { %p34_p6 = scmp.ge.s32.totalorder %s1340_s28, 4  ;;  %p1124_p7 = por %p78_p4, %p51_p3 }
  0x15   : > { %s37_s7 = ssub.s32 %s999_s22, %s1338_s26  ;;  %p106_p8 = scmp.ne.s32.totalorder %s963_s13, %s959_s12 }
  0x16   : > { %s1342_s28 = smov (%p34_p6, %s1340_s28), 0  ;;  %s99_s8 = sadd.s32 1, %s963_s13 }
  0x17   : > { %p1140_p9 = por %p106_p8, %p51_p3  ;;  %s36_s10 = ssub.s32 %s1003_s23, %s1342_s28 }
  0x18   : > { %p138_p10 = scmp.eq.s32.totalorder %s725_s27, 15  ;;  %s38_s11 = sor.u32 %s37_s7, %s36_s10 }
  0x19   : > { %s68_s25 = sor.u32 %s39_s30, %s36_s10  ;;  %s40_s3 = sor.u32 %s39_s30, %s38_s11 }
  0x1a   : > { %p69_p11 = scmp.eq.s32.totalorder %s68_s25, 0  ;;  %p41_p12 = scmp.eq.s32.totalorder %s40_s3, 0 }
  0x1b   : > { %p97_p13 = scmp.eq.s32.totalorder %s38_s11, 0  ;;  %p1158_p0 = por %p138_p10, %p106_p8 }
  0x1c   : > { %s1147_s26 = scalar_select %p69_p11, %s971_s15, %s71_s5  }
  0x1d   : > { %s1150_s19 = scalar_select %p41_p12, %s979_s17, %s43_s29  }
  0x1e   : > { %s1153_s20 = scalar_select %p97_p13, %s963_s13, %s99_s8  }
  0x1f   : > { %p728_p1 = scmp.ge.s32.totalorder %s1007_s24, 16 }
  0x21   : > { %160 = sbr.rel (%p728_p1) target bundleno = 71 (0x47), region = 16 }
  0x28   : > { %163 = sbr.rel (!%p1117_p5) target bundleno = 57 (0x39), region = 20  ;;  %s165_s3 = sand.u32 (%p1117_p5), 1, %s979_s17  }
  0x29   : > { %s760_s25 = sshll.u32 (%p1117_p5), %s999_s22, 5  ;;  %s729_s27 = sshll.u32 (%p1117_p5), %s165_s3, 6 }
  0x2a   : > { %s170_s29 = sadd.s32 (%p1117_p5), %s995_s21, %s760_s25  ;;  %s732_s30 = sshll.u32 (%p1117_p5), %s1003_s23, 6 }
  0x2b   : > { %s172_s5 = sadd.s32 (%p1117_p5), %s732_s30, %s170_s29  ;;  %s167_s4 = scalar_lea.vmem (%p1117_p5), [#allocation3], %s729_s27 }
  0x2c   : > { %s733_s7 = sshll.u32 (%p1117_p5), %s172_s5, 2 }
  0x2d   : > { %s1172_s11 = scalar_lea.vmem (%p1117_p5), %s1296_s0, %s733_s7 }
  0x2e   : > { %v190_v0 = vld [vmem:[%s1172_s11] sm:$0xf] (%p1117_p5)  ;;  %v192_v1 = vld [vmem:[%s1172_s11 + $0x8] sm:$0xf] (%p1117_p5)  ;;  %v194_v2 = vld [vmem:[%s1172_s11 + $0x10] sm:$0xf] (%p1117_p5) }
  0x2f   : > { %191 = vst [vmem:[%s167_s4] sm:$0xf] %v190_v0  ;;  %193 = vst [vmem:[%s167_s4 + $0x4] sm:$0xf] %v192_v1  ;;  %v196_v3 = vld [vmem:[%s1172_s11 + $0x18] sm:$0xf] }
  0x30   : > { %195 = vst [vmem:[%s167_s4 + $0x8] sm:$0xf] %v194_v2  ;;  %v198_v4 = vld [vmem:[%s1172_s11 + $0x20] sm:$0xf]  ;;  %v200_v5 = vld [vmem:[%s1172_s11 + $0x28] sm:$0xf] }
  0x31   : > { %197 = vst [vmem:[%s167_s4 + $0xc] sm:$0xf] %v196_v3  ;;  %199 = vst [vmem:[%s167_s4 + $0x10] sm:$0xf] %v198_v4  ;;  %v202_v6 = vld [vmem:[%s1172_s11 + $0x30] sm:$0xf] }
  0x32   : > { %201 = vst [vmem:[%s167_s4 + $0x14] sm:$0xf] %v200_v5  ;;  %v204_v7 = vld [vmem:[%s1172_s11 + $0x38] sm:$0xf]  ;;  %v206_v8 = vld [vmem:[%s1172_s11 + $0x40] sm:$0xf] }
  0x33   : > { %203 = vst [vmem:[%s167_s4 + $0x18] sm:$0xf] %v202_v6  ;;  %205 = vst [vmem:[%s167_s4 + $0x1c] sm:$0xf] %v204_v7  ;;  %v208_v9 = vld [vmem:[%s1172_s11 + $0x48] sm:$0xf] }
  0x34   : > { %207 = vst [vmem:[%s167_s4 + $0x20] sm:$0xf] %v206_v8  ;;  %v210_v10 = vld [vmem:[%s1172_s11 + $0x50] sm:$0xf]  ;;  %v212_v11 = vld [vmem:[%s1172_s11 + $0x58] sm:$0xf] }
  0x35   : > { %209 = vst [vmem:[%s167_s4 + $0x24] sm:$0xf] %v208_v9  ;;  %211 = vst [vmem:[%s167_s4 + $0x28] sm:$0xf] %v210_v10  ;;  %v214_v12 = vld [vmem:[%s1172_s11 + $0x60] sm:$0xf] }
  0x36   : > { %213 = vst [vmem:[%s167_s4 + $0x2c] sm:$0xf] %v212_v11  ;;  %v216_v13 = vld [vmem:[%s1172_s11 + $0x68] sm:$0xf]  ;;  %v218_v14 = vld [vmem:[%s1172_s11 + $0x70] sm:$0xf] }
  0x37   : > { %215 = vst [vmem:[%s167_s4 + $0x30] sm:$0xf] %v214_v12  ;;  %217 = vst [vmem:[%s167_s4 + $0x34] sm:$0xf] %v216_v13  ;;  %v220_v15 = vld [vmem:[%s1172_s11 + $0x78] sm:$0xf] }
  0x38   : > { %219 = vst [vmem:[%s167_s4 + $0x38] sm:$0xf] %v218_v14  ;;  %221 = vst [vmem:[%s167_s4 + $0x3c] sm:$0xf] %v220_v15 }
  0x39 PF: > { %276 = sbr.rel (!%p1124_p7) target bundleno = 64 (0x40), region = 61  ;;  %s278_s3 = sand.u32 (%p1124_p7), 1, %s971_s15  }
  0x3a   : > { %s735_s25 = sshll.u32 (%p1124_p7), %s1003_s23, 2  ;;  %s734_s27 = sshll.u32 (%p1124_p7), %s278_s3, 4 }
  0x3b   : > { %s282_s29 = sadd.s32 (%p1124_p7), %s995_s21, %s735_s25  ;;  %s280_s10 = scalar_lea.vmem (%p1124_p7), [#allocation4], %s734_s27 }
  0x3c   : > { %s736_s30 = sshll.u32 (%p1124_p7), %s282_s29, 3 }
  0x3d   : > { %s284_s8 = scalar_lea.vmem (%p1124_p7), %s1297_s1, %s736_s30 }
  0x3e   : > { %v314_v16 = vld [vmem:[%s284_s8] sm:$0xff] (%p1124_p7)  ;;  %v316_v17 = vld [vmem:[%s284_s8 + $0x10] sm:$0xff] (%p1124_p7) }
  0x3f   : > { %315 = vst [vmem:[%s280_s10] sm:$0xff] (%p1124_p7), %v314_v16  ;;  %317 = vst [vmem:[%s280_s10 + $0x8] sm:$0xff] (%p1124_p7), %v316_v17 }
  0x40 PF: > { %323 = sbr.rel (!%p1140_p9) target bundleno = 71 (0x47), region = 99  ;;  %s325_s6 = sand.u32 (%p1140_p9), 1, %s963_s13  }
  0x41   : > { %s738_s11 = sshll.u32 (%p1140_p9), %s1003_s23, 2  ;;  %s737_s4 = sshll.u32 (%p1140_p9), %s325_s6, 4 }
  0x42   : > { %s329_s3 = sadd.s32 (%p1140_p9), %s999_s22, %s738_s11  ;;  %s327_s27 = scalar_lea.vmem (%p1140_p9), [#allocation5], %s737_s4 }
  0x43   : > { %s739_s25 = sshll.u32 (%p1140_p9), %s329_s3, 3 }
  0x44   : > { %s331_s30 = scalar_lea.vmem (%p1140_p9), %s1298_s2, %s739_s25 }
  0x45   : > { %v361_v18 = vld [vmem:[%s331_s30] sm:$0xff] (%p1140_p9)  ;;  %v363_v19 = vld [vmem:[%s331_s30 + $0x10] sm:$0xff] (%p1140_p9) }
  0x46   : > { %362 = vst [vmem:[%s327_s27] sm:$0xff] (%p1140_p9), %v361_v18  ;;  %364 = vst [vmem:[%s327_s27 + $0x8] sm:$0xff] (%p1140_p9), %v363_v19 }
  0x47 PF: > { %p740_p2 = scmp.ge.s32.totalorder %s1007_s24, 1  ;;  %p369_p3 = scmp.lt.s32.totalorder %s1007_s24, 17 }
  0x49   : > { %p370_p4 = pnand %p740_p2, %p369_p3 }
  0x4a   : > { %s376_s9 = sand.u32 (!%p370_p4), 1, %s975_s16   ;;  %s383_s7 = sand.u32 (!%p370_p4), 1, %s967_s14  }
  0x4b   : > { %373 = sbr.rel (%p370_p4) target bundleno = 399 (0x18f), region = 137  ;;  %s741_s8 = sshll.u32 (!%p370_p4), %s376_s9, 6 }
  0x4c   : > { %s1210_s10 = sshll.u32 (!%p370_p4), %s383_s7, 4  ;;  %s390_s6 = sand.u32 (!%p370_p4), 1, %s959_s12  }
  0x4d   : > { %s1213_s11 = sshll.u32 (!%p370_p4), %s390_s6, 4  ;;  %s1215_s4 = scalar_lea.vmem (!%p370_p4), [#allocation3], %s741_s8 }
  0x4e   : > { %s385_s3 = scalar_lea.vmem (!%p370_p4), [#allocation4], %s1210_s10  ;;  %s392_s25 = scalar_lea.vmem (!%p370_p4), [#allocation5], %s1213_s11 }
  0x4f   : > { %s1220_s29 = scalar_lea.vmem (!%p370_p4), [#allocation6], %s1213_s11  ;;  %s1312_s5 = sld [smem:[#allocation7_spill]] (!%p370_p4) }
  0x55   : > { %p745_p5 = scmp.ne.s32.totalorder %s1312_s5, 0 }
  0x56   : > { %v1009_v20 = vmov (!%p745_p5), 0.0  }
  0x57   : > { %425 = sbr.rel (%p745_p5) target bundleno = 94 (0x5e), region = 153  ;;  %426 = vst [vmem:[#allocation2] sm:$0xff] (!%p745_p5), %v1009_v20  ;;  %427 = vst [vmem:[#allocation2 + $0x8] sm:$0xff] (!%p745_p5), %v1009_v20 }
  0x5e PF: > { %v897_v21 = vld [vmem:[%s1215_s4] sm:$0xff]   ;;  %v1010_v22 = vmov 0.0   ;;  %vm1011_vm0 = vmmov 0   ;;  %v898_v23 = vld [vmem:[%s1215_s4 + $0x8] sm:$0xff]   ;;  %v899_v24 = vld [vmem:[%s1215_s4 + $0x10] sm:$0xff]   ;;  %s1313_s12 = sld [smem:[#allocation7_spill]] }
  0x5f   : > { %770 = vmatprep.subr.bf16.mxu0 %v1010_v22  ;;  %786 = vmatprep.mubr.msk.bf16.mxu0 %vm1011_vm0, %v1010_v22  ;;  %v900_v25 = vld [vmem:[%s1215_s4 + $0x18] sm:$0xff]   ;;  %v901_v26 = vld [vmem:[%s1215_s4 + $0x20] sm:$0xff]   ;;  %v902_v27 = vld [vmem:[%s1215_s4 + $0x28] sm:$0xff]  }
  0x60   : > { %771 = vmatpush3.bf16.xpose.msra.mxu0 %v897_v21  ;;  %v903_v28 = vld [vmem:[%s1215_s4 + $0x30] sm:$0xff]   ;;  %v904_v29 = vld [vmem:[%s1215_s4 + $0x38] sm:$0xff]  }
  0x61   : > { %772 = vmatprep.subr.bf16.mxu0 %v1010_v22  ;;  %v428_v30 = vld [vmem:[%s385_s3] sm:$0xff]  ;;  %v429_v31 = vld [vmem:[%s385_s3 + $0x8] sm:$0xff] }
  0x62   : > { %v430_v32 = vpack.c.bf16 %v429_v31, %v428_v30  ;;  %v447_v33 = vld [vmem:[#allocation2] sm:$0xff]  ;;  %v448_v35 = vld [vmem:[#allocation2 + $0x8] sm:$0xff] }
  0x64   : > { %p754_p6 = scmp.ne.s32.totalorder %s1313_s12, 1 }
  0x65   : > { %v550_v42 = vld [vmem:[%s392_s25] sm:$0xff] (!%p754_p6)  ;;  %v551_v47 = vld [vmem:[%s392_s25 + $0x8] sm:$0xff] (!%p754_p6) }
  0x66   : > { %v552_v45 = vmul.f32 (!%p754_p6), 0.15, %v550_v42  ;;  %v553_v49 = vmul.f32 (!%p754_p6), 0.15, %v551_v47 }
  0x68   : > { %773 = vmatpush3.bf16.xpose.msra.mxu0 %v898_v23 }
  0x69   : > { %774 = vmatprep.subr.bf16.mxu0 %v1010_v22 }
  0x70   : > { %775 = vmatpush3.bf16.xpose.msra.mxu0 %v899_v24 }
  0x71   : > { %776 = vmatprep.subr.bf16.mxu0 %v1010_v22 }
  0x78   : > { %777 = vmatpush3.bf16.xpose.msra.mxu0 %v900_v25 }
  0x79   : > { %778 = vmatprep.subr.bf16.mxu0 %v1010_v22 }
  0x80   : > { %779 = vmatpush3.bf16.xpose.msra.mxu0 %v901_v26 }
  0x81   : > { %780 = vmatprep.subr.bf16.mxu0 %v1010_v22 }
  0x88   : > { %781 = vmatpush3.bf16.xpose.msra.mxu0 %v902_v27 }
  0x89   : > { %782 = vmatprep.subr.bf16.mxu0 %v1010_v22 }
  0x90   : > { %783 = vmatpush3.bf16.xpose.msra.mxu0 %v903_v28 }
  0x91   : > { %784 = vmatprep.subr.bf16.mxu0 %v1010_v22 }
  0x98   : > { %785 = vmatpush3.bf16.xpose.msra.mxu0 %v904_v29 }
  0x9f   : > { %787 = vmatmul.mubr.bf16.vlgmr.msra.gmra.mrb[0].mxu0 %v430_v32 }
 0x171   : > { %545 = sbr.rel (%p754_p6) target bundleno = 388 (0x184), region = 157 }
 0x172   : > { %v531_v34 = vpop.f32.mrb[0].mxu0 }
 0x173   : > { %v538_v36 = vadd.f32 %v531_v34, %v447_v33  ;;  %v788_v37 = vpop.f32.mrb[1].mxu0 }
 0x174   : > { %v534_v38 = vpop.f32.mrb[2].mxu0 }
 0x175   : > { %540 = vst [vmem:[#allocation2] sm:$0xff] %v538_v36  ;;  %v539_v39 = vadd.f32 %v534_v38, %v448_v35  ;;  %v789_v40 = vpop.f32.mrb[3].mxu0 }
 0x177   : > { %541 = vst [vmem:[#allocation2 + $0x8] sm:$0xff] %v539_v39 }
 0x17c   : > { %v546_v41 = vld [vmem:[#allocation2] sm:$0xff] }
 0x17d   : > { %v548_v44 = vmul.f32 0.85, %v546_v41 }
 0x17e   : > { %v547_v43 = vld [vmem:[#allocation2 + $0x8] sm:$0xff] }
 0x17f   : > { %v549_v46 = vmul.f32 0.85, %v547_v43  ;;  %v554_v48 = vadd.f32 %v552_v45, %v548_v44 }
 0x181   : > { %556 = vst [vmem:[%s1220_s29] sm:$0xff] %v554_v48  ;;  %v555_v50 = vadd.f32 %v553_v49, %v549_v46 }
 0x183   : > { %557 = vst [vmem:[%s1220_s29 + $0x8] sm:$0xff] %v555_v50 }
 0x184 PF: > { %564 = sbr.rel (!%p1158_p0) target bundleno = 399 (0x18f), region = 161  ;;  %s1314_s14 = sld [smem:[#allocation9_spill]] (%p1158_p0) }
 0x185   : > { %s1315_s16 = sld [smem:[#allocation8_spill]] (%p1158_p0)  ;;  %s1316_s10 = sld [smem:[#allocation12_spill]] (%p1158_p0) }
 0x188   : > { %v598_v51 = vld [vmem:[%s1220_s29] sm:$0xff] (%p1158_p0) }
 0x18a   : > { %s756_s30 = sshll.u32 (%p1158_p0), %s1314_s14, 2  ;;  %v600_v52 = vld [vmem:[%s1220_s29 + $0x8] sm:$0xff] (%p1158_p0) }
 0x18b   : > { %s566_s27 = sadd.s32 %s1315_s16, %s756_s30 }
 0x18c   : > { %s757_s9 = sshll.u32 %s566_s27, 3 }
 0x18d   : > { %s568_s6 = scalar_lea.vmem %s1316_s10, %s757_s9 }
 0x18e   : > { %599 = vst [vmem:[%s568_s6] sm:$0xff] %v598_v51  ;;  %601 = vst [vmem:[%s568_s6 + $0x10] sm:$0xff] %v600_v52 }
 0x18f PF: > { %s13_s24 = sadd.s32 1, %s1007_s24   ;;  %s1318_s11 = sld [smem:[#allocation10_spill]] }
 0x190   : > { %p1252_p7 = scmp.ge.s32.totalorder %s13_s24, 18   ;;  %s1319_s4 = sld [smem:[#allocation11_spill]] }
 0x191   : > { %s1321_s12 = smov %s963_s13  ;;  %s1322_s13 = smov %s1153_s20 }
 0x192   : > { %s1323_s14 = smov %s971_s15  ;;  %s1324_s15 = smov %s1147_s26 }
 0x193   : > { %s1325_s16 = smov %s979_s17  ;;  %s1326_s17 = smov %s1150_s19 }
 0x194   : > { %s1327_s18 = smov %s995_s21  ;;  %s1328_s19 = smov %s999_s22 }
 0x195   : > { %s1329_s20 = smov %s1003_s23  ;;  %s1330_s21 = smov %s1318_s11 }
 0x196   : > { %s1331_s22 = smov %s1319_s4  ;;  %s1332_s23 = smov %s1342_s28 }
 0x197   :  { %12 = sbr.rel (!%p1252_p7) target bundleno = 9 (0x9), region = 246 }

// kernel: gdt_layer_forward.7
= control target key start
LH: loop header
LB: loop body
LE: loop exit
PB: predicated region body
PF: predicated region fallthrough
CT: control target
= control target key end

     0   :  { %s1373_s12 = smov 0   ;;  %s1375_s13 = smov 0   ;;  %s2182_s0 = inlined_call_operand.vmem [shape: f32[4,1,256], index: 0, kind: input, shape index: {}]   ;;  %s2183_s1 = inlined_call_operand.vmem [shape: f32[4,256,1], index: 1, kind: input, shape index: {}]   ;;  %s2184_s2 = inlined_call_operand.vmem [shape: f32[256,256], index: 2, kind: input, shape index: {}]   ;;  %s2185_s3 = inlined_call_operand.vmem [shape: bf16[4,256,256], index: 3, kind: output, shape index: {}]  }
   0x1   :  { %s1377_s14 = smov 0   ;;  %s1379_s15 = smov 0  }
   0x2   :  { %s1381_s16 = smov 0  }
   0x3 LB: > { %s22_s17 = sadd.s32 1, %s1342_s14  ;;  %s25_s18 = sadd.s32 1, %s1346_s15  ;;  %s1350_s16 = sphi %s1381_s16, %s13_s16   ;;  %s1346_s15 = sphi %s1379_s15, %s2281_s15   ;;  %s1342_s14 = sphi %s1377_s14, %s2280_s14   ;;  %s1338_s13 = sphi %s1375_s13, %s2279_s13   ;;  %s1334_s12 = sphi %s1373_s12, %s2278_s12  }
   0x4   : > { %p23_p0 = scmp.ge.s32.totalorder %s22_s17, 2  ;;  %p1126_p1 = scmp.ge.s32.totalorder %s1350_s16, 1 }
   0x5   : > { %p179_p2 = scmp.lt.s32.totalorder %s1350_s16, 9 }
   0x6   : > { %s2283_s17 = smov (%p23_p0, %s22_s17), 0  ;;  %s2285_s18 = smov (!%p23_p0, %s25_s18), %s1346_s15 }
   0x7   : > { %p180_p3 = pnand %p1126_p1, %p179_p2  ;;  %p27_p4 = scmp.ge.s32.totalorder %s2285_s18, 4 }
   0x9   : > { %s2287_s18 = smov (%p27_p4, %s2285_s18), 0  ;;  %183 = sbr.rel (%p180_p3) target bundleno = 531 (0x213), region = 32 }
  0x10   : > { %p222_p5 = scmp.lt.s32.totalorder %s1338_s13, 3  ;;  %s1128_s19 = sshll.u32 %s1334_s12, 4  ;;  %v1352_v0 = vmov 0   ;;  %v352_v17 = vlaneseq }
  0x11   : > { %1215 = vset.pattern.permute.xlu1 %v1352_v0  ;;  %1214 = vset.pattern.permute.xlu0 %v1352_v0  ;;  %p229_p6 = scmp.lt.s32.totalorder %s1128_s19, 31 }
  0x12   : > { %s2289_s13 = smov (!%p222_p5, %s1338_s13), 3  ;;  %v353_v18 = vshrl.u32 %v352_v17, 7 }
  0x13   : > { %s2291_s19 = smov (!%p229_p6, %s1128_s19), 31  ;;  %s1129_s20 = sshll.u32 %s2289_s13, 5 }
  0x14   : > { %s232_s21 = sadd.s32 %s1129_s20, %s2291_s19  ;;  %s1136_s22 = sshll.u32 %s2289_s13, 6  ;;  %v354_v19 = vsub.s32 0, %v353_v18  ;;  %v358_v20 = vsub.s32 1, %v353_v18 }
  0x15   : > { %s1130_s23 = sshll.u32 %s232_s21, 3  ;;  %s1135_s27 = sshll.u32 %s2291_s19, 1 }
  0x16   : > { %s1413_s26 = scalar_lea.vmem %s2183_s1, %s1130_s23  ;;  %s1416_s28 = sadd.s32 %s1136_s22, %s1135_s27 }
  0x17   : > { %v257_v1 = vld [vmem:[%s1413_s26 + $0x10] sm:$0xff]  ;;  %v255_v2 = vld [vmem:[%s1413_s26] sm:$0xff]  ;;  %v258_v3 = vld [vmem:[%s1413_s26 + $0x18] sm:$0xff]  ;;  %s1127_s29 = sshll.u32 %s2289_s13, 1  ;;  %s1156_s30 = sshll.u32 %s2291_s19, 4 }
  0x18   : > { %283 = vperm.xlu1 %1215, %v257_v1   ;;  %273 = vperm.xlu0 %1214, %v255_v2   ;;  %v256_v4 = vld [vmem:[%s1413_s26 + $0x8] sm:$0xff]  ;;  %v259_v6 = vld [vmem:[%s1413_s26 + $0x20] sm:$0xff]  ;;  %v262_v7 = vld [vmem:[%s1413_s26 + $0x38] sm:$0xff]  ;;  %s225_s6 = scalar_lea.vmem %s2182_s0, %s1127_s29  ;;  %s1442_s9 = scalar_lea.vmem %s2184_s2, %s1156_s30 }
  0x19   : > { %v260_v5 = vld [vmem:[%s1413_s26 + $0x28] sm:$0xff]  ;;  %v261_v8 = vld [vmem:[%s1413_s26 + $0x30] sm:$0xff]  ;;  %v263_v10 = vld [vmem:[%s1413_s26 + $0x40] sm:$0xff]  ;;  %s1137_s10 = sshll.u32 %s1416_s28, 2 }
  0x1a   : > { %v264_v9 = vld [vmem:[%s1413_s26 + $0x48] sm:$0xff]  ;;  %v266_v11 = vld [vmem:[%s1413_s26 + $0x58] sm:$0xff]  ;;  %v265_v12 = vld [vmem:[%s1413_s26 + $0x50] sm:$0xff]  ;;  %s2119_s13 = scalar_lea.vmem %s2185_s3, %s1137_s10 }
  0x1b   : > { %v268_v13 = vld [vmem:[%s1413_s26 + $0x68] sm:$0xff]  ;;  %v267_v14 = vld [vmem:[%s1413_s26 + $0x60] sm:$0xff]  ;;  %v270_v15 = vld [vmem:[%s1413_s26 + $0x78] sm:$0xff] }
  0x1c   : > { %288 = vperm.xlu1 %1215, %v258_v3   ;;  %278 = vperm.xlu0 %1214, %v256_v4   ;;  %v269_v16 = vld [vmem:[%s1413_s26 + $0x70] sm:$0xff]  ;;  %v254_v21 = vld [vmem:[%s225_s6] sm:$0x3]  ;;  %v1452_v25 = vld [vmem:[%s1442_s9 + $0x8] sm:$0xff] }
  0x1d   : > { %v1444_v22 = vrot.slane %v254_v21, %v354_v19  ;;  %v1446_v23 = vrot.slane %v254_v21, %v358_v20  ;;  %v1449_v24 = vld [vmem:[%s1442_s9] sm:$0xff]  ;;  %2223 = vst [vmem:[#allocation2_spill] sm:$0xff] %v1452_v25  ;;  %v1455_v26 = vld [vmem:[%s1442_s9 + $0x10] sm:$0xff]  ;;  %v1461_v28 = vld [vmem:[%s1442_s9 + $0x28] sm:$0xff]  ;;  %vm2213_vm1 = vcmp.gt.f32.partialorder %v1452_v25, 0.0 }
  0x1e   : > { %2224 = vst [vmem:[#allocation3_spill] sm:$0xff] %v1455_v26  ;;  %v1458_v27 = vld [vmem:[%s1442_s9 + $0x20] sm:$0xff]  ;;  %2226 = vst [vmem:[#allocation5_spill] sm:$0xff] %v1461_v28  ;;  %vm2221_vm0 = vcmp.gt.f32.partialorder %v1449_v24, 0.0  ;;  %v1470_v35 = vld [vmem:[%s1442_s9 + $0x18] sm:$0xff]  ;;  %vm2211_vm2 = vcmp.gt.f32.partialorder %v1455_v26, 0.0 }
  0x1f   : > { %2225 = vst [vmem:[#allocation4_spill] sm:$0xff] %v1458_v27  ;;  %2227 = vst [vmem:[#allocation6_spill] sm:$0xff] %v1470_v35  ;;  %vm2204_vm3 = vcmp.gt.f32.partialorder %v1458_v27, 0.0  ;;  %vm2186_vm4 = vcmp.gt.f32.partialorder %v1461_v28, 0.0  ;;  %v1476_v36 = vld [vmem:[%s1442_s9 + $0x40] sm:$0xff]  ;;  %v1479_v43 = vld [vmem:[%s1442_s9 + $0x48] sm:$0xff] }
  0x20   : > { %298 = vperm.xlu1 %1215, %v260_v5   ;;  %293 = vperm.xlu0 %1214, %v259_v6   ;;  %2228 = vst [vmem:[#allocation7_spill] sm:$0xff] %v1476_v36  ;;  %2229 = vst [vmem:[#allocation8_spill] sm:$0xff] %v1479_v43  ;;  %vm2206_vm8 = vcmp.gt.f32.partialorder %v1470_v35, 0.0  ;;  %v1491_v50 = vld [vmem:[%s1442_s9 + $0x30] sm:$0xff]  ;;  %v1494_v51 = vld [vmem:[%s1442_s9 + $0x38] sm:$0xff]  ;;  %vm2188_vm10 = vcmp.gt.f32.partialorder %v1476_v36, 0.0 }
  0x21   : > { %2230 = vst [vmem:[#allocation9_spill] sm:$0xff] %v1491_v50  ;;  %2231 = vst [vmem:[#allocation10_spill] sm:$0xff] %v1494_v51  ;;  %vm2187_vm11 = vcmp.gt.f32.partialorder %v1479_v43, 0.0  ;;  %vm2193_vm12 = vcmp.gt.f32.partialorder %v1491_v50, 0.0  ;;  %vm2189_vm15 = vcmp.gt.f32.partialorder %v1494_v51, 0.0  ;;  %v1529_v4 = vld [vmem:[%s1442_s9 + $0x60] sm:$0xff] }
  0x22   : > { %2232 = vst [vmem:[#allocation11_spill] sm:$0xff] %v1529_v4  ;;  %v1532_v5 = vld [vmem:[%s1442_s9 + $0x68] sm:$0xff]  ;;  %v1561_v20 = vld [vmem:[%s1442_s9 + $0x50] sm:$0xff]  ;;  %v1564_v21 = vld [vmem:[%s1442_s9 + $0x58] sm:$0xff] }
  0x23   : > { %2233 = vst [vmem:[#allocation12_spill] sm:$0xff] %v1532_v5  ;;  %2234 = vst [vmem:[#allocation13_spill] sm:$0xff] %v1561_v20  ;;  %v1722_v28 = vld [vmem:[%s1442_s9 + $0xb0] sm:$0xff]  ;;  %v1725_v27 = vld [vmem:[%s1442_s9 + $0xb8] sm:$0xff] }
  0x24   : > { %308 = vperm.xlu1 %1215, %v262_v7   ;;  %303 = vperm.xlu0 %1214, %v261_v8   ;;  %2235 = vst [vmem:[#allocation14_spill] sm:$0xff] %v1564_v21  ;;  %v1760_v26 = vld [vmem:[%s1442_s9 + $0xe8] sm:$0xff] }
  0x28   : > { %318 = vperm.xlu1 %1215, %v264_v9   ;;  %313 = vperm.xlu0 %1214, %v263_v10  }
  0x2c   : > { %328 = vperm.xlu1 %1215, %v266_v11   ;;  %323 = vperm.xlu0 %1214, %v265_v12  }
  0x30   : > { %338 = vperm.xlu1 %1215, %v268_v13   ;;  %333 = vperm.xlu0 %1214, %v267_v14  }
  0x34   : > { %348 = vperm.xlu1 %1215, %v270_v15   ;;  %343 = vperm.xlu0 %1214, %v269_v16  }
  0x97   : > { %v284_v29 = vpop.permute.xlu1 %283  ;;  %v274_v30 = vpop.permute.xlu0 %273 }
  0x98   : > { %v366_v31 = vadd.f32 %v1444_v22, %v284_v29  ;;  %v367_v32 = vadd.f32 %v1446_v23, %v284_v29  ;;  %v362_v33 = vadd.f32 %v1444_v22, %v274_v30  ;;  %v363_v34 = vadd.f32 %v1446_v23, %v274_v30 }
  0x9a   : > { %v430_v37 = vmul.f32 0.2, %v366_v31  ;;  %v431_v38 = vmul.f32 0.2, %v367_v32  ;;  %v426_v39 = vmul.f32 0.2, %v362_v33 }
  0x9b   : > { %v427_v40 = vmul.f32 0.2, %v363_v34  ;;  %v289_v41 = vpop.permute.xlu1 %288  ;;  %v279_v42 = vpop.permute.xlu0 %278  ;;  %vm394_vm5 = vcmp.gt.f32.partialorder %v362_v33, 0.0  ;;  %vm395_vm6 = vcmp.gt.f32.partialorder %v363_v34, 0.0  ;;  %vm398_vm7 = vcmp.gt.f32.partialorder %v366_v31, 0.0 }
  0x9c   : > { %v1482_v44 = vadd.f32 %v1444_v22, %v289_v41  ;;  %v1485_v45 = vadd.f32 %v1446_v23, %v289_v41  ;;  %v364_v46 = vadd.f32 %v1444_v22, %v279_v42  ;;  %v365_v47 = vadd.f32 %v1446_v23, %v279_v42  ;;  %v1585_v42 = vld [vmem:[%s1442_s9 + $0x80] sm:$0xff] }
  0x9d   : > { %v458_v48 = vsel %vm394_vm5, %v362_v33, %v426_v39  ;;  %v459_v49 = vsel %vm395_vm6, %v363_v34, %v427_v40  ;;  %vm399_vm9 = vcmp.gt.f32.partialorder %v367_v32, 0.0  ;;  %v462_v55 = vsel %vm398_vm7, %v366_v31, %v430_v37 }
  0x9e   : > { %v1497_v52 = vmul.f32 0.2, %v1482_v44  ;;  %v1500_v53 = vmul.f32 0.2, %v1485_v45  ;;  %v428_v54 = vmul.f32 0.2, %v364_v46  ;;  %v463_v61 = vsel %vm399_vm9, %v367_v32, %v431_v38 }
  0x9f   : > { %v429_v56 = vmul.f32 0.2, %v365_v47  ;;  %v299_v57 = vpop.permute.xlu1 %298  ;;  %v294_v58 = vpop.permute.xlu0 %293  ;;  %v1506_v59 = vsel %vm2221_vm0, %v458_v48, -1e+30  ;;  %v1510_v60 = vsel %vm2213_vm1, %v459_v49, -1e+30 }
  0xa0   : > { %v1513_v62 = vadd.f32 %v1444_v22, %v299_v57  ;;  %v1516_v63 = vadd.f32 %v1446_v23, %v299_v57  ;;  %v370_v0 = vadd.f32 %v1444_v22, %v294_v58  ;;  %v371_v1 = vadd.f32 %v1446_v23, %v294_v58 }
  0xa1   : > { %v586_v2 = vmax.f32 %v1506_v59, %v1510_v60  ;;  %vm396_vm13 = vcmp.gt.f32.partialorder %v364_v46, 0.0  ;;  %vm397_vm14 = vcmp.gt.f32.partialorder %v365_v47, 0.0  ;;  %v1525_v3 = vsel %vm2204_vm3, %v462_v55, -1e+30  ;;  %v1603_v55 = vld [vmem:[%s1442_s9 + $0x70] sm:$0xff] }
  0xa2   : > { %v1535_v6 = vmul.f32 0.2, %v1513_v62  ;;  %v1538_v7 = vmul.f32 0.2, %v1516_v63  ;;  %v434_v8 = vmul.f32 0.2, %v370_v0  ;;  %v460_v9 = vsel %vm396_vm13, %v364_v46, %v428_v54 }
  0xa3   : > { %v435_v10 = vmul.f32 0.2, %v371_v1  ;;  %587 = vmax.xlane.f32.xlu0 %v586_v2  ;;  %v309_v11 = vpop.permute.xlu1 %308  ;;  %v304_v12 = vpop.permute.xlu0 %303  ;;  %v461_v13 = vsel %vm397_vm14, %v365_v47, %v429_v56  ;;  %v1542_v14 = vsel %vm2211_vm2, %v460_v9, -1e+30  ;;  %v1546_v15 = vsel %vm2186_vm4, %v463_v61, -1e+30 }
  0xa4   : > { %v1549_v16 = vadd.f32 %v1444_v22, %v309_v11  ;;  %v1552_v17 = vadd.f32 %v1446_v23, %v309_v11  ;;  %v374_v18 = vadd.f32 %v1444_v22, %v304_v12  ;;  %v1556_v19 = vadd.f32 %v1446_v23, %v304_v12  ;;  %v1600_v54 = vld [vmem:[%s1442_s9 + $0x88] sm:$0xff]  ;;  %2237 = vst [vmem:[#allocation16_spill] sm:$0xff] %v1603_v55  ;;  %v1617_v61 = vld [vmem:[%s1442_s9 + $0x78] sm:$0xff] }
  0xa5   : > { %vm2194_vm5 = vcmp.gt.f32.partialorder %v1529_v4, 0.0  ;;  %vm2198_vm6 = vcmp.gt.f32.partialorder %v1532_v5, 0.0  ;;  %v1568_v29 = vsel %vm2206_vm8, %v461_v13, -1e+30  ;;  %v592_v30 = vmax.f32 %v1525_v3, %v1546_v15  ;;  %2236 = vst [vmem:[#allocation15_spill] sm:$0xff] %v1600_v54  ;;  %2238 = vst [vmem:[#allocation17_spill] sm:$0xff] %v1617_v61 }
  0xa6   : > { %vm402_vm7 = vcmp.gt.f32.partialorder %v370_v0, 0.0  ;;  %vm403_vm9 = vcmp.gt.f32.partialorder %v371_v1, 0.0  ;;  %v1573_v31 = vmul.f32 0.2, %v1549_v16  ;;  %v1576_v32 = vmul.f32 0.2, %v1552_v17 }
  0xa7   : > { %v438_v33 = vmul.f32 0.2, %v374_v18  ;;  %v589_v34 = vmax.f32 %v1542_v14, %v1568_v29  ;;  %v439_v37 = vmul.f32 0.2, %v1556_v19  ;;  %593 = vmax.xlane.f32.xlu0 %v592_v30  ;;  %v319_v38 = vpop.permute.xlu1 %318  ;;  %v314_v39 = vpop.permute.xlu0 %313  ;;  %v466_v40 = vsel %vm402_vm7, %v370_v0, %v434_v8  ;;  %v1657_v30 = vld [vmem:[%s1442_s9 + $0xa0] sm:$0xff] }
  0xa8   : > { %v467_v41 = vsel %vm403_vm9, %v371_v1, %v435_v10  ;;  %vm400_vm13 = vcmp.gt.f32.partialorder %v1482_v44, 0.0  ;;  %vm2202_vm14 = vcmp.gt.f32.partialorder %v1561_v20, 0.0  ;;  %vm2201_vm4 = vcmp.gt.f32.partialorder %v1564_v21, 0.0 }
  0xa9   : > { %590 = vmax.xlane.f32.xlu1 %v589_v34  ;;  %v1588_v46 = vadd.f32 %v1444_v22, %v319_v38  ;;  %v1591_v47 = vadd.f32 %v1446_v23, %v319_v38  ;;  %v1594_v48 = vadd.f32 %v1444_v22, %v314_v39  ;;  %v1597_v49 = vadd.f32 %v1446_v23, %v314_v39 }
  0xaa   : > { %v1607_v56 = vsel %vm2188_vm10, %v466_v40, -1e+30  ;;  %v1611_v57 = vsel %vm2187_vm11, %v467_v41, -1e+30  ;;  %vm401_vm7 = vcmp.gt.f32.partialorder %v1485_v45, 0.0  ;;  %v464_v58 = vsel %vm400_vm13, %v1482_v44, %v1497_v52  ;;  %v1666_v40 = vld [vmem:[%s1442_s9 + $0xa8] sm:$0xff] }
  0xab   : > { %v1620_v0 = vmul.f32 0.2, %v1588_v46  ;;  %v1623_v1 = vmul.f32 0.2, %v1591_v47  ;;  %v1626_v2 = vmul.f32 0.2, %v1594_v48  ;;  %v598_v8 = vmax.f32 %v1607_v56, %v1611_v57  ;;  %v329_v10 = vpop.permute.xlu1 %328  ;;  %v324_v11 = vpop.permute.xlu0 %323 }
  0xac   : > { %vm2220_vm9 = vcmp.gt.f32.partialorder %v1585_v42, 0.0  ;;  %v1632_v9 = vmul.f32 0.2, %v1597_v49  ;;  %v465_v44 = vsel %vm401_vm7, %v1485_v45, %v1500_v53  ;;  %v1638_v52 = vsel %vm2193_vm12, %v464_v58, -1e+30  ;;  %v1669_v41 = vld [vmem:[%s1442_s9 + $0x90] sm:$0xff] }
  0xad   : > { %vm406_vm13 = vcmp.gt.f32.partialorder %v374_v18, 0.0  ;;  %vm2217_vm11 = vcmp.gt.f32.partialorder %v1600_v54, 0.0  ;;  %vm2215_vm10 = vcmp.gt.f32.partialorder %v1603_v55, 0.0  ;;  %599 = vmax.xlane.f32.xlu1 %v598_v8  ;;  %v1644_v12 = vsel %vm2189_vm15, %v465_v44, -1e+30  ;;  %v1672_v58 = vld [vmem:[%s1442_s9 + $0x98] sm:$0xff] }
  0xae   : > { %v1647_v45 = vadd.f32 %v1444_v22, %v329_v10  ;;  %v1650_v53 = vadd.f32 %v1446_v23, %v329_v10  ;;  %v1653_v13 = vadd.f32 %v1444_v22, %v324_v11  ;;  %vm2216_vm7 = vcmp.gt.f32.partialorder %v1617_v61, 0.0  ;;  %v1816_v61 = vld [vmem:[%s1442_s9 + $0xf0] sm:$0xff] }
  0xaf   : > { %v595_v34 = vmax.f32 %v1638_v52, %v1644_v12  ;;  %v1662_v38 = vadd.f32 %v1446_v23, %v324_v11  ;;  %vm407_vm15 = vcmp.gt.f32.partialorder %v1556_v19, 0.0  ;;  %v470_v39 = vsel %vm406_vm13, %v374_v18, %v438_v33  ;;  %v339_v50 = vpop.permute.xlu1 %338  ;;  %v334_v43 = vpop.permute.xlu0 %333 }
  0xb0   : > { %v1675_v8 = vmul.f32 0.2, %v1647_v45  ;;  %v1678_v44 = vmul.f32 0.2, %v1650_v53  ;;  %v1681_v10 = vmul.f32 0.2, %v1653_v13  ;;  %v471_v11 = vsel %vm407_vm15, %v1556_v19, %v439_v37 }
  0xb1   : > { %596 = vmax.xlane.f32.xlu0 %v595_v34  ;;  %v1685_v18 = vmul.f32 0.2, %v1662_v38  ;;  %v1689_v33 = vsel %vm2194_vm5, %v470_v39, -1e+30  ;;  %v1693_v51 = vsel %vm2198_vm6, %v471_v11, -1e+30  ;;  %v1701_v37 = vadd.f32 %v1444_v22, %v339_v50 }
  0xb2   : > { %vm542_vm13 = vcmp.gt.f32.partialorder %v1657_v30, 0.0  ;;  %v604_v19 = vmax.f32 %v1689_v33, %v1693_v51  ;;  %vm404_vm15 = vcmp.gt.f32.partialorder %v1513_v62, 0.0  ;;  %vm405_vm12 = vcmp.gt.f32.partialorder %v1516_v63, 0.0  ;;  %v1705_v34 = vld [vmem:[%s1442_s9 + $0xc0] sm:$0xff]  ;;  %v1708_v39 = vld [vmem:[%s1442_s9 + $0xc8] sm:$0xff] }
  0xb3   : > { %vm2222_vm5 = vcmp.gt.f32.partialorder %v1666_v40, 0.0  ;;  %v468_v11 = vsel %vm404_vm15, %v1513_v62, %v1535_v6  ;;  %v469_v5 = vsel %vm405_vm12, %v1516_v63, %v1538_v7  ;;  %v1715_v4 = vadd.f32 %v1446_v23, %v339_v50  ;;  %v344_v35 = vpop.permute.xlu0 %343 }
  0xb4   : > { %v1718_v36 = vadd.f32 %v1444_v22, %v334_v43  ;;  %vm540_vm6 = vcmp.gt.f32.partialorder %v1669_v41, 0.0  ;;  %605 = vmax.xlane.f32.xlu1 %v604_v19  ;;  %v1729_v62 = vsel %vm2202_vm14, %v468_v11, -1e+30  ;;  %v1733_v63 = vsel %vm2201_vm4, %v469_v5, -1e+30  ;;  %v349_v5 = vpop.permute.xlu1 %348 }
  0xb5   : > { %2239 = vst [vmem:[#allocation18_spill] sm:$0xff] %v1729_v62  ;;  %2240 = vst [vmem:[#allocation19_spill] sm:$0xff] %v1733_v63  ;;  %v1736_v50 = vmul.f32 0.2, %v1701_v37  ;;  %v1739_v6 = vadd.f32 %v1446_v23, %v334_v43  ;;  %vm541_vm12 = vcmp.gt.f32.partialorder %v1672_v58, 0.0  ;;  %v601_v7 = vmax.f32 %v1729_v62, %v1733_v63  ;;  %v1752_v43 = vld [vmem:[%s1442_s9 + $0xe0] sm:$0xff] }
  0xb6   : > { %v1745_v19 = vmul.f32 0.2, %v1715_v4  ;;  %v450_v11 = vmul.f32 0.2, %v1718_v36  ;;  %vm410_vm15 = vcmp.gt.f32.partialorder %v1594_v48, 0.0  ;;  %vm546_vm4 = vcmp.gt.f32.partialorder %v1705_v34, 0.0 }
  0xb7   : > { %vm547_vm14 = vcmp.gt.f32.partialorder %v1708_v39, 0.0  ;;  %v451_v21 = vmul.f32 0.2, %v1739_v6  ;;  %vm411_vm3 = vcmp.gt.f32.partialorder %v1597_v49, 0.0  ;;  %v474_v20 = vsel %vm410_vm15, %v1594_v48, %v1626_v2  ;;  %602 = vmax.xlane.f32.xlu0 %v601_v7  ;;  %v1774_v48 = vld [vmem:[%s1442_s9 + $0xd0] sm:$0xff] }
  0xb8   : > { %vm408_vm8 = vcmp.gt.f32.partialorder %v1549_v16, 0.0  ;;  %v475_v63 = vsel %vm411_vm3, %v1597_v49, %v1632_v9  ;;  %v1766_v62 = vsel %vm2220_vm9, %v474_v20, -1e+30  ;;  %vm409_vm2 = vcmp.gt.f32.partialorder %v1552_v17, 0.0 }
  0xb9   : > { %v472_v25 = vsel %vm408_vm8, %v1549_v16, %v1573_v31  ;;  %vm544_vm15 = vcmp.gt.f32.partialorder %v1722_v28, 0.0  ;;  %vm545_vm1 = vcmp.gt.f32.partialorder %v1725_v27, 0.0  ;;  %v1778_v2 = vsel %vm2217_vm11, %v475_v63, -1e+30  ;;  %v1791_v16 = vld [vmem:[%s1442_s9 + $0xd8] sm:$0xff] }
  0xba   : > { %v473_v49 = vsel %vm409_vm2, %v1552_v17, %v1576_v32  ;;  %v1784_v20 = vsel %vm2215_vm10, %v472_v25, -1e+30  ;;  %v1787_v9 = vadd.f32 %v1444_v22, %v349_v5  ;;  %vm550_vm3 = vcmp.gt.f32.partialorder %v1752_v43, 0.0 }
  0xbb   : > { %v610_v31 = vmax.f32 %v1766_v62, %v1778_v2  ;;  %v1797_v63 = vsel %vm2216_vm7, %v473_v49, -1e+30  ;;  %v1800_v17 = vadd.f32 %v1446_v23, %v349_v5  ;;  %v390_v25 = vadd.f32 %v1444_v22, %v344_v35 }
  0xbc   : > { %vm551_vm2 = vcmp.gt.f32.partialorder %v1760_v26, 0.0  ;;  %v607_v32 = vmax.f32 %v1784_v20, %v1797_v63  ;;  %v456_v7 = vmul.f32 0.2, %v1787_v9  ;;  %v391_v55 = vadd.f32 %v1446_v23, %v344_v35 }
  0xbd   : > { %vm414_vm8 = vcmp.gt.f32.partialorder %v1653_v13, 0.0  ;;  %vm548_vm10 = vcmp.gt.f32.partialorder %v1774_v48, 0.0  ;;  %611 = vmax.xlane.f32.xlu1 %v610_v31  ;;  %v457_v49 = vmul.f32 0.2, %v1800_v17  ;;  %v454_v5 = vmul.f32 0.2, %v390_v25 }
  0xbe   : > { %vm415_vm7 = vcmp.gt.f32.partialorder %v1662_v38, 0.0  ;;  %v478_v22 = vsel %vm414_vm8, %v1653_v13, %v1681_v10  ;;  %vm549_vm11 = vcmp.gt.f32.partialorder %v1791_v16, 0.0  ;;  %608 = vmax.xlane.f32.xlu0 %v607_v32  ;;  %v455_v54 = vmul.f32 0.2, %v391_v55 }
  0xbf   : > { %v479_v23 = vsel %vm415_vm7, %v1662_v38, %v1685_v18  ;;  %v1822_v35 = vsel %vm542_vm13, %v478_v22, -1e+30  ;;  %vm412_vm9 = vcmp.gt.f32.partialorder %v1588_v46, 0.0  ;;  %vm413_vm8 = vcmp.gt.f32.partialorder %v1591_v47, 0.0 }
  0xc0   : > { %v1827_v31 = vsel %vm2222_vm5, %v479_v23, -1e+30  ;;  %v476_v13 = vsel %vm412_vm9, %v1588_v46, %v1620_v0  ;;  %vm418_vm0 = vcmp.gt.f32.partialorder %v1718_v36, 0.0  ;;  %v477_v10 = vsel %vm413_vm8, %v1591_v47, %v1623_v1 }
  0xc1   : > { %v616_v38 = vmax.f32 %v1822_v35, %v1827_v31  ;;  %v1839_v18 = vsel %vm540_vm6, %v476_v13, -1e+30  ;;  %vm419_vm7 = vcmp.gt.f32.partialorder %v1739_v6, 0.0  ;;  %vm552_vm5 = vcmp.gt.f32.partialorder %v1816_v61, 0.0 }
  0xc2   : > { %v1845_v32 = vsel %vm541_vm12, %v477_v10, -1e+30  ;;  %v482_v46 = vsel %vm418_vm0, %v1718_v36, %v450_v11  ;;  %v483_v0 = vsel %vm419_vm7, %v1739_v6, %v451_v21  ;;  %vm416_vm9 = vcmp.gt.f32.partialorder %v1647_v45, 0.0 }
  0xc3   : > { %617 = vmax.xlane.f32.xlu1 %v616_v38  ;;  %v613_v47 = vmax.f32 %v1839_v18, %v1845_v32  ;;  %v1854_v1 = vsel %vm546_vm4, %v482_v46, -1e+30  ;;  %v1858_v22 = vsel %vm547_vm14, %v483_v0, -1e+30  ;;  %vm417_vm8 = vcmp.gt.f32.partialorder %v1650_v53, 0.0 }
  0xc4   : > { %v622_v36 = vmax.f32 %v1854_v1, %v1858_v22  ;;  %v480_v21 = vsel %vm416_vm9, %v1647_v45, %v1675_v8  ;;  %v481_v6 = vsel %vm417_vm8, %v1650_v53, %v1678_v44  ;;  %vm422_vm0 = vcmp.gt.f32.partialorder %v390_v25, 0.0  ;;  %v1883_v53 = vld [vmem:[%s1442_s9 + $0xf8] sm:$0xff] }
  0xc5   : > { %614 = vmax.xlane.f32.xlu0 %v613_v47  ;;  %v1869_v11 = vsel %vm544_vm15, %v480_v21, -1e+30  ;;  %v1873_v23 = vsel %vm545_vm1, %v481_v6, -1e+30  ;;  %vm423_vm7 = vcmp.gt.f32.partialorder %v391_v55, 0.0  ;;  %v486_v13 = vsel %vm422_vm0, %v390_v25, %v454_v5 }
  0xc6   : > { %v619_v38 = vmax.f32 %v1869_v11, %v1873_v23  ;;  %v487_v10 = vsel %vm423_vm7, %v391_v55, %v455_v54  ;;  %v1879_v45 = vsel %vm550_vm3, %v486_v13, -1e+30  ;;  %vm420_vm9 = vcmp.gt.f32.partialorder %v1701_v37, 0.0 }
  0xc7   : > { %623 = vmax.xlane.f32.xlu1 %v622_v36  ;;  %v1887_v8 = vsel %vm551_vm2, %v487_v10, -1e+30  ;;  %vm421_vm8 = vcmp.gt.f32.partialorder %v1715_v4, 0.0  ;;  %v484_v44 = vsel %vm420_vm9, %v1701_v37, %v1736_v50  ;;  %vm424_vm0 = vcmp.gt.f32.partialorder %v1787_v9, 0.0 }
  0xc8   : > { %v628_v54 = vmax.f32 %v1879_v45, %v1887_v8  ;;  %v485_v55 = vsel %vm421_vm8, %v1715_v4, %v1745_v19  ;;  %v1899_v25 = vsel %vm548_vm10, %v484_v44, -1e+30  ;;  %vm425_vm7 = vcmp.gt.f32.partialorder %v1800_v17, 0.0 }
  0xc9   : > { %620 = vmax.xlane.f32.xlu0 %v619_v38  ;;  %v1904_v5 = vsel %vm549_vm11, %v485_v55, -1e+30  ;;  %v488_v37 = vsel %vm424_vm0, %v1787_v9, %v456_v7  ;;  %v489_v50 = vsel %vm425_vm7, %v1800_v17, %v457_v49  ;;  %vm553_vm9 = vcmp.gt.f32.partialorder %v1883_v53, 0.0 }
  0xca   : > { %v625_v4 = vmax.f32 %v1899_v25, %v1904_v5  ;;  %v1913_v19 = vsel %vm552_vm5, %v488_v37, -1e+30  ;;  %v1917_v46 = vsel %vm553_vm9, %v489_v50, -1e+30  ;;  %vm2241_vm8 = vcmp.gt.f32.partialorder %v1449_v24, 0.0 }
  0xcb   : > { %629 = vmax.xlane.f32.xlu1 %v628_v54  ;;  %v631_v9 = vmax.f32 %v1913_v19, %v1917_v46 }
  0xcd   : > { %626 = vmax.xlane.f32.xlu0 %v625_v4 }
  0xd1   : > { %632 = vmax.xlane.f32.xlu0 %v631_v9 }
 0x130   : > { %v588_v17 = vpop.xlane.xlu0 %587 }
 0x131   : > { %v634_v7 = vsub.f32 %v1506_v59, %v588_v17  ;;  %v635_v49 = vsub.f32 %v1510_v60, %v588_v17 }
 0x133   : > { %v666_v0 = vmul.f32 1.442695, %v634_v7  ;;  %v668_v47 = vmul.f32 1.442695, %v635_v49 }
 0x134   : > { %v594_v36 = vpop.xlane.xlu0 %593 }
 0x135   : > { %1216 = vpow2.f32 %v666_v0  ;;  %v638_v6 = vsub.f32 %v1525_v3, %v594_v36  ;;  %v639_v13 = vsub.f32 %v1546_v15, %v594_v36  ;;  %v2242_v36 = vld [vmem:[#allocation2_spill] sm:$0xff] }
 0x136   : > { %v591_v21 = vpop.xlane.xlu1 %590  ;;  %1218 = vpow2.f32 %v668_v47  ;;  %vm2243_vm0 = vcmp.gt.f32.partialorder %v2242_v36, 0.0  ;;  %v2252_v36 = vld [vmem:[#allocation5_spill] sm:$0xff] }
 0x137   : > { %v636_v38 = vsub.f32 %v1542_v14, %v591_v21  ;;  %v637_v10 = vsub.f32 %v1568_v29, %v591_v21  ;;  %v674_v44 = vmul.f32 1.442695, %v638_v6  ;;  %v676_v59 = vmul.f32 1.442695, %v639_v13 }
 0x139   : > { %v670_v54 = vmul.f32 1.442695, %v636_v38  ;;  %v672_v55 = vmul.f32 1.442695, %v637_v10  ;;  %1220 = vpow2.f32 %v674_v44 }
 0x13a   : > { %v600_v60 = vpop.xlane.xlu1 %599 }
 0x13b   : > { %1222 = vpow2.f32 %v670_v54  ;;  %v642_v37 = vsub.f32 %v1607_v56, %v600_v60  ;;  %v643_v50 = vsub.f32 %v1611_v57, %v600_v60  ;;  %v2246_v60 = vld [vmem:[#allocation3_spill] sm:$0xff] }
 0x13c   : > { %1224 = vpow2.f32 %v672_v55  ;;  %vm2247_vm7 = vcmp.gt.f32.partialorder %v2246_v60, 0.0  ;;  %v2258_v60 = vld [vmem:[#allocation9_spill] sm:$0xff] }
 0x13d   : > { %1226 = vpow2.f32 %v676_v59  ;;  %v682_v3 = vmul.f32 1.442695, %v642_v37  ;;  %v684_v15 = vmul.f32 1.442695, %v643_v50 }
 0x13e   : > { %v597_v4 = vpop.xlane.xlu0 %596 }
 0x13f   : > { %v640_v14 = vsub.f32 %v1638_v52, %v597_v4  ;;  %v641_v29 = vsub.f32 %v1644_v12, %v597_v4  ;;  %1228 = vpow2.f32 %v682_v3  ;;  %v1217_v9 = vpop.eup %1216 }
 0x140   : > { %1230 = vpow2.f32 %v684_v15  ;;  %v1219_v0 = vpop.eup %1218  ;;  %v1935_v47 = vsel %vm2241_vm8, %v1217_v9, 0.0  ;;  %v2248_v15 = vld [vmem:[#allocation6_spill] sm:$0xff] }
 0x141   : > { %v678_v17 = vmul.f32 1.442695, %v640_v14  ;;  %v680_v7 = vmul.f32 1.442695, %v641_v29  ;;  %v606_v49 = vpop.xlane.xlu1 %605  ;;  %v1939_v52 = vsel %vm2243_vm0, %v1219_v0, 0.0  ;;  %vm2249_vm8 = vcmp.gt.f32.partialorder %v2248_v15, 0.0 }
 0x142   : > { %v646_v56 = vsub.f32 %v1689_v33, %v606_v49  ;;  %v647_v57 = vsub.f32 %v1693_v51, %v606_v49  ;;  %v762_v13 = vadd.f32 %v1939_v52, %v1935_v47  ;;  %v2244_v33 = vld [vmem:[#allocation18_spill] sm:$0xff]  ;;  %v2245_v51 = vld [vmem:[#allocation19_spill] sm:$0xff]  ;;  %v2250_v14 = vld [vmem:[#allocation4_spill] sm:$0xff] }
 0x143   : > { %1232 = vpow2.f32 %v678_v17  ;;  %v1221_v38 = vpop.eup %1220  ;;  %vm2251_vm0 = vcmp.gt.f32.partialorder %v2250_v14, 0.0  ;;  %v2260_v15 = vld [vmem:[#allocation10_spill] sm:$0xff] }
 0x144   : > { %1234 = vpow2.f32 %v680_v7  ;;  %v690_v12 = vmul.f32 1.442695, %v646_v56  ;;  %v692_v21 = vmul.f32 1.442695, %v647_v57  ;;  %v603_v6 = vpop.xlane.xlu0 %602  ;;  %763 = vadd.xlane.f32.xlu1 %v762_v13  ;;  %v1955_v29 = vsel %vm2251_vm0, %v1221_v38, 0.0 }
 0x145   : > { %v644_v10 = vsub.f32 %v2244_v33, %v603_v6  ;;  %v645_v44 = vsub.f32 %v2245_v51, %v603_v6  ;;  %v1223_v24 = vpop.eup %1222 }
 0x146   : > { %1236 = vpow2.f32 %v690_v12  ;;  %v1225_v54 = vpop.eup %1224  ;;  %v1947_v37 = vsel %vm2247_vm7, %v1223_v24, 0.0  ;;  %vm2253_vm7 = vcmp.gt.f32.partialorder %v2252_v36, 0.0 }
 0x147   : > { %1238 = vpow2.f32 %v692_v21  ;;  %v686_v55 = vmul.f32 1.442695, %v644_v10  ;;  %v688_v59 = vmul.f32 1.442695, %v645_v44  ;;  %v1227_v50 = vpop.eup %1226  ;;  %v1951_v4 = vsel %vm2249_vm8, %v1225_v54, 0.0 }
 0x148   : > { %v765_v49 = vadd.f32 %v1951_v4, %v1947_v37  ;;  %v1965_v12 = vsel %vm2253_vm7, %v1227_v50, 0.0  ;;  %vm2259_vm7 = vcmp.gt.f32.partialorder %v2258_v60, 0.0 }
 0x149   : > { %1240 = vpow2.f32 %v686_v55  ;;  %v1229_v0 = vpop.eup %1228 }
 0x14a   : > { %v612_v3 = vpop.xlane.xlu1 %611  ;;  %1242 = vpow2.f32 %v688_v59  ;;  %v1231_v21 = vpop.eup %1230  ;;  %766 = vadd.xlane.f32.xlu0 %v765_v49 }
 0x14b   : > { %v650_v9 = vsub.f32 %v1766_v62, %v612_v3  ;;  %v651_v17 = vsub.f32 %v1778_v2, %v612_v3  ;;  %v609_v7 = vpop.xlane.xlu0 %608  ;;  %v768_v62 = vadd.f32 %v1965_v12, %v1955_v29  ;;  %v2254_v2 = vld [vmem:[#allocation7_spill] sm:$0xff] }
 0x14c   : > { %v648_v56 = vsub.f32 %v1784_v20, %v609_v7  ;;  %v649_v57 = vsub.f32 %v1797_v63, %v609_v7  ;;  %vm2255_vm8 = vcmp.gt.f32.partialorder %v2254_v2, 0.0  ;;  %v2256_v20 = vld [vmem:[#allocation8_spill] sm:$0xff] }
 0x14d   : > { %v698_v6 = vmul.f32 1.442695, %v650_v9  ;;  %v700_v13 = vmul.f32 1.442695, %v651_v17  ;;  %v1971_v38 = vsel %vm2255_vm8, %v1229_v0, 0.0  ;;  %vm2257_vm0 = vcmp.gt.f32.partialorder %v2256_v20, 0.0  ;;  %v1233_v51 = vpop.eup %1232  ;;  %769 = vadd.xlane.f32.xlu1 %v768_v62 }
 0x14e   : > { %v694_v33 = vmul.f32 1.442695, %v648_v56  ;;  %v696_v10 = vmul.f32 1.442695, %v649_v57  ;;  %v1975_v63 = vsel %vm2257_vm0, %v1231_v21, 0.0  ;;  %v1235_v54 = vpop.eup %1234  ;;  %v1983_v50 = vsel %vm2259_vm7, %v1233_v51, 0.0 }
 0x14f   : > { %1244 = vpow2.f32 %v698_v6  ;;  %v774_v24 = vadd.f32 %v1975_v63, %v1971_v38  ;;  %vm2261_vm8 = vcmp.gt.f32.partialorder %v2260_v15, 0.0  ;;  %v2262_v57 = vld [vmem:[#allocation11_spill] sm:$0xff] }
 0x150   : > { %v618_v44 = vpop.xlane.xlu1 %617  ;;  %1246 = vpow2.f32 %v700_v13  ;;  %v1987_v14 = vsel %vm2261_vm8, %v1235_v54, 0.0  ;;  %v1237_v9 = vpop.eup %1236  ;;  %vm2263_vm0 = vcmp.gt.f32.partialorder %v2262_v57, 0.0  ;;  %v2266_v54 = vld [vmem:[#allocation13_spill] sm:$0xff] }
 0x151   : > { %v654_v55 = vsub.f32 %v1822_v35, %v618_v44  ;;  %v655_v59 = vsub.f32 %v1827_v31, %v618_v44  ;;  %1248 = vpow2.f32 %v694_v33  ;;  %v1239_v0 = vpop.eup %1238  ;;  %775 = vadd.xlane.f32.xlu1 %v774_v24  ;;  %v771_v56 = vadd.f32 %v1987_v14, %v1983_v50 }
 0x152   : > { %v615_v3 = vpop.xlane.xlu0 %614  ;;  %1250 = vpow2.f32 %v696_v10  ;;  %v1995_v36 = vsel %vm2263_vm0, %v1237_v9, 0.0  ;;  %vm2267_vm8 = vcmp.gt.f32.partialorder %v2266_v54, 0.0 }
 0x153   : > { %v706_v17 = vmul.f32 1.442695, %v654_v55  ;;  %v708_v7 = vmul.f32 1.442695, %v655_v59  ;;  %v652_v49 = vsub.f32 %v1839_v18, %v615_v3  ;;  %v653_v35 = vsub.f32 %v1845_v32, %v615_v3  ;;  %v1241_v62 = vpop.eup %1240  ;;  %772 = vadd.xlane.f32.xlu0 %v771_v56  ;;  %v2264_v32 = vld [vmem:[#allocation12_spill] sm:$0xff] }
 0x154   : > { %v624_v31 = vpop.xlane.xlu1 %623  ;;  %vm2265_vm7 = vcmp.gt.f32.partialorder %v2264_v32, 0.0  ;;  %v1243_v10 = vpop.eup %1242  ;;  %v2009_v55 = vsel %vm2267_vm8, %v1241_v62, 0.0  ;;  %v2273_v62 = vld [vmem:[#allocation16_spill] sm:$0xff] }
 0x155   : > { %1252 = vpow2.f32 %v706_v17  ;;  %v702_v21 = vmul.f32 1.442695, %v652_v49  ;;  %v658_v6 = vsub.f32 %v1854_v1, %v624_v31  ;;  %v659_v13 = vsub.f32 %v1858_v22, %v624_v31 }
 0x156   : > { %1254 = vpow2.f32 %v708_v7  ;;  %v704_v18 = vmul.f32 1.442695, %v653_v35  ;;  %v621_v2 = vpop.xlane.xlu0 %620  ;;  %v2001_v33 = vsel %vm2265_vm7, %v1239_v0, 0.0  ;;  %vm2270_vm7 = vcmp.gt.f32.partialorder %v1585_v42, 0.0 }
 0x157   : > { %1256 = vpow2.f32 %v702_v21  ;;  %v714_v20 = vmul.f32 1.442695, %v658_v6  ;;  %v716_v51 = vmul.f32 1.442695, %v659_v13  ;;  %v656_v44 = vsub.f32 %v1869_v11, %v621_v2  ;;  %v2271_v6 = vld [vmem:[#allocation15_spill] sm:$0xff] }
 0x158   : > { %1258 = vpow2.f32 %v704_v18  ;;  %v657_v1 = vsub.f32 %v1873_v23, %v621_v2  ;;  %v630_v24 = vpop.xlane.xlu1 %629  ;;  %v780_v22 = vadd.f32 %v2001_v33, %v1995_v36  ;;  %v2268_v23 = vld [vmem:[#allocation14_spill] sm:$0xff]  ;;  %vm2272_vm8 = vcmp.gt.f32.partialorder %v2271_v6, 0.0  ;;  %v2275_v2 = vld [vmem:[#allocation17_spill] sm:$0xff] }
 0x159   : > { %1260 = vpow2.f32 %v714_v20  ;;  %v710_v59 = vmul.f32 1.442695, %v656_v44  ;;  %v662_v60 = vsub.f32 %v1879_v45, %v630_v24  ;;  %v663_v3 = vsub.f32 %v1887_v8, %v630_v24  ;;  %v1245_v15 = vpop.eup %1244 }
 0x15a   : > { %1262 = vpow2.f32 %v716_v51  ;;  %v712_v11 = vmul.f32 1.442695, %v657_v1  ;;  %v627_v9 = vpop.xlane.xlu0 %626  ;;  %781 = vadd.xlane.f32.xlu1 %v780_v22  ;;  %vm2269_vm0 = vcmp.gt.f32.partialorder %v2268_v23, 0.0  ;;  %v1247_v7 = vpop.eup %1246  ;;  %v2023_v56 = vsel %vm2270_vm7, %v1245_v15, 0.0 }
 0x15b   : > { %v2015_v17 = vsel %vm2269_vm0, %v1243_v10, 0.0  ;;  %1264 = vpow2.f32 %v710_v59  ;;  %v722_v49 = vmul.f32 1.442695, %v662_v60  ;;  %v724_v0 = vmul.f32 1.442695, %v663_v3  ;;  %v1249_v31 = vpop.eup %1248 }
 0x15c   : > { %v660_v35 = vsub.f32 %v1899_v25, %v627_v9  ;;  %1266 = vpow2.f32 %v712_v11  ;;  %v661_v45 = vsub.f32 %v1904_v5, %v627_v9  ;;  %v777_v8 = vadd.f32 %v2015_v17, %v2009_v55  ;;  %v1251_v57 = vpop.eup %1250 }
 0x15d   : > { %1268 = vpow2.f32 %v722_v49  ;;  %v2027_v13 = vsel %vm2272_vm8, %v1247_v7, 0.0  ;;  %vm2274_vm0 = vcmp.gt.f32.partialorder %v2273_v62, 0.0  ;;  %vm2276_vm7 = vcmp.gt.f32.partialorder %v2275_v2, 0.0 }
 0x15e   : > { %v718_v21 = vmul.f32 1.442695, %v660_v35  ;;  %v2031_v25 = vsel %vm2274_vm0, %v1249_v31, 0.0  ;;  %1270 = vpow2.f32 %v724_v0  ;;  %v720_v5 = vmul.f32 1.442695, %v661_v45  ;;  %778 = vadd.xlane.f32.xlu0 %v777_v8  ;;  %v633_v18 = vpop.xlane.xlu0 %632 }
 0x15f   : > { %v786_v42 = vadd.f32 %v2027_v13, %v2023_v56  ;;  %v2037_v32 = vsel %vm2276_vm7, %v1251_v57, 0.0  ;;  %v1253_v10 = vpop.eup %1252  ;;  %v664_v20 = vsub.f32 %v1913_v19, %v633_v18  ;;  %v665_v51 = vsub.f32 %v1917_v46, %v633_v18 }
 0x160   : > { %1272 = vpow2.f32 %v718_v21  ;;  %v783_v44 = vadd.f32 %v2037_v32, %v2031_v25  ;;  %v1255_v1 = vpop.eup %1254  ;;  %v2045_v24 = vsel %vm542_vm13, %v1253_v10, 0.0  ;;  %vm2277_vm8 = vcmp.gt.f32.partialorder %v1666_v40, 0.0 }
 0x161   : > { %1274 = vpow2.f32 %v720_v5  ;;  %787 = vadd.xlane.f32.xlu1 %v786_v42  ;;  %v1257_v22 = vpop.eup %1256  ;;  %v726_v54 = vmul.f32 1.442695, %v664_v20  ;;  %v728_v59 = vmul.f32 1.442695, %v665_v51  ;;  %v2049_v60 = vsel %vm2277_vm8, %v1255_v1, 0.0 }
 0x162   : > { %v1259_v19 = vpop.eup %1258  ;;  %784 = vadd.xlane.f32.xlu0 %v783_v44  ;;  %v792_v46 = vadd.f32 %v2049_v60, %v2045_v24  ;;  %v2055_v3 = vsel %vm540_vm6, %v1257_v22, 0.0 }
 0x163   : > { %v1261_v15 = vpop.eup %1260  ;;  %1276 = vpow2.f32 %v726_v54  ;;  %v2059_v30 = vsel %vm541_vm12, %v1259_v19, 0.0 }
 0x164   : > { %v1263_v11 = vpop.eup %1262  ;;  %1278 = vpow2.f32 %v728_v59  ;;  %v789_v40 = vadd.f32 %v2059_v30, %v2055_v3  ;;  %v2065_v9 = vsel %vm546_vm4, %v1261_v15, 0.0 }
 0x165   : > { %793 = vadd.xlane.f32.xlu1 %v792_v46  ;;  %v1265_v23 = vpop.eup %1264  ;;  %v2069_v41 = vsel %vm547_vm14, %v1263_v11, 0.0 }
 0x166   : > { %v1267_v7 = vpop.eup %1266  ;;  %790 = vadd.xlane.f32.xlu0 %v789_v40  ;;  %v798_v58 = vadd.f32 %v2069_v41, %v2065_v9  ;;  %v2075_v49 = vsel %vm544_vm15, %v1265_v23, 0.0 }
 0x167   : > { %v1269_v0 = vpop.eup %1268  ;;  %v2079_v34 = vsel %vm545_vm1, %v1267_v7, 0.0 }
 0x168   : > { %v1271_v35 = vpop.eup %1270  ;;  %v795_v39 = vadd.f32 %v2079_v34, %v2075_v49  ;;  %v2085_v31 = vsel %vm550_vm3, %v1269_v0, 0.0 }
 0x169   : > { %799 = vadd.xlane.f32.xlu1 %v798_v58  ;;  %v2089_v28 = vsel %vm551_vm2, %v1271_v35, 0.0 }
 0x16a   : > { %v1273_v45 = vpop.eup %1272  ;;  %796 = vadd.xlane.f32.xlu0 %v795_v39  ;;  %v804_v27 = vadd.f32 %v2089_v28, %v2085_v31 }
 0x16b   : > { %v1275_v8 = vpop.eup %1274  ;;  %v2095_v57 = vsel %vm548_vm10, %v1273_v45, 0.0 }
 0x16c   : > { %v2099_v21 = vsel %vm549_vm11, %v1275_v8, 0.0 }
 0x16d   : > { %805 = vadd.xlane.f32.xlu1 %v804_v27  ;;  %v801_v43 = vadd.f32 %v2099_v21, %v2095_v57  ;;  %v1277_v26 = vpop.eup %1276 }
 0x16e   : > { %v1279_v6 = vpop.eup %1278  ;;  %v2105_v62 = vsel %vm552_vm5, %v1277_v26, 0.0 }
 0x16f   : > { %802 = vadd.xlane.f32.xlu0 %v801_v43  ;;  %v2109_v48 = vsel %vm553_vm9, %v1279_v6, 0.0 }
 0x170   : > { %v807_v16 = vadd.f32 %v2109_v48, %v2105_v62 }
 0x173   : > { %808 = vadd.xlane.f32.xlu0 %v807_v16 }
 0x1d1   : > { %v764_v5 = vpop.xlane.xlu1 %763 }
 0x1d2   : > { %vm810_vm1 = vcmp.gt.f32.partialorder %v764_v5, 0.0 }
 0x1d3   : > { %v826_v18 = vsel %vm810_vm1, %v764_v5, 1.0 }
 0x1d4   : > { %1280 = vrcp.f32 %v826_v18 }
 0x1d7   : > { %v767_v42 = vpop.xlane.xlu0 %766 }
 0x1d8   : > { %vm811_vm4 = vcmp.gt.f32.partialorder %v767_v42, 0.0 }
 0x1d9   : > { %v827_v10 = vsel %vm811_vm4, %v767_v42, 1.0 }
 0x1da   : > { %v770_v2 = vpop.xlane.xlu1 %769  ;;  %1282 = vrcp.f32 %v827_v10 }
 0x1db   : > { %vm812_vm10 = vcmp.gt.f32.partialorder %v770_v2, 0.0 }
 0x1dc   : > { %v828_v61 = vsel %vm812_vm10, %v770_v2, 1.0 }
 0x1dd   : > { %1284 = vrcp.f32 %v828_v61 }
 0x1de   : > { %v776_v53 = vpop.xlane.xlu1 %775  ;;  %v1281_v20 = vpop.eup %1280 }
 0x1df   : > { %vm814_vm11 = vcmp.gt.f32.partialorder %v776_v53, 0.0  ;;  %v858_v1 = vmul.f32 %v1281_v20, %v1935_v47  ;;  %v859_v22 = vmul.f32 %v1281_v20, %v1939_v52 }
 0x1e0   : > { %v830_v51 = vsel %vm814_vm11, %v776_v53, 1.0  ;;  %v773_v44 = vpop.xlane.xlu0 %772 }
 0x1e1   : > { %1286 = vrcp.f32 %v830_v51  ;;  %vm813_vm5 = vcmp.gt.f32.partialorder %v773_v44, 0.0  ;;  %v1157_v59 = vpack.c.bf16 %v859_v22, %v858_v1 }
 0x1e2   : > { %v829_v54 = vsel %vm813_vm5, %v773_v44, 1.0 }
 0x1e3   : > { %1288 = vrcp.f32 %v829_v54  ;;  %986 = vst [vmem:[%s2119_s13] sm:$0xff] %v1157_v59 }
 0x1e4   : > { %v1283_v46 = vpop.eup %1282 }
 0x1e5   : > { %v860_v47 = vmul.f32 %v1283_v46, %v1947_v37  ;;  %v861_v52 = vmul.f32 %v1283_v46, %v1951_v4 }
 0x1e7   : > { %v782_v19 = vpop.xlane.xlu1 %781  ;;  %v1285_v11 = vpop.eup %1284  ;;  %v1158_v7 = vpack.c.bf16 %v861_v52, %v860_v47 }
 0x1e8   : > { %vm816_vm6 = vcmp.gt.f32.partialorder %v782_v19, 0.0  ;;  %v862_v40 = vmul.f32 %v1285_v11, %v1955_v29  ;;  %v863_v23 = vmul.f32 %v1285_v11, %v1965_v12 }
 0x1e9   : > { %v832_v15 = vsel %vm816_vm6, %v782_v19, 1.0  ;;  %987 = vst [vmem:[%s2119_s13 + $0x8] sm:$0xff] %v1158_v7 }
 0x1ea   : > { %1290 = vrcp.f32 %v832_v15  ;;  %v1159_v0 = vpack.c.bf16 %v863_v23, %v862_v40 }
 0x1eb   : > { %v779_v58 = vpop.xlane.xlu0 %778  ;;  %v1287_v45 = vpop.eup %1286 }
 0x1ec   : > { %vm815_vm14 = vcmp.gt.f32.partialorder %v779_v58, 0.0  ;;  %988 = vst [vmem:[%s2119_s13 + $0x10] sm:$0xff] %v1159_v0  ;;  %v866_v37 = vmul.f32 %v1287_v45, %v1971_v38  ;;  %v867_v4 = vmul.f32 %v1287_v45, %v1975_v63 }
 0x1ed   : > { %v831_v35 = vsel %vm815_vm14, %v779_v58, 1.0  ;;  %v1289_v27 = vpop.eup %1288 }
 0x1ee   : > { %v788_v39 = vpop.xlane.xlu1 %787  ;;  %1292 = vrcp.f32 %v831_v35  ;;  %v1161_v12 = vpack.c.bf16 %v867_v4, %v866_v37  ;;  %v864_v43 = vmul.f32 %v1289_v27, %v1983_v50  ;;  %v865_v26 = vmul.f32 %v1289_v27, %v1987_v14 }
 0x1ef   : > { %vm818_vm13 = vcmp.gt.f32.partialorder %v788_v39, 0.0  ;;  %v785_v29 = vpop.xlane.xlu0 %784 }
 0x1f0   : > { %v834_v8 = vsel %vm818_vm13, %v788_v39, 1.0  ;;  %vm817_vm12 = vcmp.gt.f32.partialorder %v785_v29, 0.0  ;;  %990 = vst [vmem:[%s2119_s13 + $0x20] sm:$0xff] %v1161_v12  ;;  %v1160_v5 = vpack.c.bf16 %v865_v26, %v864_v43 }
 0x1f1   : > { %1294 = vrcp.f32 %v834_v8  ;;  %v833_v6 = vsel %vm817_vm12, %v785_v29, 1.0 }
 0x1f2   : > { %v794_v16 = vpop.xlane.xlu1 %793  ;;  %1296 = vrcp.f32 %v833_v6  ;;  %989 = vst [vmem:[%s2119_s13 + $0x18] sm:$0xff] %v1160_v5 }
 0x1f3   : > { %vm820_vm15 = vcmp.gt.f32.partialorder %v794_v16, 0.0  ;;  %v791_v18 = vpop.xlane.xlu0 %790 }
 0x1f4   : > { %v836_v38 = vsel %vm820_vm15, %v794_v16, 1.0  ;;  %v1291_v63 = vpop.eup %1290  ;;  %vm819_vm3 = vcmp.gt.f32.partialorder %v791_v18, 0.0 }
 0x1f5   : > { %1298 = vrcp.f32 %v836_v38  ;;  %v870_v42 = vmul.f32 %v1291_v63, %v1995_v36  ;;  %v871_v2 = vmul.f32 %v1291_v63, %v2001_v33  ;;  %v835_v50 = vsel %vm819_vm3, %v791_v18, 1.0 }
 0x1f6   : > { %v800_v10 = vpop.xlane.xlu1 %799  ;;  %1300 = vrcp.f32 %v835_v50 }
 0x1f7   : > { %vm822_vm2 = vcmp.gt.f32.partialorder %v800_v10, 0.0  ;;  %v1163_v14 = vpack.c.bf16 %v871_v2, %v870_v42  ;;  %v797_v53 = vpop.xlane.xlu0 %796 }
 0x1f8   : > { %v838_v61 = vsel %vm822_vm2, %v800_v10, 1.0  ;;  %v1293_v20 = vpop.eup %1292  ;;  %vm821_vm9 = vcmp.gt.f32.partialorder %v797_v53, 0.0 }
 0x1f9   : > { %1302 = vrcp.f32 %v838_v61  ;;  %992 = vst [vmem:[%s2119_s13 + $0x30] sm:$0xff] %v1163_v14  ;;  %v868_v51 = vmul.f32 %v1293_v20, %v2009_v55  ;;  %v869_v44 = vmul.f32 %v1293_v20, %v2015_v17  ;;  %v837_v1 = vsel %vm821_vm9, %v797_v53, 1.0 }
 0x1fa   : > { %v806_v36 = vpop.xlane.xlu1 %805  ;;  %1304 = vrcp.f32 %v837_v1 }
 0x1fb   : > { %v1295_v22 = vpop.eup %1294  ;;  %vm824_vm0 = vcmp.gt.f32.partialorder %v806_v36, 0.0  ;;  %v1162_v33 = vpack.c.bf16 %v869_v44, %v868_v51 }
 0x1fc   : > { %v874_v54 = vmul.f32 %v1295_v22, %v2023_v56  ;;  %v875_v59 = vmul.f32 %v1295_v22, %v2027_v13  ;;  %v840_v19 = vsel %vm824_vm0, %v806_v36, 1.0  ;;  %v803_v46 = vpop.xlane.xlu0 %802  ;;  %v1297_v47 = vpop.eup %1296 }
 0x1fd   : > { %1306 = vrcp.f32 %v840_v19  ;;  %vm823_vm7 = vcmp.gt.f32.partialorder %v803_v46, 0.0  ;;  %991 = vst [vmem:[%s2119_s13 + $0x28] sm:$0xff] %v1162_v33  ;;  %v872_v17 = vmul.f32 %v1297_v47, %v2031_v25  ;;  %v873_v52 = vmul.f32 %v1297_v47, %v2037_v32 }
 0x1fe   : > { %v1165_v55 = vpack.c.bf16 %v875_v59, %v874_v54  ;;  %v839_v15 = vsel %vm823_vm7, %v803_v46, 1.0 }
 0x1ff   : > { %v1299_v11 = vpop.eup %1298  ;;  %1308 = vrcp.f32 %v839_v15  ;;  %v1164_v56 = vpack.c.bf16 %v873_v52, %v872_v17 }
 0x200   : > { %994 = vst [vmem:[%s2119_s13 + $0x40] sm:$0xff] %v1165_v55  ;;  %v878_v13 = vmul.f32 %v1299_v11, %v2045_v24  ;;  %v879_v40 = vmul.f32 %v1299_v11, %v2049_v60  ;;  %v809_v23 = vpop.xlane.xlu0 %808  ;;  %v1301_v7 = vpop.eup %1300 }
 0x201   : > { %vm825_vm8 = vcmp.gt.f32.partialorder %v809_v23, 0.0  ;;  %993 = vst [vmem:[%s2119_s13 + $0x38] sm:$0xff] %v1164_v56  ;;  %v876_v25 = vmul.f32 %v1301_v7, %v2055_v3  ;;  %v877_v32 = vmul.f32 %v1301_v7, %v2059_v30 }
 0x202   : > { %v1167_v58 = vpack.c.bf16 %v879_v40, %v878_v13  ;;  %v841_v0 = vsel %vm825_vm8, %v809_v23, 1.0 }
 0x203   : > { %v1303_v35 = vpop.eup %1302  ;;  %1310 = vrcp.f32 %v841_v0  ;;  %v1166_v39 = vpack.c.bf16 %v877_v32, %v876_v25 }
 0x204   : > { %996 = vst [vmem:[%s2119_s13 + $0x50] sm:$0xff] %v1167_v58  ;;  %v882_v24 = vmul.f32 %v1303_v35, %v2065_v9  ;;  %v883_v60 = vmul.f32 %v1303_v35, %v2069_v41  ;;  %v1305_v45 = vpop.eup %1304 }
 0x205   : > { %995 = vst [vmem:[%s2119_s13 + $0x48] sm:$0xff] %v1166_v39  ;;  %v880_v4 = vmul.f32 %v1305_v45, %v2075_v49  ;;  %v881_v3 = vmul.f32 %v1305_v45, %v2079_v34 }
 0x206   : > { %v1169_v37 = vpack.c.bf16 %v883_v60, %v882_v24 }
 0x207   : > { %v1307_v30 = vpop.eup %1306  ;;  %v1168_v8 = vpack.c.bf16 %v881_v3, %v880_v4 }
 0x208   : > { %998 = vst [vmem:[%s2119_s13 + $0x60] sm:$0xff] %v1169_v37  ;;  %v886_v29 = vmul.f32 %v1307_v30, %v2085_v31  ;;  %v887_v27 = vmul.f32 %v1307_v30, %v2089_v28 }
 0x209   : > { %v1309_v9 = vpop.eup %1308  ;;  %997 = vst [vmem:[%s2119_s13 + $0x58] sm:$0xff] %v1168_v8 }
 0x20a   : > { %v1171_v41 = vpack.c.bf16 %v887_v27, %v886_v29  ;;  %v884_v12 = vmul.f32 %v1309_v9, %v2095_v57  ;;  %v885_v43 = vmul.f32 %v1309_v9, %v2099_v21 }
 0x20c   : > { %1000 = vst [vmem:[%s2119_s13 + $0x70] sm:$0xff] %v1171_v41  ;;  %v1170_v26 = vpack.c.bf16 %v885_v43, %v884_v12 }
 0x20d   : > { %v1311_v49 = vpop.eup %1310 }
 0x20e   : > { %999 = vst [vmem:[%s2119_s13 + $0x68] sm:$0xff] %v1170_v26  ;;  %v888_v34 = vmul.f32 %v1311_v49, %v2105_v62  ;;  %v889_v6 = vmul.f32 %v1311_v49, %v2109_v48 }
 0x210   : > { %v1172_v16 = vpack.c.bf16 %v889_v6, %v888_v34 }
 0x212   : > { %1001 = vst [vmem:[%s2119_s13 + $0x78] sm:$0xff] %v1172_v16 }
 0x213 PF: > { %s13_s16 = sadd.s32 1, %s1350_s16   ;;  %s2278_s12 = smov %s1342_s14 }
 0x214   : > { %p10_p7 = scmp.ge.s32.totalorder %s13_s16, 10   ;;  %s2279_s13 = smov %s1346_s15 }
 0x215   : > { %s2280_s14 = smov %s2283_s17  ;;  %s2281_s15 = smov %s2287_s18 }
 0x216   :  { %12 = sbr.rel (!%p10_p7) target bundleno = 3 (0x3), region = 68 }

// kernel: gdt_layer_forward.6
= control target key start
LH: loop header
LB: loop body
LE: loop exit
PB: predicated region body
PF: predicated region fallthrough
CT: control target
= control target key end

     0   :  { %s2588_s30 = smov 0   ;;  %s2590_s10 = smov 0   ;;  %s3956_s0 = inlined_call_operand.vmem [shape: f32[256,64], index: 0, kind: input, shape index: {}]   ;;  %s3957_s1 = inlined_call_operand.vmem [shape: f32[1,64], index: 1, kind: input, shape index: {}]   ;;  %s3958_s2 = inlined_call_operand.vmem [shape: f32[1,64], index: 2, kind: input, shape index: {}]   ;;  %s3959_s3 = inlined_call_operand.vmem [shape: bf16[64,64], index: 3, kind: input, shape index: {}]   ;;  %s3960_s4 = inlined_call_operand.vmem [shape: f32[64,1], index: 4, kind: input, shape index: {}]   ;;  %s3961_s5 = inlined_call_operand.vmem [shape: f32[4,16], index: 5, kind: input, shape index: {}]   ;;  %s3962_s6 = inlined_call_operand.vmem [shape: f32[256,64], index: 6, kind: output, shape index: {0}]   ;;  %s3963_s7 = inlined_call_operand.vmem [shape: f32[4,16,256], index: 7, kind: output, shape index: {1}]   ;;  %s3964_s8 = inlined_call_operand.vmem [shape: f32[4,1,256], index: 8, kind: output, shape index: {2}]   ;;  %s3965_s9 = inlined_call_operand.vmem [shape: f32[4,256,1], index: 9, kind: output, shape index: {3}]  }
   0x1   :  { %s2592_s11 = smov 0  }
   0x2 LB: > { %s2601_s12 = sadd.s32 4294967295, %s2529_s11   ;;  %s2603_s13 = sadd.s32 1, %s2529_s11   ;;  %s2529_s11 = sphi %s2592_s11, %s4041_s11   ;;  %s2525_s10 = sphi %s2590_s10, %s4040_s10   ;;  %s2521_s30 = sphi %s2588_s30, %s4039_s30  }
   0x3   : > { %s181_s14 = ssub.s32 %s2529_s11, %s2603_s13  ;;  %s184_s15 = sadd.s32 1, %s2525_s10 }
   0x4   : > { %p182_p0 = scmp.eq.s32.totalorder %s181_s14, 0  ;;  %p194_p1 = scmp.ne.s32.totalorder %s2525_s10, %s2521_s30 }
   0x5   : > { %p195_p2 = scmp.eq.s32.totalorder %s2601_s12, 1  ;;  %p2302_p3 = scmp.ge.s32.totalorder %s2529_s11, 1 }
   0x6   : > { %s2611_s16 = scalar_select %p182_p0, %s2525_s10, %s184_s15  }
   0x7   : > { %p2613_p4 = por %p195_p2, %p194_p1  ;;  %p295_p5 = scmp.lt.s32.totalorder %s2529_s11, 3 }
   0x9   : > { %p296_p6 = pnand %p2302_p3, %p295_p5 }
   0xb   : > { %299 = sbr.rel (%p296_p6) target bundleno = 1426 (0x592), region = 44 }
  0x12   : > { %s2306_s18 = sshll.u32 %s2601_s12, 4  ;;  %v2531_v0 = vmov 0   ;;  %vm373_vm0 = vcmask 523264   ;;  %v840_v33 = vld [vmem:[%s3960_s4] sm:$0xff]  ;;  %v841_v34 = vld [vmem:[%s3960_s4 + $0x8] sm:$0xff]  ;;  %v1048_v35 = vld [vmem:[%s3960_s4 + $0x10] sm:$0xff] }
  0x13   : > { %p344_p7 = scmp.lt.s32.totalorder %s2306_s18, 31  ;;  %2470 = vset.pattern.permute.xlu0 %v2531_v0  ;;  %2469 = vset.pattern.permute.xlu1 %v2531_v0  ;;  %v2368_v36 = vld [vmem:[%s3961_s5 + $0x3] ss:$0 sm:$0xff]  ;;  %v1049_v37 = vld [vmem:[%s3960_s4 + $0x18] sm:$0xff]  ;;  %s2532_s20 = smov 48   ;;  %v1309_v40 = vld [vmem:[%s3960_s4 + $0x28] sm:$0xff] }
  0x14   : > { %v2328_v38 = vld [vmem:[%s3961_s5 + $0x1] ss:$0 sm:$0xff]  ;;  %s2533_s23 = smov 16   ;;  %v2348_v41 = vld [vmem:[%s3961_s5 + $0x2] ss:$0 sm:$0xff]  ;;  %s2534_s11 = smov 32  }
  0x15   : > { %s4043_s18 = smov (!%p344_p7, %s2306_s18), 31  ;;  %v1308_v39 = vld [vmem:[%s3960_s4 + $0x20] sm:$0xff]  ;;  %s2536_s21 = smov 96   ;;  %vm883_vm1 = vcmask 130048   ;;  %vm932_vm2 = vcmask 7168  }
  0x16   : > { %s2307_s19 = sshll.u32 %s4043_s18, 3  ;;  %s2388_s18 = sshll.u32 (%p2613_p4), %s2601_s12, 3 }
  0x17   : > { %s2626_s22 = scalar_lea.vmem %s3956_s0, %s2307_s19  ;;  %s2878_s15 = scalar_lea.vmem %s3962_s6, %s2307_s19 }
  0x18   : > { %v2629_v1 = vld [vmem:[%s2626_s22] sm:$0xff]  ;;  %v2632_v2 = vld [vmem:[%s2626_s22 + $0x10] sm:$0xff]  ;;  %v2635_v3 = vld [vmem:[%s2626_s22 + $0x8] sm:$0xff] }
  0x19   : > { %v374_v4 = vsel %vm373_vm0, %v2629_v1, 0.0  ;;  %v380_v5 = vsel %vm373_vm0, %v2632_v2, 0.0  ;;  %v2642_v6 = vld [vmem:[%s2626_s22 + $0x18] sm:$0xff]  ;;  %v377_v7 = vsel %vm373_vm0, %v2635_v3, 0.0  ;;  %v2649_v9 = vld [vmem:[%s2626_s22 + $0x20] sm:$0xff]  ;;  %v2652_v10 = vld [vmem:[%s2626_s22 + $0x28] sm:$0xff] }
  0x1a   : > { %375 = vadd.xlane.f32.xlu0 %v374_v4  ;;  %381 = vadd.xlane.f32.xlu1 %v380_v5  ;;  %v383_v8 = vsel %vm373_vm0, %v2642_v6, 0.0  ;;  %v386_v11 = vsel %vm373_vm0, %v2649_v9, 0.0  ;;  %v389_v12 = vsel %vm373_vm0, %v2652_v10, 0.0  ;;  %v2659_v13 = vld [vmem:[%s2626_s22 + $0x30] sm:$0xff]  ;;  %v2662_v14 = vld [vmem:[%s2626_s22 + $0x38] sm:$0xff]  ;;  %v2669_v17 = vld [vmem:[%s2626_s22 + $0x40] sm:$0xff] }
  0x1b   : > { %v392_v15 = vsel %vm373_vm0, %v2659_v13, 0.0  ;;  %v395_v16 = vsel %vm373_vm0, %v2662_v14, 0.0  ;;  %v2672_v18 = vld [vmem:[%s2626_s22 + $0x48] sm:$0xff]  ;;  %v398_v19 = vsel %vm373_vm0, %v2669_v17, 0.0  ;;  %v2679_v21 = vld [vmem:[%s2626_s22 + $0x50] sm:$0xff]  ;;  %v2682_v22 = vld [vmem:[%s2626_s22 + $0x58] sm:$0xff] }
  0x1c   : > { %v401_v20 = vsel %vm373_vm0, %v2672_v18, 0.0  ;;  %v404_v23 = vsel %vm373_vm0, %v2679_v21, 0.0  ;;  %v407_v24 = vsel %vm373_vm0, %v2682_v22, 0.0  ;;  %v2689_v25 = vld [vmem:[%s2626_s22 + $0x60] sm:$0xff]  ;;  %v2692_v26 = vld [vmem:[%s2626_s22 + $0x68] sm:$0xff]  ;;  %v2699_v29 = vld [vmem:[%s2626_s22 + $0x70] sm:$0xff] }
  0x1d   : > { %v410_v27 = vsel %vm373_vm0, %v2689_v25, 0.0  ;;  %v413_v28 = vsel %vm373_vm0, %v2692_v26, 0.0  ;;  %v2702_v30 = vld [vmem:[%s2626_s22 + $0x78] sm:$0xff]  ;;  %v416_v31 = vsel %vm373_vm0, %v2699_v29, 0.0  ;;  %s2537_s22 = smov 80  }
  0x1e   : > { %378 = vadd.xlane.f32.xlu0 %v377_v7  ;;  %384 = vadd.xlane.f32.xlu1 %v383_v8  ;;  %v419_v32 = vsel %vm373_vm0, %v2702_v30, 0.0 }
  0x22   : > { %387 = vadd.xlane.f32.xlu0 %v386_v11  ;;  %390 = vadd.xlane.f32.xlu1 %v389_v12 }
  0x26   : > { %393 = vadd.xlane.f32.xlu0 %v392_v15  ;;  %396 = vadd.xlane.f32.xlu1 %v395_v16 }
  0x2a   : > { %399 = vadd.xlane.f32.xlu0 %v398_v19  ;;  %402 = vadd.xlane.f32.xlu1 %v401_v20 }
  0x2e   : > { %405 = vadd.xlane.f32.xlu0 %v404_v23  ;;  %408 = vadd.xlane.f32.xlu1 %v407_v24 }
  0x32   : > { %411 = vadd.xlane.f32.xlu0 %v410_v27  ;;  %414 = vadd.xlane.f32.xlu1 %v413_v28 }
  0x36   : > { %417 = vadd.xlane.f32.xlu0 %v416_v31  ;;  %420 = vadd.xlane.f32.xlu1 %v419_v32 }
  0x47   : > { %844 = vperm.xlu1 %2469, %v840_v33  }
  0x4b   : > { %849 = vperm.xlu1 %2469, %v841_v34  }
  0x4c   : > { %1052 = vperm.xlu0 %2470, %v1048_v35  }
  0x4f   : > { %1597 = vrot.lane.b32.xlu1 %v2368_v36, %s2532_s20  ;;  %s2535_s20 = smov 112  }
  0x50   : > { %1057 = vperm.xlu0 %2470, %v1049_v37  }
  0x54   : > { %1077 = vrot.lane.b32.xlu0 %v2328_v38, %s2533_s23  ;;  %s3332_s23 = sand.u32 1, %s2521_s30  }
  0x55   : > { %s2305_s24 = sshll.u32 %s3332_s23, 9  ;;  %s2303_s30 = sshll.u32 %s3332_s23, 6 }
  0x56   : > { %s3343_s25 = scalar_lea.vmem [#allocation4], %s2305_s24  ;;  %s3505_s26 = scalar_lea.vmem [#allocation2], %s2303_s30 }
  0x57   : > { %s2304_s27 = sshll.u32 %s3332_s23, 2 }
  0x58   : > { %1312 = vperm.xlu0 %2470, %v1308_v39   ;;  %s3526_s28 = scalar_lea.vmem [#allocation3], %s2304_s27 }
  0x5c   : > { %1317 = vperm.xlu0 %2470, %v1309_v40  }
  0x60   : > { %1337 = vrot.lane.b32.xlu0 %v2348_v41, %s2534_s11 }
  0xa7   : > { %v376_v42 = vpop.xlane.xlu0 %375  ;;  %v382_v43 = vpop.xlane.xlu1 %381 }
  0xa8   : > { %v423_v44 = vmul.f32 0.015625, %v376_v42  ;;  %v425_v45 = vmul.f32 0.015625, %v382_v43 }
  0xaa   : > { %v2736_v46 = vsub.f32 %v2629_v1, %v423_v44  ;;  %v2739_v47 = vsub.f32 %v2632_v2, %v425_v45 }
  0xab   : > { %v379_v48 = vpop.xlane.xlu0 %378  ;;  %v385_v49 = vpop.xlane.xlu1 %384 }
  0xac   : > { %v424_v50 = vmul.f32 0.015625, %v379_v48  ;;  %v426_v51 = vmul.f32 0.015625, %v385_v49  ;;  %v455_v52 = vmul.f32 %v2736_v46, %v2736_v46  ;;  %v457_v53 = vmul.f32 %v2739_v47, %v2739_v47 }
  0xae   : > { %v2746_v54 = vsub.f32 %v2635_v3, %v424_v50  ;;  %v2749_v55 = vsub.f32 %v2642_v6, %v426_v51  ;;  %v471_v56 = vsel %vm373_vm0, %v455_v52, 0.0  ;;  %v477_v59 = vsel %vm373_vm0, %v457_v53, 0.0 }
  0xaf   : > { %472 = vadd.xlane.f32.xlu0 %v471_v56  ;;  %v388_v57 = vpop.xlane.xlu0 %387  ;;  %v391_v58 = vpop.xlane.xlu1 %390 }
  0xb0   : > { %v427_v60 = vmul.f32 0.015625, %v388_v57  ;;  %v428_v61 = vmul.f32 0.015625, %v391_v58  ;;  %v456_v62 = vmul.f32 %v2746_v54, %v2746_v54  ;;  %v458_v63 = vmul.f32 %v2749_v55, %v2749_v55 }
  0xb2   : > { %v2758_v0 = vsub.f32 %v2649_v9, %v427_v60  ;;  %v2761_v1 = vsub.f32 %v2652_v10, %v428_v61  ;;  %v474_v2 = vsel %vm373_vm0, %v456_v62, 0.0  ;;  %v480_v5 = vsel %vm373_vm0, %v458_v63, 0.0  ;;  %v2472_v63 = vld [vmem:[%s3959_s3 + $0x8] sm:$0xff]  }
  0xb3   : > { %478 = vadd.xlane.f32.xlu0 %v477_v59  ;;  %475 = vadd.xlane.f32.xlu1 %v474_v2  ;;  %v394_v3 = vpop.xlane.xlu0 %393  ;;  %v397_v4 = vpop.xlane.xlu1 %396  ;;  %v2473_v2 = vld [vmem:[%s3959_s3 + $0x10] sm:$0xff]  }
  0xb4   : > { %v429_v6 = vmul.f32 0.015625, %v394_v3  ;;  %v430_v7 = vmul.f32 0.015625, %v397_v4  ;;  %v459_v8 = vmul.f32 %v2758_v0, %v2758_v0  ;;  %v460_v9 = vmul.f32 %v2761_v1, %v2761_v1  ;;  %v2474_v3 = vld [vmem:[%s3959_s3 + $0x18] sm:$0xff]  }
  0xb6   : > { %v2770_v11 = vsub.f32 %v2659_v13, %v429_v6  ;;  %v2773_v10 = vsub.f32 %v2662_v14, %v430_v7  ;;  %v483_v12 = vsel %vm373_vm0, %v459_v8, 0.0  ;;  %v486_v19 = vsel %vm373_vm0, %v460_v9, 0.0 }
  0xb7   : > { %481 = vadd.xlane.f32.xlu1 %v480_v5  ;;  %484 = vadd.xlane.f32.xlu0 %v483_v12  ;;  %v400_v15 = vpop.xlane.xlu0 %399  ;;  %v403_v16 = vpop.xlane.xlu1 %402 }
  0xb8   : > { %v431_v20 = vmul.f32 0.015625, %v400_v15  ;;  %v432_v23 = vmul.f32 0.015625, %v403_v16  ;;  %v461_v24 = vmul.f32 %v2770_v11, %v2770_v11  ;;  %v462_v13 = vmul.f32 %v2773_v10, %v2773_v10 }
  0xba   : > { %v2782_v27 = vsub.f32 %v2669_v17, %v431_v20  ;;  %v2785_v14 = vsub.f32 %v2672_v18, %v432_v23  ;;  %v489_v28 = vsel %vm373_vm0, %v461_v24, 0.0  ;;  %v492_v33 = vsel %vm373_vm0, %v462_v13, 0.0 }
  0xbb   : > { %487 = vadd.xlane.f32.xlu1 %v486_v19  ;;  %490 = vadd.xlane.f32.xlu0 %v489_v28  ;;  %v406_v31 = vpop.xlane.xlu0 %405  ;;  %v409_v32 = vpop.xlane.xlu1 %408 }
  0xbc   : > { %v433_v34 = vmul.f32 0.015625, %v406_v31  ;;  %v434_v35 = vmul.f32 0.015625, %v409_v32  ;;  %v463_v36 = vmul.f32 %v2782_v27, %v2782_v27  ;;  %v464_v17 = vmul.f32 %v2785_v14, %v2785_v14 }
  0xbe   : > { %v2794_v37 = vsub.f32 %v2679_v21, %v433_v34  ;;  %v2797_v18 = vsub.f32 %v2682_v22, %v434_v35  ;;  %v495_v38 = vsel %vm373_vm0, %v463_v36, 0.0  ;;  %v498_v41 = vsel %vm373_vm0, %v464_v17, 0.0 }
  0xbf   : > { %493 = vadd.xlane.f32.xlu1 %v492_v33  ;;  %496 = vadd.xlane.f32.xlu0 %v495_v38  ;;  %v412_v39 = vpop.xlane.xlu0 %411  ;;  %v415_v40 = vpop.xlane.xlu1 %414 }
  0xc0   : > { %v435_v42 = vmul.f32 0.015625, %v412_v39  ;;  %v436_v43 = vmul.f32 0.015625, %v415_v40  ;;  %v465_v44 = vmul.f32 %v2794_v37, %v2794_v37  ;;  %v466_v21 = vmul.f32 %v2797_v18, %v2797_v18 }
  0xc2   : > { %v2806_v45 = vsub.f32 %v2689_v25, %v435_v42  ;;  %v2809_v22 = vsub.f32 %v2692_v26, %v436_v43  ;;  %v501_v48 = vsel %vm373_vm0, %v465_v44, 0.0  ;;  %v504_v51 = vsel %vm373_vm0, %v466_v21, 0.0 }
  0xc3   : > { %499 = vadd.xlane.f32.xlu1 %v498_v41  ;;  %502 = vadd.xlane.f32.xlu0 %v501_v48  ;;  %v418_v49 = vpop.xlane.xlu0 %417  ;;  %v421_v50 = vpop.xlane.xlu1 %420 }
  0xc4   : > { %v437_v52 = vmul.f32 0.015625, %v418_v49  ;;  %v438_v53 = vmul.f32 0.015625, %v421_v50  ;;  %v467_v56 = vmul.f32 %v2806_v45, %v2806_v45  ;;  %v468_v25 = vmul.f32 %v2809_v22, %v2809_v22  ;;  %v2864_v49 = vld [vmem:[%s3957_s1] ss:$0 sm:$0xff] }
  0xc6   : > { %v2818_v57 = vsub.f32 %v2699_v29, %v437_v52  ;;  %v2821_v26 = vsub.f32 %v2702_v30, %v438_v53  ;;  %v507_v58 = vsel %vm373_vm0, %v467_v56, 0.0  ;;  %v510_v59 = vsel %vm373_vm0, %v468_v25, 0.0  ;;  %v2471_v29 = vld [vmem:[%s3959_s3] sm:$0xff]  }
  0xc7   : > { %505 = vadd.xlane.f32.xlu1 %v504_v51  ;;  %508 = vadd.xlane.f32.xlu0 %v507_v58  ;;  %v2851_v8 = vpop.permute.xlu1 %844  ;;  %v2870_v25 = vld [vmem:[%s3958_s2] ss:$0 sm:$0xff] }
  0xc8   : > { %v469_v60 = vmul.f32 %v2818_v57, %v2818_v57  ;;  %v470_v61 = vmul.f32 %v2821_v26, %v2821_v26  ;;  %2406 = vmatprep.subr.bf16.mxu0 %v2471_v29  ;;  %2430 = vmatprep.subr.bf16.mxu1 %v2471_v29 }
  0xc9   : > { %2407 = vmatpush3.bf16.msra.mxu0 %v2471_v29  ;;  %2434 = vmatpush3.bf16.msra.mxu1 %v2471_v29 }
  0xca   : > { %v513_v62 = vsel %vm373_vm0, %v469_v60, 0.0  ;;  %v516_v30 = vsel %vm373_vm0, %v470_v61, 0.0  ;;  %2408 = vmatprep.subr.bf16.mxu0 %v2472_v63  ;;  %2431 = vmatprep.subr.bf16.mxu1 %v2472_v63 }
  0xcb   : > { %511 = vadd.xlane.f32.xlu1 %v510_v59  ;;  %514 = vadd.xlane.f32.xlu0 %v513_v62  ;;  %v2843_v4 = vpop.permute.xlu0 %1052  ;;  %v2855_v12 = vpop.permute.xlu1 %849 }
  0xcc   : > { %3973 = vst [vmem:[#allocation5_spill] sm:$0xff] %v2843_v4 }
  0xcd   : > { %2409 = vmatpush3.bf16.msra.mxu0 %v2472_v63  ;;  %2435 = vmatpush3.bf16.msra.mxu1 %v2472_v63 }
  0xce   : > { %2410 = vmatprep.subr.bf16.mxu0 %v2473_v2  ;;  %2432 = vmatprep.subr.bf16.mxu1 %v2473_v2 }
  0xcf   : > { %517 = vadd.xlane.f32.xlu1 %v516_v30  ;;  %v2845_v5 = vpop.permute.xlu0 %1057  ;;  %v2859_v16 = vpop.permute.xlu1 %1597 }
  0xd0   : > { %3974 = vst [vmem:[#allocation6_spill] sm:$0xff] %v2845_v5 }
  0xd1   : > { %2411 = vmatpush3.bf16.msra.mxu0 %v2473_v2  ;;  %2436 = vmatpush3.bf16.msra.mxu1 %v2473_v2 }
  0xd2   : > { %2412 = vmatprep.subr.bf16.mxu0 %v2474_v3  ;;  %2433 = vmatprep.subr.bf16.mxu1 %v2474_v3 }
  0xd3   : > { %v2847_v6 = vpop.permute.xlu0 %1077 }
  0xd5   : > { %2413 = vmatpush3.bf16.msra.mxu0 %v2474_v3  ;;  %2437 = vmatpush3.bf16.msra.mxu1 %v2474_v3 }
  0xd7   : > { %v2849_v7 = vpop.permute.xlu0 %1312 }
  0xd8   : > { %3975 = vst [vmem:[#allocation7_spill] sm:$0xff] %v2849_v7 }
  0xdb   : > { %v2853_v9 = vpop.permute.xlu0 %1317 }
  0xdc   : > { %3976 = vst [vmem:[#allocation8_spill] sm:$0xff] %v2853_v9 }
  0xdf   : > { %v2857_v15 = vpop.permute.xlu0 %1337 }
 0x13c   : > { %v473_v19 = vpop.xlane.xlu0 %472 }
 0x13d   : > { %v519_v20 = vmul.f32 0.015625, %v473_v19 }
 0x13f   : > { %v535_v23 = vadd.f32 1e-05, %v519_v20 }
 0x140   : > { %v476_v24 = vpop.xlane.xlu1 %475  ;;  %v479_v13 = vpop.xlane.xlu0 %478 }
 0x141   : > { %2475 = vrsqrt.f32 %v535_v23  ;;  %v520_v28 = vmul.f32 0.015625, %v476_v24  ;;  %v521_v31 = vmul.f32 0.015625, %v479_v13 }
 0x143   : > { %v536_v32 = vadd.f32 1e-05, %v520_v28  ;;  %v537_v33 = vadd.f32 1e-05, %v521_v31 }
 0x144   : > { %v482_v34 = vpop.xlane.xlu1 %481  ;;  %v485_v35 = vpop.xlane.xlu0 %484 }
 0x145   : > { %2477 = vrsqrt.f32 %v536_v32  ;;  %v522_v36 = vmul.f32 0.015625, %v482_v34  ;;  %v523_v17 = vmul.f32 0.015625, %v485_v35 }
 0x146   : > { %2479 = vrsqrt.f32 %v537_v33 }
 0x147   : > { %v538_v38 = vadd.f32 1e-05, %v522_v36  ;;  %v539_v39 = vadd.f32 1e-05, %v523_v17 }
 0x148   : > { %v488_v40 = vpop.xlane.xlu1 %487  ;;  %v491_v41 = vpop.xlane.xlu0 %490 }
 0x149   : > { %2481 = vrsqrt.f32 %v538_v38  ;;  %v524_v42 = vmul.f32 0.015625, %v488_v40  ;;  %v525_v43 = vmul.f32 0.015625, %v491_v41 }
 0x14a   : > { %2483 = vrsqrt.f32 %v539_v39 }
 0x14b   : > { %v2476_v44 = vpop.eup %2475  ;;  %v540_v21 = vadd.f32 1e-05, %v524_v42  ;;  %v541_v48 = vadd.f32 1e-05, %v525_v43 }
 0x14c   : > { %v494_v50 = vpop.xlane.xlu1 %493  ;;  %v497_v51 = vpop.xlane.xlu0 %496  ;;  %v567_v52 = vmul.f32 %v2476_v44, %v2736_v46 }
 0x14d   : > { %2485 = vrsqrt.f32 %v540_v21  ;;  %v526_v53 = vmul.f32 0.015625, %v494_v50  ;;  %v527_v56 = vmul.f32 0.015625, %v497_v51 }
 0x14e   : > { %2487 = vrsqrt.f32 %v541_v48  ;;  %v590_v58 = vmul.f32 %v2864_v49, %v567_v52 }
 0x14f   : > { %v2478_v59 = vpop.eup %2477  ;;  %v542_v46 = vadd.f32 1e-05, %v526_v53  ;;  %v543_v60 = vadd.f32 1e-05, %v527_v56 }
 0x150   : > { %v2480_v61 = vpop.eup %2479  ;;  %v500_v62 = vpop.xlane.xlu1 %499  ;;  %v568_v30 = vmul.f32 %v2478_v59, %v2746_v54  ;;  %v613_v63 = vadd.f32 %v2870_v25, %v590_v58 }
 0x151   : > { %v503_v29 = vpop.xlane.xlu0 %502  ;;  %2489 = vrsqrt.f32 %v542_v46  ;;  %v528_v2 = vmul.f32 0.015625, %v500_v62  ;;  %v569_v19 = vmul.f32 %v2480_v61, %v2739_v47 }
 0x152   : > { %v529_v3 = vmul.f32 0.015625, %v503_v29  ;;  %2491 = vrsqrt.f32 %v543_v60  ;;  %v591_v20 = vmul.f32 %v2864_v49, %v568_v30  ;;  %629 = vst.msk [vmem:[%s2878_s15] sm:$0xff] %vm373_vm0, %v613_v63 }
 0x153   : > { %v2482_v23 = vpop.eup %2481  ;;  %v544_v24 = vadd.f32 1e-05, %v528_v2  ;;  %v592_v28 = vmul.f32 %v2864_v49, %v569_v19 }
 0x154   : > { %v545_v13 = vadd.f32 1e-05, %v529_v3  ;;  %v2484_v31 = vpop.eup %2483  ;;  %v506_v54 = vpop.xlane.xlu1 %505  ;;  %v614_v33 = vadd.f32 %v2870_v25, %v591_v20  ;;  %v570_v34 = vmul.f32 %v2482_v23, %v2749_v55 }
 0x155   : > { %v509_v32 = vpop.xlane.xlu0 %508  ;;  %2493 = vrsqrt.f32 %v544_v24  ;;  %v530_v47 = vmul.f32 0.015625, %v506_v54  ;;  %v615_v36 = vadd.f32 %v2870_v25, %v592_v28  ;;  %v571_v39 = vmul.f32 %v2484_v31, %v2758_v0 }
 0x156   : > { %v531_v35 = vmul.f32 0.015625, %v509_v32  ;;  %2495 = vrsqrt.f32 %v545_v13  ;;  %630 = vst.msk [vmem:[%s2878_s15 + $0x8] sm:$0xff] %vm373_vm0, %v614_v33  ;;  %v645_v17 = vpack.c.bf16 %v614_v33, %v613_v63  ;;  %v593_v38 = vmul.f32 %v2864_v49, %v570_v34 }
 0x157   : > { %v2486_v40 = vpop.eup %2485  ;;  %v546_v41 = vadd.f32 1e-05, %v530_v47  ;;  %631 = vst.msk [vmem:[%s2878_s15 + $0x10] sm:$0xff] %vm373_vm0, %v615_v36  ;;  %v594_v50 = vmul.f32 %v2864_v49, %v571_v39 }
 0x158   : > { %v547_v42 = vadd.f32 1e-05, %v531_v35  ;;  %v2488_v55 = vpop.eup %2487  ;;  %v512_v43 = vpop.xlane.xlu1 %511  ;;  %2414 = vmatprep.mubr.msk.bf16.mxu0 %vm373_vm0, %v645_v17  ;;  %v616_v21 = vadd.f32 %v2870_v25, %v593_v38  ;;  %v572_v48 = vmul.f32 %v2486_v40, %v2761_v1 }
 0x159   : > { %v515_v44 = vpop.xlane.xlu0 %514  ;;  %2497 = vrsqrt.f32 %v546_v41  ;;  %v532_v51 = vmul.f32 0.015625, %v512_v43  ;;  %v573_v52 = vmul.f32 %v2488_v55, %v2770_v11  ;;  %v617_v58 = vadd.f32 %v2870_v25, %v594_v50 }
 0x15a   : > { %v533_v0 = vmul.f32 0.015625, %v515_v44  ;;  %2499 = vrsqrt.f32 %v547_v42  ;;  %632 = vst.msk [vmem:[%s2878_s15 + $0x18] sm:$0xff] %vm373_vm0, %v616_v21  ;;  %v646_v53 = vpack.c.bf16 %v616_v21, %v615_v36  ;;  %v595_v56 = vmul.f32 %v2864_v49, %v572_v48 }
 0x15b   : > { %v2490_v59 = vpop.eup %2489  ;;  %v548_v46 = vadd.f32 1e-05, %v532_v51  ;;  %v596_v60 = vmul.f32 %v2864_v49, %v573_v52  ;;  %633 = vst.msk [vmem:[%s2878_s15 + $0x20] sm:$0xff] %vm373_vm0, %v617_v58 }
 0x15c   : > { %v549_v1 = vadd.f32 1e-05, %v533_v0  ;;  %v2492_v61 = vpop.eup %2491  ;;  %v518_v62 = vpop.xlane.xlu1 %517  ;;  %2415 = vmatmul.mubr.msk.bf16.vlgmr.msra.gmra.mrb[0].mxu0 %vm373_vm0, %v646_v53  ;;  %v618_v11 = vadd.f32 %v2870_v25, %v595_v56  ;;  %v574_v29 = vmul.f32 %v2490_v59, %v2773_v10 }
 0x15d   : > { %2501 = vrsqrt.f32 %v548_v46  ;;  %v534_v30 = vmul.f32 0.015625, %v518_v62  ;;  %v619_v63 = vadd.f32 %v2870_v25, %v596_v60  ;;  %v575_v2 = vmul.f32 %v2492_v61, %v2782_v27 }
 0x15e   : > { %2503 = vrsqrt.f32 %v549_v1  ;;  %634 = vst.msk [vmem:[%s2878_s15 + $0x28] sm:$0xff] %vm373_vm0, %v618_v11  ;;  %v647_v3 = vpack.c.bf16 %v618_v11, %v617_v58  ;;  %v597_v19 = vmul.f32 %v2864_v49, %v574_v29 }
 0x15f   : > { %v2494_v20 = vpop.eup %2493  ;;  %v550_v23 = vadd.f32 1e-05, %v534_v30  ;;  %635 = vst.msk [vmem:[%s2878_s15 + $0x30] sm:$0xff] %vm373_vm0, %v619_v63  ;;  %v598_v10 = vmul.f32 %v2864_v49, %v575_v2 }
 0x160   : > { %v2496_v24 = vpop.eup %2495  ;;  %2418 = vmatprep.mubr.msk.bf16.mxu0 %vm373_vm0, %v647_v3  ;;  %v620_v13 = vadd.f32 %v2870_v25, %v597_v19  ;;  %v576_v27 = vmul.f32 %v2494_v20, %v2785_v14 }
 0x161   : > { %2505 = vrsqrt.f32 %v550_v23  ;;  %v621_v28 = vadd.f32 %v2870_v25, %v598_v10  ;;  %v577_v31 = vmul.f32 %v2496_v24, %v2794_v37 }
 0x162   : > { %636 = vst.msk [vmem:[%s2878_s15 + $0x38] sm:$0xff] %vm373_vm0, %v620_v13  ;;  %v648_v54 = vpack.c.bf16 %v620_v13, %v619_v63  ;;  %v599_v32 = vmul.f32 %v2864_v49, %v576_v27 }
 0x163   : > { %v2498_v33 = vpop.eup %2497  ;;  %637 = vst.msk [vmem:[%s2878_s15 + $0x40] sm:$0xff] %vm373_vm0, %v621_v28  ;;  %v600_v34 = vmul.f32 %v2864_v49, %v577_v31 }
 0x164   : > { %v2500_v47 = vpop.eup %2499  ;;  %2419 = vmatmul.mubr.msk.bf16.gmra.mrb[4].mxu0 %vm373_vm0, %v648_v54  ;;  %v622_v14 = vadd.f32 %v2870_v25, %v599_v32  ;;  %v578_v35 = vmul.f32 %v2498_v33, %v2797_v18 }
 0x165   : > { %v623_v37 = vadd.f32 %v2870_v25, %v600_v34  ;;  %v579_v36 = vmul.f32 %v2500_v47, %v2806_v45 }
 0x166   : > { %638 = vst.msk [vmem:[%s2878_s15 + $0x48] sm:$0xff] %vm373_vm0, %v622_v14  ;;  %v649_v17 = vpack.c.bf16 %v622_v14, %v621_v28  ;;  %v601_v38 = vmul.f32 %v2864_v49, %v578_v35 }
 0x167   : > { %v2502_v39 = vpop.eup %2501  ;;  %639 = vst.msk [vmem:[%s2878_s15 + $0x50] sm:$0xff] %vm373_vm0, %v623_v37  ;;  %v602_v40 = vmul.f32 %v2864_v49, %v579_v36 }
 0x168   : > { %v2504_v41 = vpop.eup %2503  ;;  %2422 = vmatprep.mubr.msk.bf16.mxu1 %vm373_vm0, %v649_v17  ;;  %v624_v18 = vadd.f32 %v2870_v25, %v601_v38  ;;  %v580_v42 = vmul.f32 %v2502_v39, %v2809_v22 }
 0x169   : > { %v625_v45 = vadd.f32 %v2870_v25, %v602_v40  ;;  %v581_v55 = vmul.f32 %v2504_v41, %v2818_v57 }
 0x16a   : > { %640 = vst.msk [vmem:[%s2878_s15 + $0x58] sm:$0xff] %vm373_vm0, %v624_v18  ;;  %v650_v43 = vpack.c.bf16 %v624_v18, %v623_v37  ;;  %v603_v44 = vmul.f32 %v2864_v49, %v580_v42 }
 0x16b   : > { %v2506_v21 = vpop.eup %2505  ;;  %641 = vst.msk [vmem:[%s2878_s15 + $0x60] sm:$0xff] %vm373_vm0, %v625_v45  ;;  %v604_v48 = vmul.f32 %v2864_v49, %v581_v55 }
 0x16c   : > { %2423 = vmatmul.mubr.msk.bf16.vlgmr.msra.gmra.mrb[0].mxu1 %vm373_vm0, %v650_v43  ;;  %v626_v22 = vadd.f32 %v2870_v25, %v603_v44  ;;  %v582_v50 = vmul.f32 %v2506_v21, %v2821_v26  ;;  %v2969_v26 = vld [vmem:[%s3961_s5] ss:$0 sm:$0xff] }
 0x16d   : > { %v627_v51 = vadd.f32 %v2870_v25, %v604_v48 }
 0x16e   : > { %642 = vst.msk [vmem:[%s2878_s15 + $0x68] sm:$0xff] %vm373_vm0, %v626_v22  ;;  %v651_v57 = vpack.c.bf16 %v626_v22, %v625_v45  ;;  %v605_v0 = vmul.f32 %v2864_v49, %v582_v50 }
 0x16f   : > { %643 = vst.msk [vmem:[%s2878_s15 + $0x70] sm:$0xff] %vm373_vm0, %v627_v51 }
 0x170   : > { %2426 = vmatprep.mubr.msk.bf16.mxu1 %vm373_vm0, %v651_v57  ;;  %v628_v52 = vadd.f32 %v2870_v25, %v605_v0 }
 0x172   : > { %644 = vst.msk [vmem:[%s2878_s15 + $0x78] sm:$0xff] %vm373_vm0, %v628_v52  ;;  %v652_v53 = vpack.c.bf16 %v628_v52, %v627_v51 }
 0x174   : > { %2427 = vmatmul.mubr.msk.bf16.gmra.mrb[4].mxu1 %vm373_vm0, %v652_v53 }
 0x22f   : > { %v2971_v56 = vpop.f32.mrb[0].mxu0 }
 0x230   : > { %969 = vrot.lane.b32.xlu1 %v2971_v56, %s2535_s20  ;;  %v2975_v49 = vpop.f32.mrb[1].mxu0  ;;  %v1082_v61 = vmul.f32 %v2971_v56, %v2847_v6  ;;  %v1342_v37 = vmul.f32 %v2971_v56, %v2857_v15  ;;  %v869_v43 = vmul.f32 %v2971_v56, %v2969_v26 }
 0x231   : > { %1225 = vrot.lane.b32.xlu0 %v2975_v49, %s2536_s21  ;;  %v2979_v25 = vpop.f32.mrb[2].mxu0  ;;  %v2983_v58 = vmul.f32 %v2969_v26, %v2975_v49  ;;  %v1080_v17 = vmul.f32 %v2847_v6, %v2975_v49  ;;  %v1340_v39 = vmul.f32 %v2857_v15, %v2975_v49 }
 0x232   : > { %v2985_v59 = vpop.f32.mrb[3].mxu0  ;;  %v2989_v46 = vmul.f32 %v2979_v25, %v2969_v26  ;;  %v1083_v41 = vmul.f32 %v2979_v25, %v2847_v6  ;;  %v1343_v42 = vmul.f32 %v2979_v25, %v2857_v15  ;;  %v890_v21 = vsel %vm883_vm1, %v869_v43, 0.0 }
 0x233   : > { %v2993_v1 = vmul.f32 %v2969_v26, %v2985_v59  ;;  %v1081_v55 = vmul.f32 %v2847_v6, %v2985_v59  ;;  %v1341_v22 = vmul.f32 %v2857_v15, %v2985_v59 }
 0x235   : > { %1485 = vrot.lane.b32.xlu0 %v2975_v49, %s2537_s22 }
 0x237   : > { %v2997_v60 = vpop.f32.mrb[4].mxu0 }
 0x238   : > { %3977 = vst [vmem:[#allocation9_spill] sm:$0xff] %v2997_v60  ;;  %v3001_v62 = vpop.f32.mrb[5].mxu0  ;;  %v3005_v11 = vmul.f32 %v2997_v60, %v2969_v26  ;;  %v1086_v57 = vmul.f32 %v2997_v60, %v2847_v6 }
 0x239   : > { %3978 = vst [vmem:[#allocation10_spill] sm:$0xff] %v3001_v62  ;;  %1116 = vrot.lane.b32.xlu0 %v1082_v61, %s2535_s20  ;;  %v3008_v29 = vpop.f32.mrb[6].mxu0  ;;  %v3012_v30 = vmul.f32 %v2969_v26, %v3001_v62  ;;  %v1344_v43 = vmul.f32 %v2857_v15, %v3001_v62 }
 0x23a   : > { %3979 = vst [vmem:[#allocation11_spill] sm:$0xff] %v3008_v29  ;;  %v3014_v63 = vpop.f32.mrb[7].mxu0  ;;  %v3018_v2 = vmul.f32 %v3008_v29, %v2969_v26 }
 0x23b   : > { %v3022_v3 = vmul.f32 %v2969_v26, %v3014_v63 }
 0x23f   : > { %v3024_v19 = vpop.f32.mrb[0].mxu1 }
 0x240   : > { %985 = vrot.lane.b32.xlu1 %v3024_v19, %s2535_s20  ;;  %v3028_v20 = vpop.f32.mrb[1].mxu1  ;;  %v1090_v23 = vmul.f32 %v3024_v19, %v2847_v6  ;;  %v1350_v36 = vmul.f32 %v3024_v19, %v2857_v15  ;;  %v877_v48 = vmul.f32 %v3024_v19, %v2969_v26 }
 0x241   : > { %v3032_v10 = vpop.f32.mrb[2].mxu1  ;;  %v3036_v24 = vmul.f32 %v2969_v26, %v3028_v20  ;;  %v1088_v38 = vmul.f32 %v2847_v6, %v3028_v20  ;;  %v1348_v40 = vmul.f32 %v2857_v15, %v3028_v20 }
 0x242   : > { %1132 = vrot.lane.b32.xlu0 %v1090_v23, %s2535_s20  ;;  %v3039_v13 = vpop.f32.mrb[3].mxu1  ;;  %v3043_v27 = vmul.f32 %v3032_v10, %v2969_v26  ;;  %v1091_v18 = vmul.f32 %v3032_v10, %v2847_v6  ;;  %v1351_v45 = vmul.f32 %v3032_v10, %v2857_v15  ;;  %v914_v50 = vsel %vm883_vm1, %v877_v48, 0.0 }
 0x243   : > { %v3047_v28 = vmul.f32 %v2969_v26, %v3039_v13  ;;  %v1089_v44 = vmul.f32 %v2847_v6, %v3039_v13  ;;  %v1349_v51 = vmul.f32 %v2857_v15, %v3039_v13 }
 0x244   : > { %1229 = vrot.lane.b32.xlu1 %v2971_v56, %s2536_s21 }
 0x246   : > { %1231 = vrot.lane.b32.xlu0 %v2979_v25, %s2536_s21 }
 0x247   : > { %v3053_v31 = vpop.f32.mrb[4].mxu1 }
 0x248   : > { %3980 = vst [vmem:[#allocation12_spill] sm:$0xff] %v3053_v31  ;;  %1245 = vrot.lane.b32.xlu1 %v3024_v19, %s2536_s21  ;;  %v3057_v54 = vpop.f32.mrb[5].mxu1  ;;  %v3061_v32 = vmul.f32 %v3053_v31, %v2969_v26  ;;  %v1094_v0 = vmul.f32 %v3053_v31, %v2847_v6  ;;  %v1354_v23 = vmul.f32 %v3053_v31, %v2857_v15 }
 0x249   : > { %v3063_v33 = vpop.f32.mrb[6].mxu1  ;;  %v3067_v34 = vmul.f32 %v2969_v26, %v3057_v54  ;;  %v1352_v48 = vmul.f32 %v2857_v15, %v3057_v54 }
 0x24a   : > { %3981 = vst [vmem:[#allocation13_spill] sm:$0xff] %v3063_v33  ;;  %1247 = vrot.lane.b32.xlu0 %v3032_v10, %s2536_s21  ;;  %v3071_v47 = vpop.f32.mrb[7].mxu1  ;;  %v3075_v14 = vmul.f32 %v3063_v33, %v2969_v26 }
 0x24b   : > { %3982 = vst [vmem:[#allocation14_spill] sm:$0xff] %v3071_v47  ;;  %v3079_v35 = vmul.f32 %v2969_v26, %v3071_v47  ;;  %v1346_v26 = vmul.f32 %v2997_v60, %v2857_v15 }
 0x24c   : > { %1489 = vrot.lane.b32.xlu1 %v2971_v56, %s2537_s22 }
 0x24d   : > { %v923_v5 = vsel %vm883_vm1, %v3079_v35, 0.0 }
 0x24e   : > { %1376 = vrot.lane.b32.xlu0 %v1342_v37, %s2536_s21 }
 0x250   : > { %1505 = vrot.lane.b32.xlu1 %v3024_v19, %s2537_s22 }
 0x252   : > { %1392 = vrot.lane.b32.xlu0 %v1350_v36, %s2536_s21 }
 0x254   : > { %965 = vrot.lane.b32.xlu1 %v2975_v49, %s2535_s20 }
 0x256   : > { %1491 = vrot.lane.b32.xlu0 %v2979_v25, %s2537_s22 }
 0x258   : > { %981 = vrot.lane.b32.xlu1 %v3028_v20, %s2535_s20 }
 0x25a   : > { %1507 = vrot.lane.b32.xlu0 %v3032_v10, %s2537_s22 }
 0x25c   : > { %1241 = vrot.lane.b32.xlu1 %v3028_v20, %s2536_s21 }
 0x25e   : > { %1112 = vrot.lane.b32.xlu0 %v1080_v17, %s2535_s20 }
 0x260   : > { %1501 = vrot.lane.b32.xlu1 %v3028_v20, %s2537_s22 }
 0x262   : > { %1128 = vrot.lane.b32.xlu0 %v1088_v38, %s2535_s20 }
 0x264   : > { %971 = vrot.lane.b32.xlu1 %v2979_v25, %s2535_s20 }
 0x266   : > { %1243 = vrot.lane.b32.xlu0 %v3039_v13, %s2536_s21 }
 0x268   : > { %987 = vrot.lane.b32.xlu1 %v3032_v10, %s2535_s20 }
 0x26a   : > { %1372 = vrot.lane.b32.xlu0 %v1340_v39, %s2536_s21  ;;  %v1084_v39 = vmul.f32 %v2847_v6, %v3001_v62 }
 0x26e   : > { %1388 = vrot.lane.b32.xlu0 %v1348_v40, %s2536_s21 }
 0x272   : > { %1503 = vrot.lane.b32.xlu0 %v3039_v13, %s2537_s22 }
 0x276   : > { %1118 = vrot.lane.b32.xlu0 %v1083_v41, %s2535_s20  ;;  %v1092_v41 = vmul.f32 %v2847_v6, %v3057_v54 }
 0x27a   : > { %1134 = vrot.lane.b32.xlu0 %v1091_v18, %s2535_s20 }
 0x27e   : > { %1378 = vrot.lane.b32.xlu0 %v1343_v42, %s2536_s21 }
 0x282   : > { %1394 = vrot.lane.b32.xlu0 %v1351_v45, %s2536_s21 }
 0x286   : > { %1114 = vrot.lane.b32.xlu0 %v1081_v55, %s2535_s20  ;;  %v884_v55 = vsel %vm883_vm1, %v2983_v58, 0.0 }
 0x28a   : > { %1130 = vrot.lane.b32.xlu0 %v1089_v44, %s2535_s20 }
 0x28c   : > { %891 = vadd.xlane.f32.xlu1 %v890_v21  ;;  %v908_v21 = vsel %vm883_vm1, %v3036_v24, 0.0 }
 0x28e   : > { %1374 = vrot.lane.b32.xlu0 %v1341_v22, %s2536_s21 }
 0x290   : > { %915 = vadd.xlane.f32.xlu1 %v914_v50  ;;  %v893_v50 = vsel %vm883_vm1, %v2989_v46, 0.0  ;;  %v887_v46 = vsel %vm883_vm1, %v2993_v1, 0.0 }
 0x292   : > { %1390 = vrot.lane.b32.xlu0 %v1349_v51, %s2536_s21 }
 0x296   : > { %977 = vrot.lane.b32.xlu0 %v2997_v60, %s2535_s20 }
 0x29a   : > { %995 = vrot.lane.b32.xlu0 %v3063_v33, %s2535_s20 }
 0x29e   : > { %1124 = vrot.lane.b32.xlu0 %v1086_v57, %s2535_s20  ;;  %v917_v57 = vsel %vm883_vm1, %v3043_v27, 0.0  ;;  %v911_v27 = vsel %vm883_vm1, %v3047_v28, 0.0  ;;  %v1355_v28 = vmul.f32 %v3063_v33, %v2857_v15 }
 0x2a1   : > { %967 = vrot.lane.b32.xlu1 %v2985_v59, %s2535_s20 }
 0x2a2   : > { %1140 = vrot.lane.b32.xlu0 %v1094_v0, %s2535_s20  ;;  %v3230_v22 = vpop.permute.xlu1 %969 }
 0x2a3   : > { %v3165_v52 = vpop.permute.xlu0 %1225 }
 0x2a5   : > { %983 = vrot.lane.b32.xlu1 %v3039_v13, %s2535_s20 }
 0x2a6   : > { %1239 = vrot.lane.b32.xlu0 %v3008_v29, %s2536_s21 }
 0x2a7   : > { %v3173_v53 = vpop.permute.xlu0 %1485 }
 0x2a8   : > { %3983 = vst [vmem:[#allocation15_spill] sm:$0xff] %v3173_v53 }
 0x2a9   : > { %1227 = vrot.lane.b32.xlu1 %v2985_v59, %s2536_s21 }
 0x2aa   : > { %1255 = vrot.lane.b32.xlu0 %v3063_v33, %s2536_s21 }
 0x2ab   : > { %v3182_v61 = vpop.permute.xlu0 %1116 }
 0x2ad   : > { %1487 = vrot.lane.b32.xlu1 %v2985_v59, %s2537_s22 }
 0x2ae   : > { %1384 = vrot.lane.b32.xlu0 %v1346_v26, %s2536_s21 }
 0x2b2   : > { %1400 = vrot.lane.b32.xlu0 %v1354_v23, %s2536_s21  ;;  %v3237_v51 = vpop.permute.xlu1 %985  ;;  %v1087_v23 = vmul.f32 %v3008_v29, %v2847_v6 }
 0x2b4   : > { %v3187_v37 = vpop.permute.xlu0 %1132 }
 0x2b6   : > { %1499 = vrot.lane.b32.xlu0 %v3008_v29, %s2537_s22  ;;  %v3247_v0 = vpop.permute.xlu1 %1229 }
 0x2b7   : > { %3989 = vst [vmem:[#allocation21_spill] sm:$0xff] %v3247_v0 }
 0x2b8   : > { %v3191_v36 = vpop.permute.xlu0 %1231 }
 0x2b9   : > { %3984 = vst [vmem:[#allocation16_spill] sm:$0xff] %v3191_v36 }
 0x2ba   : > { %1515 = vrot.lane.b32.xlu0 %v3063_v33, %s2537_s22 }
 0x2bc   : > { %v3195_v17 = vpop.permute.xlu0 %1247 }
 0x2bd   : > { %3985 = vst [vmem:[#allocation17_spill] sm:$0xff] %v3195_v17 }
 0x2be   : > { %991 = vrot.lane.b32.xlu0 %v3071_v47, %s2535_s20 }
 0x2c0   : > { %v3199_v38 = vpop.permute.xlu0 %1376 }
 0x2c2   : > { %1120 = vrot.lane.b32.xlu0 %v1084_v39, %s2535_s20 }
 0x2c4   : > { %v3204_v40 = vpop.permute.xlu0 %1392 }
 0x2c6   : > { %1136 = vrot.lane.b32.xlu0 %v1092_v41, %s2535_s20  ;;  %v1095_v41 = vmul.f32 %v3063_v33, %v2847_v6 }
 0x2c8   : > { %v3209_v18 = vpop.permute.xlu0 %1491 }
 0x2c9   : > { %3986 = vst [vmem:[#allocation18_spill] sm:$0xff] %v3209_v18 }
 0x2ca   : > { %1235 = vrot.lane.b32.xlu0 %v3014_v63, %s2536_s21 }
 0x2cc   : > { %v3213_v42 = vpop.permute.xlu0 %1507 }
 0x2cd   : > { %3987 = vst [vmem:[#allocation19_spill] sm:$0xff] %v3213_v42 }
 0x2ce   : > { %1251 = vrot.lane.b32.xlu0 %v3071_v47, %s2536_s21 }
 0x2d0   : > { %v3217_v45 = vpop.permute.xlu0 %1112 }
 0x2d1   : > { %885 = vadd.xlane.f32.xlu1 %v884_v55  ;;  %v3262_v55 = vpop.permute.xlu1 %1245 }
 0x2d2   : > { %1380 = vrot.lane.b32.xlu0 %v1344_v43, %s2536_s21  ;;  %3991 = vst [vmem:[#allocation23_spill] sm:$0xff] %v3262_v55  ;;  %v1347_v43 = vmul.f32 %v3008_v29, %v2857_v15 }
 0x2d4   : > { %v3224_v44 = vpop.permute.xlu0 %1128 }
 0x2d5   : > { %909 = vadd.xlane.f32.xlu1 %v908_v21  ;;  %v3270_v21 = vpop.permute.xlu1 %1489 }
 0x2d6   : > { %1396 = vrot.lane.b32.xlu0 %v1352_v48, %s2536_s21  ;;  %3992 = vst [vmem:[#allocation24_spill] sm:$0xff] %v3270_v21 }
 0x2d8   : > { %v3233_v58 = vpop.permute.xlu0 %1243 }
 0x2d9   : > { %3988 = vst [vmem:[#allocation20_spill] sm:$0xff] %v3233_v58  ;;  %894 = vadd.xlane.f32.xlu1 %v893_v50 }
 0x2da   : > { %1495 = vrot.lane.b32.xlu0 %v3014_v63, %s2537_s22 }
 0x2dc   : > { %v3241_v24 = vpop.permute.xlu0 %1372 }
 0x2dd   : > { %918 = vadd.xlane.f32.xlu1 %v917_v57  ;;  %v1085_v57 = vmul.f32 %v2847_v6, %v3014_v63 }
 0x2de   : > { %1511 = vrot.lane.b32.xlu0 %v3071_v47, %s2537_s22 }
 0x2e0   : > { %v3249_v26 = vpop.permute.xlu0 %1388 }
 0x2e1   : > { %888 = vadd.xlane.f32.xlu1 %v887_v46  ;;  %v3281_v46 = vpop.permute.xlu1 %1505 }
 0x2e2   : > { %1126 = vrot.lane.b32.xlu0 %v1087_v23, %s2535_s20  ;;  %3993 = vst [vmem:[#allocation25_spill] sm:$0xff] %v3281_v46 }
 0x2e4   : > { %v3256_v39 = vpop.permute.xlu0 %1503 }
 0x2e5   : > { %3990 = vst [vmem:[#allocation22_spill] sm:$0xff] %v3256_v39  ;;  %912 = vadd.xlane.f32.xlu1 %v911_v27  ;;  %v1093_v27 = vmul.f32 %v2847_v6, %v3071_v47  ;;  %v1353_v6 = vmul.f32 %v2857_v15, %v3071_v47 }
 0x2e6   : > { %1142 = vrot.lane.b32.xlu0 %v1095_v41, %s2535_s20  ;;  %v3291_v41 = vpop.permute.xlu1 %965 }
 0x2e8   : > { %v3265_v1 = vpop.permute.xlu0 %1118 }
 0x2ea   : > { %1386 = vrot.lane.b32.xlu0 %v1347_v43, %s2536_s21  ;;  %v3304_v9 = vpop.permute.xlu1 %981 }
 0x2ec   : > { %v3272_v48 = vpop.permute.xlu0 %1134 }
 0x2ee   : > { %1402 = vrot.lane.b32.xlu0 %v1355_v28, %s2536_s21  ;;  %v1345_v28 = vmul.f32 %v2857_v15, %v3014_v63  ;;  %v3313_v7 = vpop.permute.xlu1 %1241 }
 0x2ef   : > { %3994 = vst [vmem:[#allocation26_spill] sm:$0xff] %v3313_v7 }
 0x2f0   : > { %v3277_v50 = vpop.permute.xlu0 %1378 }
 0x2f2   : > { %1122 = vrot.lane.b32.xlu0 %v1085_v57, %s2535_s20  ;;  %v3319_v15 = vpop.permute.xlu1 %1501 }
 0x2f3   : > { %3995 = vst [vmem:[#allocation27_spill] sm:$0xff] %v3319_v15 }
 0x2f4   : > { %v3284_v23 = vpop.permute.xlu0 %1394 }
 0x2f6   : > { %993 = vrot.lane.b32.xlu1 %v3053_v31, %s2535_s20  ;;  %1138 = vrot.lane.b32.xlu0 %v1093_v27, %s2535_s20 }
 0x2f8   : > { %v3293_v43 = vpop.permute.xlu0 %1114 }
 0x2fa   : > { %1237 = vrot.lane.b32.xlu1 %v2997_v60, %s2536_s21  ;;  %1382 = vrot.lane.b32.xlu0 %v1345_v28, %s2536_s21 }
 0x2fc   : > { %v3300_v57 = vpop.permute.xlu0 %1130 }
 0x2fe   : > { %1253 = vrot.lane.b32.xlu1 %v3053_v31, %s2536_s21  ;;  %1398 = vrot.lane.b32.xlu0 %v1353_v6, %s2536_s21  ;;  %v3327_v6 = vpop.permute.xlu1 %971 }
 0x300   : > { %v3309_v27 = vpop.permute.xlu0 %1374 }
 0x302   : > { %1497 = vrot.lane.b32.xlu1 %v2997_v60, %s2537_s22  ;;  %v3337_v39 = vpop.permute.xlu1 %987 }
 0x304   : > { %v3315_v28 = vpop.permute.xlu0 %1390 }
 0x306   : > { %1513 = vrot.lane.b32.xlu1 %v3053_v31, %s2537_s22 }
 0x308   : > { %v3321_v42 = vpop.permute.xlu0 %977 }
 0x30a   : > { %973 = vrot.lane.b32.xlu1 %v3001_v62, %s2535_s20 }
 0x30c   : > { %v3329_v46 = vpop.permute.xlu0 %995 }
 0x30e   : > { %989 = vrot.lane.b32.xlu1 %v3057_v54, %s2535_s20 }
 0x310   : > { %v3339_v15 = vpop.permute.xlu0 %1124 }
 0x312   : > { %1233 = vrot.lane.b32.xlu1 %v3001_v62, %s2536_s21 }
 0x314   : > { %v3349_v21 = vpop.permute.xlu0 %1140 }
 0x316   : > { %1249 = vrot.lane.b32.xlu1 %v3057_v54, %s2536_s21  ;;  %s1770_s21 = scalar_lea.vmem (%p2613_p4), %s3963_s7, %s2388_s18 }
 0x318   : > { %v3357_v53 = vpop.permute.xlu0 %1239 }
 0x319   : > { %v892_v18 = vpop.xlane.xlu1 %891  ;;  %3996 = vst [vmem:[#allocation28_spill] sm:$0xff] %v3357_v53  ;;  %v926_v53 = vsel %vm883_vm1, %v3061_v32, 0.0 }
 0x31a   : > { %935 = vst.msk [vmem:[%s3343_s25 + $0x10] sm:$0xff] %vm932_vm2, %v892_v18  ;;  %1493 = vrot.lane.b32.xlu1 %v3001_v62, %s2537_s22 }
 0x31c   : > { %v3361_v18 = vpop.permute.xlu0 %1255 }
 0x31d   : > { %v916_v4 = vpop.xlane.xlu1 %915  ;;  %924 = vadd.xlane.f32.xlu0 %v923_v5  ;;  %3997 = vst [vmem:[#allocation29_spill] sm:$0xff] %v3361_v18 }
 0x31e   : > { %943 = vst.msk [vmem:[%s3343_s25 + $0x50] sm:$0xff] %vm932_vm2, %v916_v4  ;;  %1509 = vrot.lane.b32.xlu1 %v3057_v54, %s2537_s22  ;;  %v902_v4 = vsel %vm883_vm1, %v3005_v11, 0.0 }
 0x320   : > { %v3363_v17 = vpop.permute.xlu0 %1384 }
 0x321   : > { %v3375_v7 = vpop.permute.xlu1 %967 }
 0x322   : > { %979 = vrot.lane.b32.xlu1 %v3008_v29, %s2535_s20 }
 0x324   : > { %v3365_v55 = vpop.permute.xlu0 %1400 }
 0x328   : > { %v3367_v58 = vpop.permute.xlu0 %1499 }
 0x329   : > { %3998 = vst [vmem:[#allocation30_spill] sm:$0xff] %v3367_v58  ;;  %v3382_v58 = vpop.permute.xlu1 %983 }
 0x32c   : > { %v3369_v35 = vpop.permute.xlu0 %1515 }
 0x32d   : > { %3999 = vst [vmem:[#allocation31_spill] sm:$0xff] %v3369_v35 }
 0x330   : > { %v3373_v5 = vpop.permute.xlu0 %991 }
 0x334   : > { %v3380_v18 = vpop.permute.xlu0 %1120 }
 0x338   : > { %v3385_v11 = vpop.permute.xlu0 %1136 }
 0x33c   : > { %v3391_v32 = vpop.permute.xlu0 %1235 }
 0x33d   : > { %4000 = vst [vmem:[#allocation32_spill] sm:$0xff] %v3391_v32 }
 0x340   : > { %v3398_v35 = vpop.permute.xlu0 %1251 }
 0x341   : > { %4002 = vst [vmem:[#allocation34_spill] sm:$0xff] %v3398_v35 }
 0x346   : > { %903 = vadd.xlane.f32.xlu1 %v902_v4  ;;  %v3388_v4 = vpop.permute.xlu1 %1227 }
 0x34a   : > { %927 = vadd.xlane.f32.xlu1 %v926_v53  ;;  %806 = vxpose.xlu0.b32.start [1/16] (narrow) %v2975_v49, 16  ;;  %v3393_v53 = vpop.permute.xlu1 %1487 }
 0x34b   : > { %4001 = vst [vmem:[#allocation33_spill] sm:$0xff] %v3393_v53  ;;  %v3406_v53 = vpop.permute.xlu0 %1380 }
 0x34e   : > { %807 = vxpose.xlu0.b32.cont [2/16] (narrow) %v2985_v59, 16 }
 0x34f   : > { %v1397_v35 = vpop.permute.xlu0 %1396 }
 0x352   : > { %808 = vxpose.xlu0.b32.cont [3/16] (narrow) %v2971_v56, 16 }
 0x356   : > { %809 = vxpose.xlu0.b32.cont [4/16] (narrow) %v2979_v25, 16 }
 0x35a   : > { %810 = vxpose.xlu0.b32.cont [5/16] (narrow) %v3001_v62, 16 }
 0x35b   : > { %975 = vrot.lane.b32.xlu1 %v3014_v63, %s2535_s20 }
 0x35e   : > { %v886_v36 = vpop.xlane.xlu1 %885  ;;  %811 = vxpose.xlu0.b32.cont [6/16] (narrow) %v3014_v63, 16 }
 0x35f   : > { %933 = vst.msk [vmem:[%s3343_s25] sm:$0xff] %vm932_vm2, %v886_v36 }
 0x362   : > { %v910_v0 = vpop.xlane.xlu1 %909  ;;  %812 = vxpose.xlu0.b32.cont [7/16] (narrow) %v2997_v60, 16  ;;  %v3417_v60 = vpop.permute.xlu0 %1495 }
 0x363   : > { %941 = vst.msk [vmem:[%s3343_s25 + $0x40] sm:$0xff] %vm932_vm2, %v910_v0  ;;  %4003 = vst [vmem:[#allocation35_spill] sm:$0xff] %v3417_v60 }
 0x366   : > { %v895_v32 = vpop.xlane.xlu1 %894  ;;  %813 = vxpose.xlu0.b32.cont [8/16] (narrow) %v3008_v29, 16  ;;  %v3422_v29 = vpop.permute.xlu0 %1511 }
 0x367   : > { %936 = vst.msk [vmem:[%s3343_s25 + $0x18] sm:$0xff] %vm932_vm2, %v895_v32  ;;  %4004 = vst [vmem:[#allocation36_spill] sm:$0xff] %v3422_v29  ;;  %v905_v29 = vsel %vm883_vm1, %v3018_v2, 0.0  ;;  %v1193_v2 = vsel %vm883_vm1, %v3272_v48, 0.0  ;;  %v1423_v48 = vsel %vm883_vm1, %v3309_v27, 0.0 }
 0x36a   : > { %v919_v62 = vpop.xlane.xlu1 %918  ;;  %814 = vxpose.xlu0.b32.cont [9/16] (narrow) %v3028_v20, 16  ;;  %v3426_v32 = vpop.permute.xlu0 %1126 }
 0x36b   : > { %944 = vst.msk [vmem:[%s3343_s25 + $0x58] sm:$0xff] %vm932_vm2, %v919_v62  ;;  %v896_v62 = vsel %vm883_vm1, %v3012_v30, 0.0 }
 0x36e   : > { %v889_v36 = vpop.xlane.xlu1 %888  ;;  %815 = vxpose.xlu0.b32.cont [10/16] (narrow) %v3039_v13, 16 }
 0x36f   : > { %934 = vst.msk [vmem:[%s3343_s25 + $0x8] sm:$0xff] %vm932_vm2, %v889_v36  ;;  %v1143_v36 = vpop.permute.xlu0 %1142 }
 0x372   : > { %v913_v0 = vpop.xlane.xlu1 %912  ;;  %816 = vxpose.xlu0.b32.cont [11/16] (narrow) %v3024_v19, 16 }
 0x373   : > { %942 = vst.msk [vmem:[%s3343_s25 + $0x48] sm:$0xff] %vm932_vm2, %v913_v0  ;;  %v920_v0 = vsel %vm883_vm1, %v3067_v34, 0.0  ;;  %v3437_v60 = vpop.permute.xlu0 %1386  ;;  %v899_v34 = vsel %vm883_vm1, %v3022_v3, 0.0  ;;  %v1163_v3 = vsel %vm883_vm1, %v3293_v43, 0.0  ;;  %v1462_v43 = vsel %vm883_vm1, %v3365_v55, 0.0 }
 0x376   : > { %817 = vxpose.xlu0.b32.cont [12/16] (narrow) %v3032_v10, 16  ;;  %v3441_v30 = vpop.permute.xlu1 %993 }
 0x37a   : > { %818 = vxpose.xlu0.b32.cont [13/16] (narrow) %v3057_v54, 16 }
 0x37e   : > { %819 = vxpose.xlu0.b32.cont [14/16] (narrow) %v3071_v47, 16  ;;  %v929_v47 = vsel %vm883_vm1, %v3075_v14, 0.0 }
 0x37f   : > { %897 = vadd.xlane.f32.xlu1 %v896_v62  ;;  %v3443_v62 = vpop.permute.xlu0 %1402 }
 0x382   : > { %820 = vxpose.xlu0.b32.cont [15/16] (narrow) %v3053_v31, 16 }
 0x383   : > { %921 = vadd.xlane.f32.xlu1 %v920_v0  ;;  %v1450_v0 = vsel %vm883_vm1, %v3204_v40, 0.0  ;;  %v1187_v40 = vsel %vm883_vm1, %v3300_v57, 0.0  ;;  %v1456_v57 = vsel %vm883_vm1, %v1397_v35, 0.0  ;;  %v1190_v35 = vsel %vm883_vm1, %v3187_v37, 0.0 }
 0x384   : > { %v1420_v37 = vsel %vm883_vm1, %v3241_v24, 0.0 }
 0x386   : > { %821 = vxpose.xlu0.b32.end [16/16] (narrow) %v3063_v33, 16  ;;  %v3449_v33 = vpop.permute.xlu1 %1237 }
 0x387   : > { %906 = vadd.xlane.f32.xlu1 %v905_v29  ;;  %v3451_v29 = vpop.permute.xlu0 %1122 }
 0x38b   : > { %930 = vadd.xlane.f32.xlu1 %v929_v47  ;;  %v3455_v47 = vpop.permute.xlu1 %1253  ;;  %v1139_v14 = vpop.permute.xlu0 %1138 }
 0x38c   : > { %4005 = vst [vmem:[#allocation37_spill] sm:$0xff] %v3455_v47  ;;  %v1199_v55 = vsel %vm883_vm1, %v1139_v14, 0.0 }
 0x38f   : > { %900 = vadd.xlane.f32.xlu1 %v899_v34  ;;  %v3461_v34 = vpop.permute.xlu1 %1497 }
 0x393   : > { %1451 = vadd.xlane.f32.xlu1 %v1450_v0  ;;  %v3463_v0 = vpop.permute.xlu0 %1382 }
 0x397   : > { %1194 = vadd.xlane.f32.xlu1 %v1193_v2  ;;  %v3467_v2 = vpop.permute.xlu1 %1513  ;;  %v3469_v47 = vpop.permute.xlu0 %1398 }
 0x39b   : > { %1164 = vadd.xlane.f32.xlu1 %v1163_v3  ;;  %v3474_v31 = vpop.permute.xlu1 %973 }
 0x39f   : > { %1188 = vadd.xlane.f32.xlu1 %v1187_v40  ;;  %v1205_v40 = vsel %vm883_vm1, %v1143_v36, 0.0  ;;  %v3479_v27 = vpop.permute.xlu1 %989  ;;  %v1426_v36 = vsel %vm883_vm1, %v3199_v38, 0.0 }
 0x3a3   : > { %1424 = vadd.xlane.f32.xlu1 %v1423_v48  ;;  %v1166_v48 = vsel %vm883_vm1, %v3182_v61, 0.0  ;;  %v1184_v61 = vsel %vm883_vm1, %v3224_v44, 0.0  ;;  %v1169_v44 = vsel %vm883_vm1, %v3265_v1, 0.0  ;;  %v1453_v1 = vsel %vm883_vm1, %v3284_v23, 0.0 }
 0x3a4   : > { %v1202_v23 = vsel %vm883_vm1, %v3349_v21, 0.0  ;;  %v1432_v21 = vsel %vm883_vm1, %v3406_v53, 0.0 }
 0x3a7   : > { %1463 = vadd.xlane.f32.xlu1 %v1462_v43  ;;  %v3486_v43 = vpop.permute.xlu1 %1233 }
 0x3aa   : > { %v925_v3 = vpop.xlane.xlu0 %924 }
 0x3ab   : > { %946 = vst.msk [vmem:[%s3343_s25 + $0x68] sm:$0xff] %vm932_vm2, %v925_v3  ;;  %1457 = vadd.xlane.f32.xlu1 %v1456_v57  ;;  %v3490_v3 = vpop.permute.xlu1 %1249  ;;  %v1160_v57 = vsel %vm883_vm1, %v3217_v45, 0.0 }
 0x3af   : > { %1206 = vadd.xlane.f32.xlu1 %v1205_v40  ;;  %v3496_v14 = vpop.permute.xlu1 %1493 }
 0x3b3   : > { %1167 = vadd.xlane.f32.xlu0 %v1166_v48  ;;  %1200 = vadd.xlane.f32.xlu1 %v1199_v55  ;;  %v3501_v40 = vpop.permute.xlu1 %1509  ;;  %v1444_v48 = vsel %vm883_vm1, %v3249_v26, 0.0 }
 0x3b7   : > { %1191 = vadd.xlane.f32.xlu0 %v1190_v35  ;;  %v980_v55 = vpop.permute.xlu1 %979 }
 0x3bb   : > { %1427 = vadd.xlane.f32.xlu0 %v1426_v36  ;;  %v1429_v36 = vsel %vm883_vm1, %v3277_v50, 0.0 }
 0x3bf   : > { %1161 = vadd.xlane.f32.xlu0 %v1160_v57 }
 0x3c3   : > { %1185 = vadd.xlane.f32.xlu0 %v1184_v61 }
 0x3c7   : > { %1421 = vadd.xlane.f32.xlu0 %v1420_v37 }
 0x3ca   : > { %v822_v38 = vpop.trf.xlu0 }
 0x3cb   : > { %838 = vst [vmem:[%s3505_s26] sm:$0xff] %v822_v38  ;;  %1445 = vadd.xlane.f32.xlu0 %v1444_v48  ;;  %v852_v24 = vmul.f32 %v2851_v8, %v822_v38  ;;  %v1447_v38 = vsel %vm883_vm1, %v3315_v28, 0.0  ;;  %v1438_v28 = vsel %vm883_vm1, %v3363_v17, 0.0 }
 0x3ce   : > { %v823_v45 = vpop.trf.xlu0 }
 0x3cf   : > { %839 = vst [vmem:[%s3505_s26 + $0x8] sm:$0xff] %v823_v45  ;;  %v853_v35 = vmul.f32 %v2855_v12, %v823_v45  ;;  %1170 = vadd.xlane.f32.xlu0 %v1169_v44  ;;  %v1178_v44 = vsel %vm883_vm1, %v3339_v15, 0.0  ;;  %v1172_v15 = vsel %vm883_vm1, %v3380_v18, 0.0 }
 0x3d1   : > { %v854_v26 = vadd.f32 %v853_v35, %v852_v24  ;;  %v1196_v24 = vsel %vm883_vm1, %v3385_v11, 0.0 }
 0x3d3   : > { %v855_v57 = vrot.slane %v854_v26, 4  ;;  %v904_v61 = vpop.xlane.xlu1 %903  ;;  %1430 = vadd.xlane.f32.xlu0 %v1429_v36 }
 0x3d4   : > { %939 = vst.msk [vmem:[%s3343_s25 + $0x30] sm:$0xff] %vm932_vm2, %v904_v61  ;;  %v4012_v61 = vld [vmem:[#allocation28_spill] sm:$0xff] }
 0x3d5   : > { %v856_v37 = vadd.f32 %v855_v57, %v854_v26 }
 0x3d7   : > { %v857_v48 = vrot.slane %v856_v37, 2  ;;  %v928_v8 = vpop.xlane.xlu1 %927  ;;  %1454 = vadd.xlane.f32.xlu0 %v1453_v1 }
 0x3d8   : > { %947 = vst.msk [vmem:[%s3343_s25 + $0x70] sm:$0xff] %vm932_vm2, %v928_v8  ;;  %v4014_v8 = vld [vmem:[#allocation20_spill] sm:$0xff] }
 0x3d9   : > { %v858_v12 = vadd.f32 %v857_v48, %v856_v37  ;;  %v1609_v37 = vmul.f32 %v2859_v16, %v3039_v13  ;;  %v1611_v13 = vmul.f32 %v3032_v10, %v2859_v16  ;;  %v4017_v10 = vld [vmem:[#allocation14_spill] sm:$0xff] }
 0x3db   : > { %v859_v50 = vrot.slane %v858_v12, 1  ;;  %1448 = vadd.xlane.f32.xlu0 %v1447_v38  ;;  %v976_v17 = vpop.permute.xlu1 %975  ;;  %v4015_v38 = vld [vmem:[#allocation23_spill] sm:$0xff] }
 0x3dd   : > { %v860_v45 = vadd.f32 %v859_v50, %v858_v12 }
 0x3df   : > { %861 = vst [vmem:[%s3526_s28] sm:$0x1] %v860_v45  ;;  %1179 = vadd.xlane.f32.xlu0 %v1178_v44  ;;  %v4016_v45 = vld [vmem:[#allocation17_spill] sm:$0xff]  ;;  %v1613_v44 = vmul.f32 %v2859_v16, %v4017_v10  ;;  %v4037_v10 = vld [vmem:[#allocation7_spill] sm:$0xff] }
 0x3e3   : > { %1203 = vadd.xlane.f32.xlu0 %v1202_v23 }
 0x3e6   : > { %1013 = vxpose.xlu1.b32.start [1/16] (narrow) %v3291_v41, 16  ;;  %v1465_v41 = vsel %vm883_vm1, %v3443_v62, 0.0 }
 0x3e7   : > { %1439 = vadd.xlane.f32.xlu0 %v1438_v28 }
 0x3ea   : > { %1014 = vxpose.xlu1.b32.cont [2/16] (narrow) %v3375_v7, 16  ;;  %v1181_v7 = vsel %vm883_vm1, %v3426_v32, 0.0 }
 0x3eb   : > { %1173 = vadd.xlane.f32.xlu0 %v1172_v15 }
 0x3ee   : > { %1015 = vxpose.xlu1.b32.cont [3/16] (narrow) %v3230_v22, 16  ;;  %v1441_v22 = vsel %vm883_vm1, %v3437_v60, 0.0  ;;  %v1435_v60 = vsel %vm883_vm1, %v3463_v0, 0.0 }
 0x3ef   : > { %1197 = vadd.xlane.f32.xlu0 %v1196_v24  ;;  %v4019_v24 = vld [vmem:[#allocation34_spill] sm:$0xff] }
 0x3f2   : > { %1016 = vxpose.xlu1.b32.cont [4/16] (narrow) %v3327_v6, 16 }
 0x3f3   : > { %1433 = vadd.xlane.f32.xlu0 %v1432_v21  ;;  %v4020_v21 = vld [vmem:[#allocation13_spill] sm:$0xff] }
 0x3f6   : > { %1017 = vxpose.xlu1.b32.cont [5/16] (narrow) %v3474_v31, 16  ;;  %v1175_v31 = vsel %vm883_vm1, %v3451_v29, 0.0 }
 0x3f7   : > { %1182 = vadd.xlane.f32.xlu0 %v1181_v7  ;;  %v1615_v7 = vmul.f32 %v4020_v21, %v2859_v16 }
 0x3fa   : > { %1018 = vxpose.xlu1.b32.cont [6/16] (narrow) %v976_v17, 16 }
 0x3fb   : > { %1442 = vadd.xlane.f32.xlu0 %v1441_v22  ;;  %v1568_v22 = vld [vmem:[%s3960_s4 + $0x30] sm:$0xff] }
 0x3fe   : > { %1019 = vxpose.xlu1.b32.cont [7/16] (narrow) %v3321_v42, 16  ;;  %v1459_v42 = vsel %vm883_vm1, %v3469_v47, 0.0  ;;  %v4009_v47 = vld [vmem:[#allocation9_spill] sm:$0xff] }
 0x3ff   : > { %1466 = vadd.xlane.f32.xlu0 %v1465_v41  ;;  %v1606_v0 = vmul.f32 %v4009_v47, %v2859_v16 }
 0x402   : > { %1020 = vxpose.xlu1.b32.cont [8/16] (narrow) %v980_v55, 16  ;;  %v4010_v55 = vld [vmem:[#allocation32_spill] sm:$0xff] }
 0x403   : > { %1176 = vadd.xlane.f32.xlu0 %v1175_v31  ;;  %v4022_v31 = vld [vmem:[#allocation29_spill] sm:$0xff] }
 0x406   : > { %1021 = vxpose.xlu1.b32.cont [9/16] (narrow) %v3304_v9, 16 }
 0x407   : > { %1436 = vadd.xlane.f32.xlu0 %v1435_v60 }
 0x40a   : > { %1022 = vxpose.xlu1.b32.cont [10/16] (narrow) %v3382_v58, 16 }
 0x40b   : > { %1460 = vadd.xlane.f32.xlu0 %v1459_v42  ;;  %v4023_v42 = vld [vmem:[#allocation15_spill] sm:$0xff] }
 0x40c   : > { %v898_v6 = vpop.xlane.xlu1 %897 }
 0x40d   : > { %937 = vst.msk [vmem:[%s3343_s25 + $0x20] sm:$0xff] %vm932_vm2, %v898_v6 }
 0x40e   : > { %1023 = vxpose.xlu1.b32.cont [11/16] (narrow) %v3237_v51, 16  ;;  %v1600_v51 = vmul.f32 %v2859_v16, %v2975_v49  ;;  %v1602_v49 = vmul.f32 %v2971_v56, %v2859_v16  ;;  %v4007_v56 = vld [vmem:[#allocation10_spill] sm:$0xff] }
 0x410   : > { %v922_v18 = vpop.xlane.xlu1 %921 }
 0x411   : > { %945 = vst.msk [vmem:[%s3343_s25 + $0x60] sm:$0xff] %vm932_vm2, %v922_v18 }
 0x412   : > { %1024 = vxpose.xlu1.b32.cont [12/16] (narrow) %v3337_v39, 16 }
 0x414   : > { %v907_v9 = vpop.xlane.xlu1 %906 }
 0x415   : > { %940 = vst.msk [vmem:[%s3343_s25 + $0x38] sm:$0xff] %vm932_vm2, %v907_v9  ;;  %v4024_v9 = vld [vmem:[#allocation33_spill] sm:$0xff] }
 0x416   : > { %1025 = vxpose.xlu1.b32.cont [13/16] (narrow) %v3479_v27, 16 }
 0x418   : > { %v931_v58 = vpop.xlane.xlu1 %930 }
 0x419   : > { %948 = vst.msk [vmem:[%s3343_s25 + $0x78] sm:$0xff] %vm932_vm2, %v931_v58 }
 0x41a   : > { %1026 = vxpose.xlu1.b32.cont [14/16] (narrow) %v3373_v5, 16  ;;  %v1601_v5 = vmul.f32 %v2859_v16, %v2985_v59  ;;  %v1603_v59 = vmul.f32 %v2979_v25, %v2859_v16  ;;  %v1605_v25 = vmul.f32 %v2859_v16, %v3014_v63  ;;  %v4011_v63 = vld [vmem:[#allocation11_spill] sm:$0xff] }
 0x41b   : > { %v1607_v35 = vmul.f32 %v4011_v63, %v2859_v16 }
 0x41c   : > { %v901_v11 = vpop.xlane.xlu1 %900 }
 0x41d   : > { %938 = vst.msk [vmem:[%s3343_s25 + $0x28] sm:$0xff] %vm932_vm2, %v901_v11  ;;  %v4025_v11 = vld [vmem:[#allocation5_spill] sm:$0xff] }
 0x41e   : > { %1027 = vxpose.xlu1.b32.cont [15/16] (narrow) %v3441_v30, 16  ;;  %v1604_v30 = vmul.f32 %v2859_v16, %v4007_v56  ;;  %v4028_v56 = vld [vmem:[#allocation18_spill] sm:$0xff] }
 0x420   : > { %v1452_v39 = vpop.xlane.xlu1 %1451 }
 0x421   : > { %2359 = vst.msk [vmem:[%s3343_s25 + $0x150] sm:$0xff] %vm932_vm2, %v1452_v39  ;;  %1632 = vrot.lane.b32.xlu0 %v1600_v51, %s2537_s22  ;;  %v4026_v39 = vld [vmem:[#allocation6_spill] sm:$0xff] }
 0x422   : > { %1028 = vxpose.xlu1.b32.end [16/16] (narrow) %v3329_v46, 16 }
 0x424   : > { %v1195_v53 = vpop.xlane.xlu1 %1194 }
 0x425   : > { %2340 = vst.msk [vmem:[%s3343_s25 + $0xd8] sm:$0xff] %vm932_vm2, %v1195_v53  ;;  %1634 = vrot.lane.b32.xlu0 %v1601_v5, %s2537_s22 }
 0x426   : > { %1273 = vxpose.xlu1.b32.start [1/16] (narrow) %v3165_v52, 16  ;;  %v4006_v52 = vld [vmem:[#allocation21_spill] sm:$0xff] }
 0x428   : > { %v1165_v32 = vpop.xlane.xlu1 %1164 }
 0x429   : > { %2330 = vst.msk [vmem:[%s3343_s25 + $0x88] sm:$0xff] %vm932_vm2, %v1165_v32  ;;  %1636 = vrot.lane.b32.xlu0 %v1602_v49, %s2537_s22  ;;  %v4027_v32 = vld [vmem:[#allocation24_spill] sm:$0xff] }
 0x42a   : > { %1274 = vxpose.xlu1.b32.cont [2/16] (narrow) %v3388_v4, 16  ;;  %v4008_v4 = vld [vmem:[#allocation16_spill] sm:$0xff] }
 0x42c   : > { %v1189_v46 = vpop.xlane.xlu1 %1188 }
 0x42d   : > { %2338 = vst.msk [vmem:[%s3343_s25 + $0xc8] sm:$0xff] %vm932_vm2, %v1189_v46  ;;  %1638 = vrot.lane.b32.xlu0 %v1603_v59, %s2537_s22 }
 0x42e   : > { %1275 = vxpose.xlu1.b32.cont [3/16] (narrow) %v4006_v52, 16 }
 0x430   : > { %v1425_v62 = vpop.xlane.xlu1 %1424 }
 0x431   : > { %2350 = vst.msk [vmem:[%s3343_s25 + $0x108] sm:$0xff] %vm932_vm2, %v1425_v62  ;;  %1640 = vrot.lane.b32.xlu0 %v1604_v30, %s2537_s22 }
 0x432   : > { %1276 = vxpose.xlu1.b32.cont [4/16] (narrow) %v4008_v4, 16 }
 0x434   : > { %v1464_v29 = vpop.xlane.xlu1 %1463 }
 0x435   : > { %2363 = vst.msk [vmem:[%s3343_s25 + $0x170] sm:$0xff] %vm932_vm2, %v1464_v29  ;;  %1642 = vrot.lane.b32.xlu0 %v1605_v25, %s2537_s22 }
 0x436   : > { %1277 = vxpose.xlu1.b32.cont [5/16] (narrow) %v3486_v43, 16  ;;  %v1608_v43 = vmul.f32 %v2859_v16, %v3028_v20  ;;  %v4013_v20 = vld [vmem:[#allocation26_spill] sm:$0xff] }
 0x438   : > { %v1458_v27 = vpop.xlane.xlu1 %1457 }
 0x439   : > { %2361 = vst.msk [vmem:[%s3343_s25 + $0x160] sm:$0xff] %vm932_vm2, %v1458_v27  ;;  %1644 = vrot.lane.b32.xlu0 %v1606_v0, %s2537_s22  ;;  %v4029_v0 = vld [vmem:[#allocation35_spill] sm:$0xff] }
 0x43a   : > { %1278 = vxpose.xlu1.b32.cont [6/16] (narrow) %v4010_v55, 16 }
 0x43c   : > { %v1207_v26 = vpop.xlane.xlu1 %1206 }
 0x43d   : > { %2344 = vst.msk [vmem:[%s3343_s25 + $0xf8] sm:$0xff] %vm932_vm2, %v1207_v26  ;;  %1646 = vrot.lane.b32.xlu0 %v1607_v35, %s2537_s22  ;;  %v4031_v35 = vld [vmem:[#allocation27_spill] sm:$0xff] }
 0x43e   : > { %1279 = vxpose.xlu1.b32.cont [7/16] (narrow) %v3449_v33, 16  ;;  %v1610_v33 = vmul.f32 %v3024_v19, %v2859_v16  ;;  %v1612_v19 = vmul.f32 %v2859_v16, %v3057_v54  ;;  %v4018_v54 = vld [vmem:[#allocation12_spill] sm:$0xff] }
 0x43f   : > { %v1614_v28 = vmul.f32 %v4018_v54, %v2859_v16  ;;  %v1569_v16 = vld [vmem:[%s3960_s4 + $0x38] sm:$0xff] }
 0x440   : > { %v1201_v36 = vpop.xlane.xlu1 %1200  ;;  %v1168_v57 = vpop.xlane.xlu0 %1167 }
 0x441   : > { %2342 = vst.msk [vmem:[%s3343_s25 + $0xe8] sm:$0xff] %vm932_vm2, %v1201_v36  ;;  %2331 = vst.msk [vmem:[%s3343_s25 + $0x90] sm:$0xff] %vm932_vm2, %v1168_v57  ;;  %1648 = vrot.lane.b32.xlu0 %v1608_v43, %s2537_s22  ;;  %v4032_v43 = vld [vmem:[#allocation22_spill] sm:$0xff] }
 0x442   : > { %1280 = vxpose.xlu1.b32.cont [8/16] (narrow) %v4012_v61, 16  ;;  %v4034_v61 = vld [vmem:[#allocation19_spill] sm:$0xff] }
 0x444   : > { %v1192_v1 = vpop.xlane.xlu0 %1191 }
 0x445   : > { %2339 = vst.msk [vmem:[%s3343_s25 + $0xd0] sm:$0xff] %vm932_vm2, %v1192_v1  ;;  %1650 = vrot.lane.b32.xlu0 %v1609_v37, %s2537_s22 }
 0x446   : > { %1281 = vxpose.xlu1.b32.cont [9/16] (narrow) %v4013_v20, 16  ;;  %v4035_v20 = vld [vmem:[#allocation36_spill] sm:$0xff] }
 0x448   : > { %v1428_v48 = vpop.xlane.xlu0 %1427 }
 0x449   : > { %2351 = vst.msk [vmem:[%s3343_s25 + $0x110] sm:$0xff] %vm932_vm2, %v1428_v48  ;;  %1652 = vrot.lane.b32.xlu0 %v1610_v33, %s2537_s22 }
 0x44a   : > { %1282 = vxpose.xlu1.b32.cont [10/16] (narrow) %v4014_v8, 16 }
 0x44c   : > { %v1162_v12 = vpop.xlane.xlu0 %1161 }
 0x44d   : > { %2329 = vst.msk [vmem:[%s3343_s25 + $0x80] sm:$0xff] %vm932_vm2, %v1162_v12  ;;  %1654 = vrot.lane.b32.xlu0 %v1611_v13, %s2537_s22  ;;  %v4036_v13 = vld [vmem:[#allocation31_spill] sm:$0xff] }
 0x44e   : > { %1283 = vxpose.xlu1.b32.cont [11/16] (narrow) %v4015_v38, 16 }
 0x450   : > { %v1186_v50 = vpop.xlane.xlu0 %1185 }
 0x451   : > { %2337 = vst.msk [vmem:[%s3343_s25 + $0xc0] sm:$0xff] %vm932_vm2, %v1186_v50  ;;  %1656 = vrot.lane.b32.xlu0 %v1612_v19, %s2537_s22 }
 0x452   : > { %1284 = vxpose.xlu1.b32.cont [12/16] (narrow) %v4016_v45, 16 }
 0x454   : > { %v1422_v23 = vpop.xlane.xlu0 %1421 }
 0x455   : > { %2349 = vst.msk [vmem:[%s3343_s25 + $0x100] sm:$0xff] %vm932_vm2, %v1422_v23  ;;  %1658 = vrot.lane.b32.xlu0 %v1613_v44, %s2537_s22  ;;  %v4038_v23 = vld [vmem:[#allocation8_spill] sm:$0xff] }
 0x456   : > { %1285 = vxpose.xlu1.b32.cont [13/16] (narrow) %v3490_v3, 16  ;;  %v4021_v3 = vld [vmem:[#allocation37_spill] sm:$0xff] }
 0x458   : > { %v1446_v15 = vpop.xlane.xlu0 %1445 }
 0x459   : > { %2357 = vst.msk [vmem:[%s3343_s25 + $0x140] sm:$0xff] %vm932_vm2, %v1446_v15  ;;  %1660 = vrot.lane.b32.xlu0 %v1614_v28, %s2537_s22 }
 0x45a   : > { %1286 = vxpose.xlu1.b32.cont [14/16] (narrow) %v4019_v24, 16 }
 0x45c   : > { %v1171_v17 = vpop.xlane.xlu0 %1170 }
 0x45d   : > { %2332 = vst.msk [vmem:[%s3343_s25 + $0x98] sm:$0xff] %vm932_vm2, %v1171_v17  ;;  %1662 = vrot.lane.b32.xlu0 %v1615_v7, %s2537_s22 }
 0x45e   : > { %1287 = vxpose.xlu1.b32.cont [15/16] (narrow) %v4021_v3, 16 }
 0x460   : > { %v1431_v41 = vpop.xlane.xlu0 %1430 }
 0x461   : > { %2352 = vst.msk [vmem:[%s3343_s25 + $0x118] sm:$0xff] %vm932_vm2, %v1431_v41  ;;  %1572 = vperm.xlu0 %2470, %v1568_v22  }
 0x462   : > { %1288 = vxpose.xlu1.b32.end [16/16] (narrow) %v4022_v31, 16 }
 0x464   : > { %v1455_v60 = vpop.xlane.xlu0 %1454 }
 0x465   : > { %2360 = vst.msk [vmem:[%s3343_s25 + $0x158] sm:$0xff] %vm932_vm2, %v1455_v60  ;;  %1577 = vperm.xlu0 %2470, %v1569_v16  }
 0x466   : > { %1533 = vxpose.xlu1.b32.start [1/16] (narrow) %v4023_v42, 16  ;;  %v1029_v6 = vpop.trf.xlu1 }
 0x467   : > { %2325 = vst [vmem:[%s3505_s26 + $0x10] sm:$0xff] %v1029_v6  ;;  %v1060_v51 = vmul.f32 %v4025_v11, %v1029_v6 }
 0x468   : > { %v1449_v18 = vpop.xlane.xlu0 %1448 }
 0x469   : > { %2358 = vst.msk [vmem:[%s3343_s25 + $0x148] sm:$0xff] %vm932_vm2, %v1449_v18 }
 0x46a   : > { %1534 = vxpose.xlu1.b32.cont [2/16] (narrow) %v4024_v9, 16  ;;  %v1030_v58 = vpop.trf.xlu1 }
 0x46b   : > { %2326 = vst [vmem:[%s3505_s26 + $0x18] sm:$0xff] %v1030_v58  ;;  %v1061_v5 = vmul.f32 %v4026_v39, %v1030_v58 }
 0x46c   : > { %v1180_v53 = vpop.xlane.xlu0 %1179 }
 0x46d   : > { %v1062_v49 = vadd.f32 %v1061_v5, %v1060_v51  ;;  %2335 = vst.msk [vmem:[%s3343_s25 + $0xb0] sm:$0xff] %vm932_vm2, %v1180_v53 }
 0x46e   : > { %1535 = vxpose.xlu1.b32.cont [3/16] (narrow) %v4027_v32, 16 }
 0x46f   : > { %v1063_v59 = vrot.slane %v1062_v49, 4 }
 0x470   : > { %v1204_v46 = vpop.xlane.xlu0 %1203 }
 0x471   : > { %v1064_v52 = vadd.f32 %v1063_v59, %v1062_v49  ;;  %2343 = vst.msk [vmem:[%s3343_s25 + $0xf0] sm:$0xff] %vm932_vm2, %v1204_v46 }
 0x472   : > { %1536 = vxpose.xlu1.b32.cont [4/16] (narrow) %v4028_v56, 16 }
 0x473   : > { %v1065_v30 = vrot.slane %v1064_v52, 2 }
 0x474   : > { %v1440_v62 = vpop.xlane.xlu0 %1439 }
 0x475   : > { %v1066_v4 = vadd.f32 %v1065_v30, %v1064_v52  ;;  %2355 = vst.msk [vmem:[%s3343_s25 + $0x130] sm:$0xff] %vm932_vm2, %v1440_v62 }
 0x476   : > { %1537 = vxpose.xlu1.b32.cont [5/16] (narrow) %v3496_v14, 16  ;;  %v4030_v14 = vld [vmem:[#allocation30_spill] sm:$0xff] }
 0x477   : > { %v1067_v25 = vrot.slane %v1066_v4, 1 }
 0x478   : > { %v1174_v29 = vpop.xlane.xlu0 %1173 }
 0x479   : > { %v1068_v47 = vadd.f32 %v1067_v25, %v1066_v4  ;;  %2333 = vst.msk [vmem:[%s3343_s25 + $0xa0] sm:$0xff] %vm932_vm2, %v1174_v29 }
 0x47a   : > { %1538 = vxpose.xlu1.b32.cont [6/16] (narrow) %v4029_v0, 16 }
 0x47b   : > { %2327 = vst [vmem:[%s3526_s28 + $0x1] sm:$0x1] %v1068_v47 }
 0x47c   : > { %v1198_v27 = vpop.xlane.xlu0 %1197 }
 0x47d   : > { %2341 = vst.msk [vmem:[%s3343_s25 + $0xe0] sm:$0xff] %vm932_vm2, %v1198_v27 }
 0x47e   : > { %1539 = vxpose.xlu1.b32.cont [7/16] (narrow) %v3461_v34, 16  ;;  %v4033_v34 = vld [vmem:[#allocation25_spill] sm:$0xff] }
 0x480   : > { %v1434_v55 = vpop.xlane.xlu0 %1433 }
 0x481   : > { %2353 = vst.msk [vmem:[%s3343_s25 + $0x120] sm:$0xff] %vm932_vm2, %v1434_v55 }
 0x482   : > { %1540 = vxpose.xlu1.b32.cont [8/16] (narrow) %v4030_v14, 16 }
 0x484   : > { %v1183_v63 = vpop.xlane.xlu0 %1182 }
 0x485   : > { %2336 = vst.msk [vmem:[%s3343_s25 + $0xb8] sm:$0xff] %vm932_vm2, %v1183_v63 }
 0x486   : > { %1541 = vxpose.xlu1.b32.cont [9/16] (narrow) %v4031_v35, 16 }
 0x488   : > { %v1443_v26 = vpop.xlane.xlu0 %1442 }
 0x489   : > { %2356 = vst.msk [vmem:[%s3343_s25 + $0x138] sm:$0xff] %vm932_vm2, %v1443_v26 }
 0x48a   : > { %1542 = vxpose.xlu1.b32.cont [10/16] (narrow) %v4032_v43, 16 }
 0x48c   : > { %v1467_v36 = vpop.xlane.xlu0 %1466 }
 0x48d   : > { %2364 = vst.msk [vmem:[%s3343_s25 + $0x178] sm:$0xff] %vm932_vm2, %v1467_v36 }
 0x48e   : > { %1543 = vxpose.xlu1.b32.cont [11/16] (narrow) %v4033_v34, 16 }
 0x490   : > { %v1177_v57 = vpop.xlane.xlu0 %1176 }
 0x491   : > { %2334 = vst.msk [vmem:[%s3343_s25 + $0xa8] sm:$0xff] %vm932_vm2, %v1177_v57 }
 0x492   : > { %1544 = vxpose.xlu1.b32.cont [12/16] (narrow) %v4034_v61, 16 }
 0x494   : > { %v1437_v37 = vpop.xlane.xlu0 %1436 }
 0x495   : > { %2354 = vst.msk [vmem:[%s3343_s25 + $0x128] sm:$0xff] %vm932_vm2, %v1437_v37 }
 0x496   : > { %1545 = vxpose.xlu1.b32.cont [13/16] (narrow) %v3501_v40, 16 }
 0x498   : > { %v1461_v1 = vpop.xlane.xlu0 %1460 }
 0x499   : > { %2362 = vst.msk [vmem:[%s3343_s25 + $0x168] sm:$0xff] %vm932_vm2, %v1461_v1 }
 0x49a   : > { %1546 = vxpose.xlu1.b32.cont [14/16] (narrow) %v4035_v20, 16 }
 0x49c   : > { %v1633_v33 = vpop.permute.xlu0 %1632 }
 0x49d   : > { %v1680_v48 = vsel %vm883_vm1, %v1633_v33, 0.0 }
 0x49e   : > { %1547 = vxpose.xlu1.b32.cont [15/16] (narrow) %v3467_v2, 16  ;;  %1681 = vadd.xlane.f32.xlu0 %v1680_v48 }
 0x4a0   : > { %v1635_v8 = vpop.permute.xlu0 %1634 }
 0x4a1   : > { %v1683_v5 = vsel %vm883_vm1, %v1635_v8, 0.0 }
 0x4a2   : > { %1548 = vxpose.xlu1.b32.end [16/16] (narrow) %v4036_v13, 16 }
 0x4a4   : > { %v1637_v12 = vpop.permute.xlu0 %1636 }
 0x4a5   : > { %v1686_v38 = vsel %vm883_vm1, %v1637_v12, 0.0 }
 0x4a6   : > { %v1289_v19 = vpop.trf.xlu1  ;;  %1687 = vadd.xlane.f32.xlu0 %v1686_v38 }
 0x4a7   : > { %2345 = vst [vmem:[%s3505_s26 + $0x20] sm:$0xff] %v1289_v19  ;;  %v1320_v44 = vmul.f32 %v4037_v10, %v1289_v19 }
 0x4a8   : > { %v1639_v40 = vpop.permute.xlu0 %1638 }
 0x4a9   : > { %v1689_v50 = vsel %vm883_vm1, %v1639_v40, 0.0 }
 0x4aa   : > { %v1290_v45 = vpop.trf.xlu1  ;;  %1690 = vadd.xlane.f32.xlu0 %v1689_v50 }
 0x4ab   : > { %2346 = vst [vmem:[%s3505_s26 + $0x28] sm:$0xff] %v1290_v45  ;;  %v1321_v2 = vmul.f32 %v4038_v23, %v1290_v45  ;;  %v1814_v23 = vld [vmem:[%s3505_s26 + $0x8] sm:$0xff] (%p2613_p4) }
 0x4ac   : > { %v1641_v54 = vpop.permute.xlu0 %1640  ;;  %1815 = vst [vmem:[%s1770_s21 + $0x10] sm:$0xff] (%p2613_p4), %v1814_v23 }
 0x4ad   : > { %v1322_v28 = vadd.f32 %v1321_v2, %v1320_v44  ;;  %v1692_v15 = vsel %vm883_vm1, %v1641_v54, 0.0  ;;  %v1812_v44 = vld [vmem:[%s3505_s26] sm:$0xff] (%p2613_p4)  ;;  %v1816_v2 = vld [vmem:[%s3505_s26 + $0x10] sm:$0xff] (%p2613_p4)  ;;  %v1818_v54 = vld [vmem:[%s3505_s26 + $0x18] sm:$0xff] (%p2613_p4) }
 0x4ae   : > { %1693 = vadd.xlane.f32.xlu0 %v1692_v15  ;;  %1813 = vst [vmem:[%s1770_s21] sm:$0xff] (%p2613_p4), %v1812_v44  ;;  %1817 = vst [vmem:[%s1770_s21 + $0x20] sm:$0xff] (%p2613_p4), %v1816_v2 }
 0x4af   : > { %v1323_v24 = vrot.slane %v1322_v28, 4  ;;  %1819 = vst [vmem:[%s1770_s21 + $0x30] sm:$0xff] (%p2613_p4), %v1818_v54 }
 0x4b0   : > { %v1643_v21 = vpop.permute.xlu0 %1642 }
 0x4b1   : > { %v1324_v7 = vadd.f32 %v1323_v24, %v1322_v28  ;;  %v1695_v17 = vsel %vm883_vm1, %v1643_v21, 0.0  ;;  %v1820_v28 = vld [vmem:[%s3505_s26 + $0x20] sm:$0xff] (%p2613_p4) }
 0x4b2   : > { %1696 = vadd.xlane.f32.xlu0 %v1695_v17  ;;  %v1822_v15 = vld [vmem:[%s3505_s26 + $0x28] sm:$0xff] (%p2613_p4)  ;;  %1821 = vst [vmem:[%s1770_s21 + $0x40] sm:$0xff] (%p2613_p4), %v1820_v28 }
 0x4b3   : > { %v1325_v3 = vrot.slane %v1324_v7, 2  ;;  %1823 = vst [vmem:[%s1770_s21 + $0x50] sm:$0xff] (%p2613_p4), %v1822_v15 }
 0x4b4   : > { %v1645_v22 = vpop.permute.xlu0 %1644 }
 0x4b5   : > { %v1326_v41 = vadd.f32 %v1325_v3, %v1324_v7  ;;  %v1698_v31 = vsel %vm883_vm1, %v1645_v22, 0.0 }
 0x4b6   : > { %1699 = vadd.xlane.f32.xlu0 %v1698_v31 }
 0x4b7   : > { %v1327_v16 = vrot.slane %v1326_v41, 1 }
 0x4b8   : > { %v1647_v60 = vpop.permute.xlu0 %1646 }
 0x4b9   : > { %v1328_v42 = vadd.f32 %v1327_v16, %v1326_v41  ;;  %v1701_v6 = vsel %vm883_vm1, %v1647_v60, 0.0 }
 0x4ba   : > { %1702 = vadd.xlane.f32.xlu0 %v1701_v6 }
 0x4bb   : > { %2347 = vst [vmem:[%s3526_s28 + $0x2] sm:$0x1] %v1328_v42 }
 0x4bc   : > { %v1649_v18 = vpop.permute.xlu0 %1648 }
 0x4bd   : > { %v1704_v9 = vsel %vm883_vm1, %v1649_v18, 0.0 }
 0x4be   : > { %1705 = vadd.xlane.f32.xlu0 %v1704_v9 }
 0x4c0   : > { %v1651_v58 = vpop.permute.xlu0 %1650 }
 0x4c1   : > { %v1707_v11 = vsel %vm883_vm1, %v1651_v58, 0.0 }
 0x4c2   : > { %1708 = vadd.xlane.f32.xlu0 %v1707_v11 }
 0x4c4   : > { %v1653_v51 = vpop.permute.xlu0 %1652 }
 0x4c5   : > { %v1710_v39 = vsel %vm883_vm1, %v1653_v51, 0.0 }
 0x4c6   : > { %1711 = vadd.xlane.f32.xlu0 %v1710_v39 }
 0x4c8   : > { %v1655_v53 = vpop.permute.xlu0 %1654 }
 0x4c9   : > { %1684 = vadd.xlane.f32.xlu1 %v1683_v5  ;;  %v1713_v49 = vsel %vm883_vm1, %v1655_v53, 0.0 }
 0x4cc   : > { %v1657_v32 = vpop.permute.xlu0 %1656 }
 0x4cd   : > { %v1716_v59 = vsel %vm883_vm1, %v1657_v32, 0.0  ;;  %1714 = vadd.xlane.f32.xlu1 %v1713_v49 }
 0x4ce   : > { %1717 = vadd.xlane.f32.xlu0 %v1716_v59 }
 0x4d0   : > { %v1659_v46 = vpop.permute.xlu0 %1658 }
 0x4d1   : > { %v1719_v52 = vsel %vm883_vm1, %v1659_v46, 0.0 }
 0x4d2   : > { %1720 = vadd.xlane.f32.xlu1 %v1719_v52 }
 0x4d4   : > { %v1661_v56 = vpop.permute.xlu0 %1660 }
 0x4d5   : > { %v1722_v30 = vsel %vm883_vm1, %v1661_v56, 0.0 }
 0x4d6   : > { %1723 = vadd.xlane.f32.xlu0 %v1722_v30 }
 0x4d8   : > { %v1663_v62 = vpop.permute.xlu0 %1662 }
 0x4d9   : > { %v1725_v4 = vsel %vm883_vm1, %v1663_v62, 0.0 }
 0x4da   : > { %1726 = vadd.xlane.f32.xlu1 %v1725_v4 }
 0x4e0   : > { %v1573_v25 = vpop.permute.xlu0 %1572 }
 0x4e4   : > { %v1578_v47 = vpop.permute.xlu0 %1577 }
 0x4e6   : > { %v1549_v29 = vpop.trf.xlu1 }
 0x4e7   : > { %2365 = vst [vmem:[%s3505_s26 + $0x30] sm:$0xff] %v1549_v29  ;;  %v1580_v27 = vmul.f32 %v1573_v25, %v1549_v29 }
 0x4ea   : > { %v1550_v0 = vpop.trf.xlu1 }
 0x4eb   : > { %2366 = vst [vmem:[%s3505_s26 + $0x38] sm:$0xff] %v1550_v0  ;;  %v1581_v55 = vmul.f32 %v1578_v47, %v1550_v0 }
 0x4ed   : > { %v1582_v14 = vadd.f32 %v1581_v55, %v1580_v27 }
 0x4ee   : > { %v1824_v24 = vld [vmem:[%s3505_s26 + $0x30] sm:$0xff] (%p2613_p4) }
 0x4ef   : > { %v1583_v63 = vrot.slane %v1582_v14, 4  ;;  %1825 = vst [vmem:[%s1770_s21 + $0x60] sm:$0xff] (%p2613_p4), %v1824_v24 }
 0x4f1   : > { %v1584_v35 = vadd.f32 %v1583_v63, %v1582_v14 }
 0x4f2   : > { %v1826_v21 = vld [vmem:[%s3505_s26 + $0x38] sm:$0xff] (%p2613_p4) }
 0x4f3   : > { %v1585_v26 = vrot.slane %v1584_v35, 2  ;;  %1827 = vst [vmem:[%s1770_s21 + $0x70] sm:$0xff] (%p2613_p4), %v1826_v21 }
 0x4f5   : > { %v1586_v43 = vadd.f32 %v1585_v26, %v1584_v35 }
 0x4f7   : > { %v1587_v36 = vrot.slane %v1586_v43, 1 }
 0x4f9   : > { %v1588_v34 = vadd.f32 %v1587_v36, %v1586_v43 }
 0x4fb   : > { %2367 = vst [vmem:[%s3526_s28 + $0x3] sm:$0x1] %v1588_v34 }
 0x52b   : > { %v1682_v57 = vpop.xlane.xlu0 %1681 }
 0x52c   : > { %2369 = vst.msk [vmem:[%s3343_s25 + $0x180] sm:$0xff] %vm932_vm2, %v1682_v57 }
 0x533   : > { %v1688_v61 = vpop.xlane.xlu0 %1687 }
 0x534   : > { %2371 = vst.msk [vmem:[%s3343_s25 + $0x190] sm:$0xff] %vm932_vm2, %v1688_v61 }
 0x537   : > { %v1691_v37 = vpop.xlane.xlu0 %1690 }
 0x538   : > { %2372 = vst.msk [vmem:[%s3343_s25 + $0x198] sm:$0xff] %vm932_vm2, %v1691_v37 }
 0x53b   : > { %v1694_v1 = vpop.xlane.xlu0 %1693 }
 0x53c   : > { %2373 = vst.msk [vmem:[%s3343_s25 + $0x1a0] sm:$0xff] %vm932_vm2, %v1694_v1 }
 0x53f   : > { %v1697_v20 = vpop.xlane.xlu0 %1696 }
 0x540   : > { %2374 = vst.msk [vmem:[%s3343_s25 + $0x1a8] sm:$0xff] %vm932_vm2, %v1697_v20 }
 0x543   : > { %v1700_v33 = vpop.xlane.xlu0 %1699 }
 0x544   : > { %2375 = vst.msk [vmem:[%s3343_s25 + $0x1b0] sm:$0xff] %vm932_vm2, %v1700_v33 }
 0x547   : > { %v1703_v48 = vpop.xlane.xlu0 %1702 }
 0x548   : > { %2376 = vst.msk [vmem:[%s3343_s25 + $0x1b8] sm:$0xff] %vm932_vm2, %v1703_v48 }
 0x54b   : > { %v1706_v8 = vpop.xlane.xlu0 %1705 }
 0x54c   : > { %2377 = vst.msk [vmem:[%s3343_s25 + $0x1c0] sm:$0xff] %vm932_vm2, %v1706_v8 }
 0x54f   : > { %v1709_v13 = vpop.xlane.xlu0 %1708 }
 0x550   : > { %2378 = vst.msk [vmem:[%s3343_s25 + $0x1c8] sm:$0xff] %vm932_vm2, %v1709_v13 }
 0x553   : > { %v1712_v12 = vpop.xlane.xlu0 %1711 }
 0x554   : > { %2379 = vst.msk [vmem:[%s3343_s25 + $0x1d0] sm:$0xff] %vm932_vm2, %v1712_v12 }
 0x556   : > { %v1685_v38 = vpop.xlane.xlu1 %1684 }
 0x557   : > { %2370 = vst.msk [vmem:[%s3343_s25 + $0x188] sm:$0xff] %vm932_vm2, %v1685_v38 }
 0x55a   : > { %v1715_v19 = vpop.xlane.xlu1 %1714 }
 0x55b   : > { %2380 = vst.msk [vmem:[%s3343_s25 + $0x1d8] sm:$0xff] %vm932_vm2, %v1715_v19  ;;  %v1718_v40 = vpop.xlane.xlu0 %1717 }
 0x55c   : > { %2381 = vst.msk [vmem:[%s3343_s25 + $0x1e0] sm:$0xff] %vm932_vm2, %v1718_v40 }
 0x55f   : > { %v1721_v50 = vpop.xlane.xlu1 %1720 }
 0x560   : > { %2382 = vst.msk [vmem:[%s3343_s25 + $0x1e8] sm:$0xff] %vm932_vm2, %v1721_v50 }
 0x562   : > { %1768 = sbr.rel (!%p2613_p4) target bundleno = 1385 (0x569), region = 52 }
 0x563   : > { %v1724_v45 = vpop.xlane.xlu0 %1723 }
 0x564   : > { %2383 = vst.msk [vmem:[%s3343_s25 + $0x1f0] sm:$0xff] %vm932_vm2, %v1724_v45 }
 0x567   : > { %v1727_v10 = vpop.xlane.xlu1 %1726 }
 0x568   : > { %2384 = vst.msk [vmem:[%s3343_s25 + $0x1f8] sm:$0xff] %vm932_vm2, %v1727_v10 }
 0x569 PF: > { %1833 = sbr.rel (!%p2613_p4) target bundleno = 1392 (0x570), region = 90  ;;  %s1834_s24 = scalar_lea.vmem (%p2613_p4), %s3964_s8, %s2601_s12  ;;  %v1850_v7 = vld [vmem:[%s3526_s28] sm:$0x1] (%p2613_p4)  ;;  %v1852_v17 = vld [vmem:[%s3526_s28 + $0x1] sm:$0x1] (%p2613_p4) }
 0x56a   : > { %v1854_v3 = vld [vmem:[%s3526_s28 + $0x2] sm:$0x1] (%p2613_p4)  ;;  %1851 = vst [vmem:[%s1834_s24] sm:$0x1] (%p2613_p4), %v1850_v7  ;;  %1853 = vst [vmem:[%s1834_s24 + $0x2] sm:$0x1] (%p2613_p4), %v1852_v17 }
 0x56b   : > { %1855 = vst [vmem:[%s1834_s24 + $0x4] sm:$0x1] (%p2613_p4), %v1854_v3  ;;  %v1856_v22 = vld [vmem:[%s3526_s28 + $0x3] sm:$0x1] (%p2613_p4) }
 0x56c   : > { %1857 = vst [vmem:[%s1834_s24 + $0x6] sm:$0x1] (%p2613_p4), %v1856_v22 }
 0x570 PF: > { %1880 = sbr.rel (!%p2613_p4) target bundleno = 1426 (0x592), region = 124  ;;  %s2393_s30 = sshll.u32 (%p2613_p4), %s2601_s12, 7  ;;  %v2037_v41 = vld [vmem:[%s3343_s25] sm:$0xff] (%p2613_p4)  ;;  %v2039_v31 = vld [vmem:[%s3343_s25 + $0x8] sm:$0xff] (%p2613_p4)  ;;  %v2041_v16 = vld [vmem:[%s3343_s25 + $0x10] sm:$0xff] (%p2613_p4) }
 0x571   : > { %s3819_s28 = scalar_lea.vmem (%p2613_p4), %s3965_s9, %s2393_s30  ;;  %v2043_v60 = vld [vmem:[%s3343_s25 + $0x18] sm:$0xff] (%p2613_p4)  ;;  %v2045_v42 = vld [vmem:[%s3343_s25 + $0x20] sm:$0xff] (%p2613_p4)  ;;  %v2047_v6 = vld [vmem:[%s3343_s25 + $0x28] sm:$0xff] (%p2613_p4) }
 0x572   : > { %2038 = vst [vmem:[%s3819_s28] sm:$0xff] (%p2613_p4), %v2037_v41  ;;  %2040 = vst [vmem:[%s3819_s28 + $0x8] sm:$0xff] (%p2613_p4), %v2039_v31  ;;  %v2049_v18 = vld [vmem:[%s3343_s25 + $0x30] sm:$0xff] (%p2613_p4)  ;;  %v2051_v9 = vld [vmem:[%s3343_s25 + $0x38] sm:$0xff] (%p2613_p4) }
 0x573   : > { %2042 = vst [vmem:[%s3819_s28 + $0x10] sm:$0xff] (%p2613_p4), %v2041_v16  ;;  %2044 = vst [vmem:[%s3819_s28 + $0x18] sm:$0xff] (%p2613_p4), %v2043_v60  ;;  %v2053_v58 = vld [vmem:[%s3343_s25 + $0x40] sm:$0xff] (%p2613_p4)  ;;  %v2055_v11 = vld [vmem:[%s3343_s25 + $0x48] sm:$0xff] (%p2613_p4) }
 0x574   : > { %2046 = vst [vmem:[%s3819_s28 + $0x20] sm:$0xff] (%p2613_p4), %v2045_v42  ;;  %2048 = vst [vmem:[%s3819_s28 + $0x28] sm:$0xff] (%p2613_p4), %v2047_v6  ;;  %v2057_v51 = vld [vmem:[%s3343_s25 + $0x50] sm:$0xff] (%p2613_p4)  ;;  %v2059_v39 = vld [vmem:[%s3343_s25 + $0x58] sm:$0xff] (%p2613_p4) }
 0x575   : > { %2050 = vst [vmem:[%s3819_s28 + $0x30] sm:$0xff] (%p2613_p4), %v2049_v18  ;;  %2052 = vst [vmem:[%s3819_s28 + $0x38] sm:$0xff] (%p2613_p4), %v2051_v9  ;;  %v2061_v5 = vld [vmem:[%s3343_s25 + $0x60] sm:$0xff] (%p2613_p4)  ;;  %v2063_v53 = vld [vmem:[%s3343_s25 + $0x68] sm:$0xff] (%p2613_p4) }
 0x576   : > { %2054 = vst [vmem:[%s3819_s28 + $0x40] sm:$0xff] (%p2613_p4), %v2053_v58  ;;  %2056 = vst [vmem:[%s3819_s28 + $0x48] sm:$0xff] (%p2613_p4), %v2055_v11  ;;  %v2065_v49 = vld [vmem:[%s3343_s25 + $0x70] sm:$0xff] (%p2613_p4)  ;;  %v2067_v32 = vld [vmem:[%s3343_s25 + $0x78] sm:$0xff] (%p2613_p4) }
 0x577   : > { %2058 = vst [vmem:[%s3819_s28 + $0x50] sm:$0xff] %v2057_v51  ;;  %2060 = vst [vmem:[%s3819_s28 + $0x58] sm:$0xff] %v2059_v39  ;;  %v2069_v59 = vld [vmem:[%s3343_s25 + $0x80] sm:$0xff]  ;;  %v2071_v46 = vld [vmem:[%s3343_s25 + $0x88] sm:$0xff] }
 0x578   : > { %2062 = vst [vmem:[%s3819_s28 + $0x60] sm:$0xff] %v2061_v5  ;;  %2064 = vst [vmem:[%s3819_s28 + $0x68] sm:$0xff] %v2063_v53  ;;  %v2073_v52 = vld [vmem:[%s3343_s25 + $0x90] sm:$0xff]  ;;  %v2075_v56 = vld [vmem:[%s3343_s25 + $0x98] sm:$0xff] }
 0x579   : > { %2066 = vst [vmem:[%s3819_s28 + $0x70] sm:$0xff] %v2065_v49  ;;  %2068 = vst [vmem:[%s3819_s28 + $0x78] sm:$0xff] %v2067_v32  ;;  %v2077_v30 = vld [vmem:[%s3343_s25 + $0xa0] sm:$0xff]  ;;  %v2079_v62 = vld [vmem:[%s3343_s25 + $0xa8] sm:$0xff] }
 0x57a   : > { %2070 = vst [vmem:[%s3819_s28 + $0x100] sm:$0xff] %v2069_v59  ;;  %2072 = vst [vmem:[%s3819_s28 + $0x108] sm:$0xff] %v2071_v46  ;;  %v2081_v4 = vld [vmem:[%s3343_s25 + $0xb0] sm:$0xff]  ;;  %v2083_v25 = vld [vmem:[%s3343_s25 + $0xb8] sm:$0xff] }
 0x57b   : > { %2074 = vst [vmem:[%s3819_s28 + $0x110] sm:$0xff] %v2073_v52  ;;  %2076 = vst [vmem:[%s3819_s28 + $0x118] sm:$0xff] %v2075_v56  ;;  %v2085_v29 = vld [vmem:[%s3343_s25 + $0xc0] sm:$0xff]  ;;  %v2087_v47 = vld [vmem:[%s3343_s25 + $0xc8] sm:$0xff] }
 0x57c   : > { %2078 = vst [vmem:[%s3819_s28 + $0x120] sm:$0xff] %v2077_v30  ;;  %2080 = vst [vmem:[%s3819_s28 + $0x128] sm:$0xff] %v2079_v62  ;;  %v2089_v0 = vld [vmem:[%s3343_s25 + $0xd0] sm:$0xff]  ;;  %v2091_v27 = vld [vmem:[%s3343_s25 + $0xd8] sm:$0xff] }
 0x57d   : > { %2082 = vst [vmem:[%s3819_s28 + $0x130] sm:$0xff] %v2081_v4  ;;  %2084 = vst [vmem:[%s3819_s28 + $0x138] sm:$0xff] %v2083_v25  ;;  %v2093_v55 = vld [vmem:[%s3343_s25 + $0xe0] sm:$0xff]  ;;  %v2095_v14 = vld [vmem:[%s3343_s25 + $0xe8] sm:$0xff] }
 0x57e   : > { %2086 = vst [vmem:[%s3819_s28 + $0x140] sm:$0xff] %v2085_v29  ;;  %2088 = vst [vmem:[%s3819_s28 + $0x148] sm:$0xff] %v2087_v47  ;;  %v2097_v63 = vld [vmem:[%s3343_s25 + $0xf0] sm:$0xff]  ;;  %v2099_v35 = vld [vmem:[%s3343_s25 + $0xf8] sm:$0xff] }
 0x57f   : > { %2090 = vst [vmem:[%s3819_s28 + $0x150] sm:$0xff] %v2089_v0  ;;  %2092 = vst [vmem:[%s3819_s28 + $0x158] sm:$0xff] %v2091_v27  ;;  %v2101_v26 = vld [vmem:[%s3343_s25 + $0x100] sm:$0xff]  ;;  %v2103_v43 = vld [vmem:[%s3343_s25 + $0x108] sm:$0xff] }
 0x580   : > { %2094 = vst [vmem:[%s3819_s28 + $0x160] sm:$0xff] %v2093_v55  ;;  %2096 = vst [vmem:[%s3819_s28 + $0x168] sm:$0xff] %v2095_v14  ;;  %v2105_v36 = vld [vmem:[%s3343_s25 + $0x110] sm:$0xff]  ;;  %v2107_v34 = vld [vmem:[%s3343_s25 + $0x118] sm:$0xff] }
 0x581   : > { %2098 = vst [vmem:[%s3819_s28 + $0x170] sm:$0xff] %v2097_v63  ;;  %2100 = vst [vmem:[%s3819_s28 + $0x178] sm:$0xff] %v2099_v35  ;;  %v2109_v57 = vld [vmem:[%s3343_s25 + $0x120] sm:$0xff]  ;;  %v2111_v61 = vld [vmem:[%s3343_s25 + $0x128] sm:$0xff] }
 0x582   : > { %2102 = vst [vmem:[%s3819_s28 + $0x200] sm:$0xff] %v2101_v26  ;;  %2104 = vst [vmem:[%s3819_s28 + $0x208] sm:$0xff] %v2103_v43  ;;  %v2113_v37 = vld [vmem:[%s3343_s25 + $0x130] sm:$0xff]  ;;  %v2115_v1 = vld [vmem:[%s3343_s25 + $0x138] sm:$0xff] }
 0x583   : > { %2106 = vst [vmem:[%s3819_s28 + $0x210] sm:$0xff] %v2105_v36  ;;  %2108 = vst [vmem:[%s3819_s28 + $0x218] sm:$0xff] %v2107_v34  ;;  %v2117_v20 = vld [vmem:[%s3343_s25 + $0x140] sm:$0xff]  ;;  %v2119_v33 = vld [vmem:[%s3343_s25 + $0x148] sm:$0xff] }
 0x584   : > { %2110 = vst [vmem:[%s3819_s28 + $0x220] sm:$0xff] %v2109_v57  ;;  %2112 = vst [vmem:[%s3819_s28 + $0x228] sm:$0xff] %v2111_v61  ;;  %v2121_v48 = vld [vmem:[%s3343_s25 + $0x150] sm:$0xff]  ;;  %v2123_v8 = vld [vmem:[%s3343_s25 + $0x158] sm:$0xff] }
 0x585   : > { %2114 = vst [vmem:[%s3819_s28 + $0x230] sm:$0xff] %v2113_v37  ;;  %2116 = vst [vmem:[%s3819_s28 + $0x238] sm:$0xff] %v2115_v1  ;;  %v2125_v13 = vld [vmem:[%s3343_s25 + $0x160] sm:$0xff]  ;;  %v2127_v12 = vld [vmem:[%s3343_s25 + $0x168] sm:$0xff] }
 0x586   : > { %2118 = vst [vmem:[%s3819_s28 + $0x240] sm:$0xff] %v2117_v20  ;;  %2120 = vst [vmem:[%s3819_s28 + $0x248] sm:$0xff] %v2119_v33  ;;  %v2129_v38 = vld [vmem:[%s3343_s25 + $0x170] sm:$0xff]  ;;  %v2131_v19 = vld [vmem:[%s3343_s25 + $0x178] sm:$0xff] }
 0x587   : > { %2122 = vst [vmem:[%s3819_s28 + $0x250] sm:$0xff] %v2121_v48  ;;  %2124 = vst [vmem:[%s3819_s28 + $0x258] sm:$0xff] %v2123_v8  ;;  %v2133_v40 = vld [vmem:[%s3343_s25 + $0x180] sm:$0xff]  ;;  %v2135_v50 = vld [vmem:[%s3343_s25 + $0x188] sm:$0xff] }
 0x588   : > { %2126 = vst [vmem:[%s3819_s28 + $0x260] sm:$0xff] %v2125_v13  ;;  %2128 = vst [vmem:[%s3819_s28 + $0x268] sm:$0xff] %v2127_v12  ;;  %v2137_v45 = vld [vmem:[%s3343_s25 + $0x190] sm:$0xff]  ;;  %v2139_v10 = vld [vmem:[%s3343_s25 + $0x198] sm:$0xff] }
 0x589   : > { %2130 = vst [vmem:[%s3819_s28 + $0x270] sm:$0xff] %v2129_v38  ;;  %2132 = vst [vmem:[%s3819_s28 + $0x278] sm:$0xff] %v2131_v19  ;;  %v2141_v44 = vld [vmem:[%s3343_s25 + $0x1a0] sm:$0xff]  ;;  %v2143_v23 = vld [vmem:[%s3343_s25 + $0x1a8] sm:$0xff] }
 0x58a   : > { %2134 = vst [vmem:[%s3819_s28 + $0x300] sm:$0xff] %v2133_v40  ;;  %2136 = vst [vmem:[%s3819_s28 + $0x308] sm:$0xff] %v2135_v50  ;;  %v2145_v2 = vld [vmem:[%s3343_s25 + $0x1b0] sm:$0xff]  ;;  %v2147_v54 = vld [vmem:[%s3343_s25 + $0x1b8] sm:$0xff] }
 0x58b   : > { %2138 = vst [vmem:[%s3819_s28 + $0x310] sm:$0xff] %v2137_v45  ;;  %2140 = vst [vmem:[%s3819_s28 + $0x318] sm:$0xff] %v2139_v10  ;;  %v2149_v28 = vld [vmem:[%s3343_s25 + $0x1c0] sm:$0xff]  ;;  %v2151_v15 = vld [vmem:[%s3343_s25 + $0x1c8] sm:$0xff] }
 0x58c   : > { %2142 = vst [vmem:[%s3819_s28 + $0x320] sm:$0xff] %v2141_v44  ;;  %2144 = vst [vmem:[%s3819_s28 + $0x328] sm:$0xff] %v2143_v23  ;;  %v2153_v24 = vld [vmem:[%s3343_s25 + $0x1d0] sm:$0xff]  ;;  %v2155_v21 = vld [vmem:[%s3343_s25 + $0x1d8] sm:$0xff] }
 0x58d   : > { %2146 = vst [vmem:[%s3819_s28 + $0x330] sm:$0xff] %v2145_v2  ;;  %2148 = vst [vmem:[%s3819_s28 + $0x338] sm:$0xff] %v2147_v54  ;;  %v2157_v7 = vld [vmem:[%s3343_s25 + $0x1e0] sm:$0xff]  ;;  %v2159_v17 = vld [vmem:[%s3343_s25 + $0x1e8] sm:$0xff] }
 0x58e   : > { %2150 = vst [vmem:[%s3819_s28 + $0x340] sm:$0xff] %v2149_v28  ;;  %2152 = vst [vmem:[%s3819_s28 + $0x348] sm:$0xff] %v2151_v15  ;;  %v2161_v3 = vld [vmem:[%s3343_s25 + $0x1f0] sm:$0xff]  ;;  %v2163_v22 = vld [vmem:[%s3343_s25 + $0x1f8] sm:$0xff] }
 0x58f   : > { %2154 = vst [vmem:[%s3819_s28 + $0x350] sm:$0xff] %v2153_v24  ;;  %2156 = vst [vmem:[%s3819_s28 + $0x358] sm:$0xff] %v2155_v21 }
 0x590   : > { %2158 = vst [vmem:[%s3819_s28 + $0x360] sm:$0xff] %v2157_v7  ;;  %2160 = vst [vmem:[%s3819_s28 + $0x368] sm:$0xff] %v2159_v17 }
 0x591   : > { %2162 = vst [vmem:[%s3819_s28 + $0x370] sm:$0xff] %v2161_v3  ;;  %2164 = vst [vmem:[%s3819_s28 + $0x378] sm:$0xff] %v2163_v22 }
 0x592 PF: > { %p17_p8 = scmp.ge.s32.totalorder %s2603_s13, 4   ;;  %s4039_s30 = smov %s2525_s10 }
 0x593   : > { %s4040_s10 = smov %s2611_s16  ;;  %s4041_s11 = smov %s2603_s13 }
 0x594   :  { %19 = sbr.rel (!%p17_p8) target bundleno = 2 (0x2), region = 229 }

// kernel: gdt_layer_forward.11
= control target key start
LH: loop header
LB: loop body
LE: loop exit
PB: predicated region body
PF: predicated region fallthrough
CT: control target
= control target key end

     0   :  { %s2926_s0 = inlined_call_operand.vmem [shape: f32[4,16,256], index: 0, kind: input, shape index: {}]   ;;  %s2927_s1 = inlined_call_operand.vmem [shape: f32[256,64], index: 1, kind: input, shape index: {}]   ;;  %s2928_s2 = inlined_call_operand.vmem [shape: f32[1,64], index: 2, kind: input, shape index: {}]   ;;  %s2929_s3 = inlined_call_operand.vmem [shape: f32[1,64], index: 3, kind: input, shape index: {}]   ;;  %s2930_s4 = inlined_call_operand.vmem [shape: bf16[64,256], index: 4, kind: input, shape index: {}]   ;;  %s2931_s5 = inlined_call_operand.vmem [shape: f32[1,256], index: 5, kind: input, shape index: {}]   ;;  %s2932_s6 = inlined_call_operand.vmem [shape: bf16[256,64], index: 6, kind: input, shape index: {}]   ;;  %s2933_s7 = inlined_call_operand.vmem [shape: f32[1,64], index: 7, kind: input, shape index: {}]   ;;  %s2934_s8 = inlined_call_operand.vmem [shape: f32[256,64], index: 8, kind: output, shape index: {}]  }
   0x1   :  { %2939 = sst [smem:[#allocation11_spill]] %s2926_s0 }
   0x2   :  { %2940 = sst [smem:[#allocation12_spill]] %s2930_s4 }
   0x3   :  { %s2228_s27 = smov 0   ;;  %s2230_s28 = smov 0  }
   0x4   :  { %s2232_s29 = smov 0   ;;  %s2234_s30 = smov 0  }
   0x5   :  { %s2236_s9 = smov 0   ;;  %s2238_s10 = smov 0  }
   0x6   :  { %s2240_s11 = smov 0   ;;  %s2242_s12 = smov 0  }
   0x7   :  { %s2244_s13 = smov 0  }
   0x8 LB: > { %2941 = sst [smem:[#allocation6_spill]] %s2170_s11  ;;  %s27_s14 = sadd.s32 1, %s2170_s11  ;;  %s2178_s13 = sphi %s2244_s13, %s18_s13   ;;  %s2174_s12 = sphi %s2242_s12, %s2954_s12   ;;  %s2170_s11 = sphi %s2240_s11, %s2953_s11   ;;  %s2166_s10 = sphi %s2238_s10, %s2952_s10   ;;  %s2162_s9 = sphi %s2236_s9, %s2959_s9   ;;  %s2158_s30 = sphi %s2234_s30, %s2958_s30   ;;  %s2154_s29 = sphi %s2232_s29, %s2957_s29   ;;  %s2150_s28 = sphi %s2230_s28, %s2956_s28   ;;  %s2146_s27 = sphi %s2228_s27, %s2955_s27  }
   0x9   : > { %2942 = sst [smem:[#allocation7_spill]] %s2174_s12  ;;  %s30_s15 = sadd.s32 1, %s2174_s12 }
   0xa   : > { %p28_p0 = scmp.ge.s32.totalorder %s27_s14, 2  ;;  %s37_s16 = sadd.s32 1, %s2158_s30 }
   0xb   : > { %p44_p1 = scmp.ne.s32.totalorder %s2158_s30, %s2154_s29  ;;  %p45_p2 = scmp.eq.s32.totalorder %s2178_s13, 0 }
   0xc   : > { %s2961_s14 = smov (%p28_p0, %s27_s14), 0  ;;  %s2963_s15 = smov (!%p28_p0, %s30_s15), %s2174_s12 }
   0xd   : > { %2943 = sst [smem:[#allocation8_spill]] %s2961_s14  ;;  %p2282_p3 = por %p45_p2, %p44_p1 }
   0xe   : > { %s128_s18 = ssub.s32 %s2170_s11, %s2961_s14  ;;  %p32_p4 = scmp.ge.s32.totalorder %s2963_s15, 2 }
   0xf   : > { %p129_p5 = scmp.eq.s32.totalorder %s128_s18, 0  ;;  %s131_s19 = sadd.s32 1, %s2150_s28 }
  0x10   : > { %p138_p6 = scmp.ne.s32.totalorder %s2150_s28, %s2146_s27  ;;  %s2965_s15 = smov (%p32_p4, %s2963_s15), 0 }
  0x11   : > { %2945 = sst [smem:[#allocation9_spill]] %s2965_s15  ;;  %s34_s21 = ssub.s32 %s2174_s12, %s2965_s15 }
  0x12   : > { %s2294_s20 = scalar_select %p129_p5, %s2150_s28, %s131_s19  }
  0x13   : > { %p2298_p7 = por %p138_p6, %p45_p2  ;;  %p35_p8 = scmp.eq.s32.totalorder %s34_s21, 0 }
  0x14   : > { %p1840_p9 = scmp.ge.s32.totalorder %s2178_s13, 4 }
  0x15   : > { %s2303_s23 = scalar_select %p35_p8, %s2158_s30, %s37_s16  }
  0x16   : > { %272 = sbr.rel (%p1840_p9) target bundleno = 58 (0x3a), region = 28 }
  0x17   : > { %2947 = sst [smem:[#allocation10_spill]] %s2303_s23 }
  0x1d   : > { %275 = sbr.rel (!%p2282_p3) target bundleno = 43 (0x2b), region = 32  ;;  %s277_s24 = sand.u32 (%p2282_p3), 1, %s2158_s30  }
  0x1e   : > { %s1842_s25 = sshll.u32 (%p2282_p3), %s2174_s12, 3  ;;  %s1841_s26 = sshll.u32 (%p2282_p3), %s277_s24, 6 }
  0x1f   : > { %s2948_s0 = sld [smem:[#allocation11_spill]] (%p2282_p3)  ;;  %s279_s16 = scalar_lea.vmem (%p2282_p3), [#allocation4], %s1841_s26 }
  0x25   : > { %s281_s15 = scalar_lea.vmem %s2948_s0, %s1842_s25 }
  0x26   : > { %v323_v0 = vld [vmem:[%s281_s15] sm:$0xff]  ;;  %v325_v1 = vld [vmem:[%s281_s15 + $0x10] sm:$0xff] }
  0x27   : > { %v327_v2 = vld [vmem:[%s281_s15 + $0x20] sm:$0xff]  ;;  %324 = vst [vmem:[%s279_s16] sm:$0xff] %v323_v0  ;;  %326 = vst [vmem:[%s279_s16 + $0x8] sm:$0xff] %v325_v1  ;;  %v329_v3 = vld [vmem:[%s281_s15 + $0x30] sm:$0xff] }
  0x28   : > { %328 = vst [vmem:[%s279_s16 + $0x10] sm:$0xff] %v327_v2  ;;  %v331_v4 = vld [vmem:[%s281_s15 + $0x40] sm:$0xff]  ;;  %v333_v5 = vld [vmem:[%s281_s15 + $0x50] sm:$0xff]  ;;  %330 = vst [vmem:[%s279_s16 + $0x18] sm:$0xff] %v329_v3 }
  0x29   : > { %332 = vst [vmem:[%s279_s16 + $0x20] sm:$0xff] %v331_v4  ;;  %334 = vst [vmem:[%s279_s16 + $0x28] sm:$0xff] %v333_v5  ;;  %v335_v6 = vld [vmem:[%s281_s15 + $0x60] sm:$0xff]  ;;  %v337_v7 = vld [vmem:[%s281_s15 + $0x70] sm:$0xff] }
  0x2a   : > { %336 = vst [vmem:[%s279_s16 + $0x30] sm:$0xff] %v335_v6  ;;  %338 = vst [vmem:[%s279_s16 + $0x38] sm:$0xff] %v337_v7 }
  0x2b PF: > { %353 = sbr.rel (!%p2298_p7) target bundleno = 58 (0x3a), region = 74  ;;  %s355_s17 = sand.u32 (%p2298_p7), 1, %s2150_s28  }
  0x2c   : > { %s1844_s21 = sshll.u32 (%p2298_p7), %s2170_s11, 2  ;;  %s1843_s24 = sshll.u32 (%p2298_p7), %s355_s17, 5 }
  0x2d   : > { %s2949_s4 = sld [smem:[#allocation12_spill]] (%p2298_p7)  ;;  %s357_s19 = scalar_lea.vmem (%p2298_p7), [#allocation5], %s1843_s24 }
  0x33   : > { %s359_s18 = scalar_lea.vmem %s2949_s4, %s1844_s21 }
  0x34   : > { %v375_v8 = vld [vmem:[%s359_s18] sm:$0xf]  ;;  %v377_v9 = vld [vmem:[%s359_s18 + $0x8] sm:$0xf]  ;;  %v379_v10 = vld [vmem:[%s359_s18 + $0x10] sm:$0xf] }
  0x35   : > { %376 = vst [vmem:[%s357_s19] sm:$0xf] %v375_v8  ;;  %378 = vst [vmem:[%s357_s19 + $0x4] sm:$0xf] %v377_v9  ;;  %v381_v11 = vld [vmem:[%s359_s18 + $0x18] sm:$0xf] }
  0x36   : > { %v383_v12 = vld [vmem:[%s359_s18 + $0x20] sm:$0xf]  ;;  %380 = vst [vmem:[%s357_s19 + $0x8] sm:$0xf] %v379_v10  ;;  %382 = vst [vmem:[%s357_s19 + $0xc] sm:$0xf] %v381_v11 }
  0x37   : > { %384 = vst [vmem:[%s357_s19 + $0x10] sm:$0xf] %v383_v12  ;;  %v385_v13 = vld [vmem:[%s359_s18 + $0x28] sm:$0xf]  ;;  %v387_v14 = vld [vmem:[%s359_s18 + $0x30] sm:$0xf] }
  0x38   : > { %v389_v15 = vld [vmem:[%s359_s18 + $0x38] sm:$0xf]  ;;  %386 = vst [vmem:[%s357_s19 + $0x14] sm:$0xf] %v385_v13  ;;  %388 = vst [vmem:[%s357_s19 + $0x18] sm:$0xf] %v387_v14 }
  0x39   : > { %390 = vst [vmem:[%s357_s19 + $0x1c] sm:$0xf] %v389_v15 }
  0x3a PF: > { %p1845_p10 = scmp.ge.s32.totalorder %s2178_s13, 1  ;;  %p443_p11 = scmp.lt.s32.totalorder %s2178_s13, 5 }
  0x3c   : > { %p444_p12 = pnand %p1845_p10, %p443_p11 }
  0x3d   : > { %s450_s15 = sand.u32 (!%p444_p12), 1, %s2154_s29   ;;  %s457_s22 = sand.u32 (!%p444_p12), 1, %s2146_s27  }
  0x3e   : > { %447 = sbr.rel (%p444_p12) target bundleno = 1281 (0x501), region = 123  ;;  %s1846_s16 = sshll.u32 (!%p444_p12), %s450_s15, 6 }
  0x3f   : > { %s1847_s17 = sshll.u32 (!%p444_p12), %s457_s22, 5  ;;  %s1848_s21 = sshll.u32 (!%p444_p12), %s2166_s10, 4 }
  0x40   : > { %p513_p13 = scmp.lt.s32.totalorder (!%p444_p12), %s2162_s9, 1  ;;  %p508_p0 = scmp.lt.s32.totalorder (!%p444_p12), %s1848_s21, 31 }
  0x41   : > { %s1850_s24 = sshll.u32 (!%p444_p12), %s2162_s9, 4  ;;  %s452_s26 = scalar_lea.vmem (!%p444_p12), [#allocation4], %s1846_s16 }
  0x42   : > { %p517_p1 = scmp.lt.s32.totalorder (!%p444_p12), %s1850_s24, 31  ;;  %s2349_s18 = scalar_lea.vmem (!%p444_p12), [#allocation5], %s1847_s17 }
  0x43   : > { %p1854_p2 = scmp.ne.s32.totalorder (!%p444_p12), %s2162_s9, 0 }
  0x45   : > { %s2328_s25 = scalar_select %p513_p13, %s2162_s9, 1 }
  0x46   : > { %s2967_s21 = smov (!%p508_p0, %s1848_s21), 31  ;;  %s2969_s24 = smov (!%p517_p1, %s1850_s24), 31 }
  0x47   : > { %s515_s19 = scalar_lea.vmem %s2931_s5, %s2328_s25  ;;  %s1849_s0 = sshll.u32 %s2967_s21, 3  ;;  %v1855_v16 = vld [vmem:[%s452_s26 + $0x10] sm:$0xff] (!%p1854_p2)  ;;  %v533_v17 = vld [vmem:[%s452_s26] sm:$0xff] (!%p1854_p2)  ;;  %v1856_v18 = vld [vmem:[%s452_s26 + $0x18] sm:$0xff] (!%p1854_p2)  ;;  %vm881_vm0 = vcmask (!%p1854_p2), 261120   ;;  %vm864_vm1 = vcmask (!%p1854_p2), 130048  }
  0x48   : > { %s2337_s27 = scalar_lea.vmem %s2927_s1, %s1849_s0  ;;  %s2342_s15 = scalar_lea.vmem %s2934_s8, %s1849_s0  ;;  %570 = vxpose.xlu1.b32.start [1/2] (short) (!%p1854_p2), %v1855_v16, 128  ;;  %535 = vxpose.xlu0.b32.start [1/2] (short) (!%p1854_p2), %v533_v17, 128  ;;  %v534_v19 = vld [vmem:[%s452_s26 + $0x8] sm:$0xff] (!%p1854_p2)  ;;  %v1859_v20 = vld [vmem:[%s452_s26 + $0x30] sm:$0xff] (!%p1854_p2)  ;;  %v1857_v21 = vld [vmem:[%s452_s26 + $0x20] sm:$0xff] (!%p1854_p2)  ;;  %vm898_vm2 = vcmask (!%p1854_p2), 392192   ;;  %vm947_vm3 = vcmask (!%p1854_p2), 523264  }
  0x49   : > { %s1851_s22 = sshll.u32 %s2969_s24, 2  ;;  %532 = sbr.rel (%p1854_p2) target bundleno = 790 (0x316), region = 135  ;;  %v1860_v22 = vld [vmem:[%s452_s26 + $0x38] sm:$0xff] (!%p1854_p2)  ;;  %v1858_v23 = vld [vmem:[%s452_s26 + $0x28] sm:$0xff] (!%p1854_p2) }
  0x4a   : > { %s2347_s23 = scalar_lea.vmem %s2932_s6, %s1851_s22  ;;  %s2180_s0 = smov (!%p1854_p2), 16  }
  0x4b   : > { %s2181_s4 = smov (!%p1854_p2), 32   ;;  %s2182_s11 = smov (!%p1854_p2), 48  }
  0x4c   : > { %571 = vxpose.xlu1.b32.end [2/2] (short) (!%p1854_p2), %v1856_v18, 128  ;;  %536 = vxpose.xlu0.b32.end [2/2] (short) (!%p1854_p2), %v534_v19, 128 }
  0x85   : > { %640 = vxpose.xlu1.b32.start [1/2] (short) %v1859_v20, 128  ;;  %605 = vxpose.xlu0.b32.start [1/2] (short) %v1857_v21, 128 }
  0x89   : > { %641 = vxpose.xlu1.b32.end [2/2] (short) %v1860_v22, 128  ;;  %606 = vxpose.xlu0.b32.end [2/2] (short) %v1858_v23, 128 }
  0xc8   : > { %v586_v24 = vpop.trf.xlu1  ;;  %v2352_v25 = vpop.trf.xlu0 }
  0xcc   : > { %v587_v26 = vpop.trf.xlu1  ;;  %v2354_v27 = vpop.trf.xlu0 }
  0xd0   : > { %v588_v28 = vpop.trf.xlu1  ;;  %v2356_v29 = vpop.trf.xlu0 }
  0xd4   : > { %v589_v30 = vpop.trf.xlu1  ;;  %v2358_v31 = vpop.trf.xlu0 }
  0xd8   : > { %v590_v32 = vpop.trf.xlu1  ;;  %v2360_v33 = vpop.trf.xlu0 }
  0xdc   : > { %v591_v34 = vpop.trf.xlu1  ;;  %v2362_v35 = vpop.trf.xlu0 }
  0xdf   : > { %690 = vrot.lane.b32.xlu1 %v587_v26, %s2180_s0 }
  0xe0   : > { %v592_v36 = vpop.trf.xlu1  ;;  %v2365_v37 = vpop.trf.xlu0 }
  0xe3   : > { %692 = vrot.lane.b32.xlu1 %v588_v28, %s2180_s0 }
  0xe4   : > { %v593_v38 = vpop.trf.xlu1  ;;  %v2368_v39 = vpop.trf.xlu0 }
  0xe7   : > { %694 = vrot.lane.b32.xlu1 %v589_v30, %s2180_s0 }
  0xe8   : > { %v594_v40 = vpop.trf.xlu1  ;;  %v2371_v41 = vpop.trf.xlu0 }
  0xea   : > { %688 = vrot.lane.b32.xlu0 %v586_v24, %s2180_s0 }
  0xeb   : > { %696 = vrot.lane.b32.xlu1 %v590_v32, %s2180_s0 }
  0xec   : > { %v595_v42 = vpop.trf.xlu1  ;;  %v2375_v43 = vpop.trf.xlu0 }
  0xee   : > { %698 = vrot.lane.b32.xlu0 %v591_v34, %s2180_s0 }
  0xef   : > { %700 = vrot.lane.b32.xlu1 %v592_v36, %s2180_s0 }
  0xf0   : > { %v596_v44 = vpop.trf.xlu1  ;;  %v2379_v45 = vpop.trf.xlu0 }
  0xf2   : > { %702 = vrot.lane.b32.xlu0 %v593_v38, %s2180_s0 }
  0xf3   : > { %704 = vrot.lane.b32.xlu1 %v594_v40, %s2180_s0 }
  0xf4   : > { %v597_v46 = vpop.trf.xlu1  ;;  %v2383_v47 = vpop.trf.xlu0 }
  0xf6   : > { %706 = vrot.lane.b32.xlu0 %v595_v42, %s2180_s0 }
  0xf7   : > { %708 = vrot.lane.b32.xlu1 %v596_v44, %s2180_s0 }
  0xf8   : > { %v598_v48 = vpop.trf.xlu1  ;;  %v2387_v49 = vpop.trf.xlu0 }
  0xfa   : > { %710 = vrot.lane.b32.xlu0 %v597_v46, %s2180_s0 }
  0xfb   : > { %712 = vrot.lane.b32.xlu1 %v598_v48, %s2180_s0 }
  0xfc   : > { %v599_v50 = vpop.trf.xlu1  ;;  %v2391_v51 = vpop.trf.xlu0 }
  0xfe   : > { %714 = vrot.lane.b32.xlu0 %v599_v50, %s2180_s0 }
 0x100   : > { %v600_v52 = vpop.trf.xlu1  ;;  %v2394_v53 = vpop.trf.xlu0 }
 0x101   : > { %716 = vrot.lane.b32.xlu1 %v600_v52, %s2180_s0 }
 0x104   : > { %v601_v54 = vpop.trf.xlu1  ;;  %v2397_v55 = vpop.trf.xlu0 }
 0x105   : > { %718 = vrot.lane.b32.xlu0 %v601_v54, %s2180_s0 }
 0x108   : > { %v621_v56 = vpop.trf.xlu0  ;;  %v656_v57 = vpop.trf.xlu1 }
 0x109   : > { %752 = vrot.lane.b32.xlu1 %v621_v56, %s2181_s4 }
 0x10c   : > { %v622_v58 = vpop.trf.xlu0  ;;  %v657_v59 = vpop.trf.xlu1 }
 0x10d   : > { %754 = vrot.lane.b32.xlu0 %v622_v58, %s2181_s4 }
 0x110   : > { %v623_v60 = vpop.trf.xlu0  ;;  %v658_v61 = vpop.trf.xlu1 }
 0x111   : > { %756 = vrot.lane.b32.xlu1 %v623_v60, %s2181_s4 }
 0x114   : > { %v624_v62 = vpop.trf.xlu0  ;;  %v659_v63 = vpop.trf.xlu1 }
 0x115   : > { %758 = vrot.lane.b32.xlu0 %v624_v62, %s2181_s4 }
 0x118   : > { %v625_v0 = vpop.trf.xlu0  ;;  %v660_v2 = vpop.trf.xlu1 }
 0x119   : > { %760 = vrot.lane.b32.xlu1 %v625_v0, %s2181_s4 }
 0x11c   : > { %v626_v1 = vpop.trf.xlu0  ;;  %v661_v4 = vpop.trf.xlu1 }
 0x11d   : > { %762 = vrot.lane.b32.xlu0 %v626_v1, %s2181_s4 }
 0x120   : > { %v627_v3 = vpop.trf.xlu0  ;;  %v662_v7 = vpop.trf.xlu1 }
 0x121   : > { %764 = vrot.lane.b32.xlu1 %v627_v3, %s2181_s4 }
 0x124   : > { %v628_v5 = vpop.trf.xlu0  ;;  %v663_v9 = vpop.trf.xlu1 }
 0x125   : > { %766 = vrot.lane.b32.xlu0 %v628_v5, %s2181_s4 }
 0x128   : > { %v629_v6 = vpop.trf.xlu0  ;;  %v664_v12 = vpop.trf.xlu1 }
 0x129   : > { %768 = vrot.lane.b32.xlu1 %v629_v6, %s2181_s4 }
 0x12c   : > { %v630_v8 = vpop.trf.xlu0  ;;  %v665_v14 = vpop.trf.xlu1 }
 0x12d   : > { %770 = vrot.lane.b32.xlu0 %v630_v8, %s2181_s4  ;;  %v915_v8 = vld [vmem:[%s2337_s27] sm:$0xff] }
 0x130   : > { %v631_v10 = vpop.trf.xlu0  ;;  %v666_v17 = vpop.trf.xlu1 }
 0x131   : > { %772 = vrot.lane.b32.xlu1 %v631_v10, %s2181_s4 }
 0x134   : > { %v632_v11 = vpop.trf.xlu0  ;;  %v667_v19 = vpop.trf.xlu1 }
 0x135   : > { %774 = vrot.lane.b32.xlu0 %v632_v11, %s2181_s4 }
 0x138   : > { %v633_v13 = vpop.trf.xlu0  ;;  %v668_v20 = vpop.trf.xlu1 }
 0x139   : > { %776 = vrot.lane.b32.xlu1 %v633_v13, %s2181_s4 }
 0x13c   : > { %v634_v15 = vpop.trf.xlu0  ;;  %v669_v21 = vpop.trf.xlu1 }
 0x13d   : > { %778 = vrot.lane.b32.xlu0 %v634_v15, %s2181_s4 }
 0x140   : > { %v635_v16 = vpop.trf.xlu0  ;;  %v670_v22 = vpop.trf.xlu1 }
 0x141   : > { %780 = vrot.lane.b32.xlu1 %v635_v16, %s2181_s4  ;;  %v917_v16 = vld [vmem:[%s2337_s27 + $0x10] sm:$0xff] }
 0x144   : > { %v636_v18 = vpop.trf.xlu0  ;;  %v671_v23 = vpop.trf.xlu1 }
 0x145   : > { %816 = vrot.lane.b32.xlu1 %v656_v57, %s2182_s11  ;;  %782 = vrot.lane.b32.xlu0 %v636_v18, %s2181_s4 }
 0x149   : > { %820 = vrot.lane.b32.xlu1 %v658_v61, %s2182_s11  ;;  %818 = vrot.lane.b32.xlu0 %v657_v59, %s2182_s11 }
 0x14d   : > { %824 = vrot.lane.b32.xlu1 %v660_v2, %s2182_s11  ;;  %822 = vrot.lane.b32.xlu0 %v659_v63, %s2182_s11 }
 0x151   : > { %828 = vrot.lane.b32.xlu1 %v662_v7, %s2182_s11  ;;  %826 = vrot.lane.b32.xlu0 %v661_v4, %s2182_s11  ;;  %v691_v24 = vpop.permute.xlu1 %690 }
 0x155   : > { %832 = vrot.lane.b32.xlu1 %v664_v12, %s2182_s11  ;;  %830 = vrot.lane.b32.xlu0 %v663_v9, %s2182_s11  ;;  %v693_v26 = vpop.permute.xlu1 %692 }
 0x156   : > { %v867_v15 = vsel %vm864_vm1, %v2356_v29, %v693_v26 }
 0x159   : > { %836 = vrot.lane.b32.xlu1 %v666_v17, %s2182_s11  ;;  %834 = vrot.lane.b32.xlu0 %v665_v14, %s2182_s11  ;;  %v695_v28 = vpop.permute.xlu1 %694  ;;  %v866_v14 = vsel %vm864_vm1, %v2354_v27, %v691_v24 }
 0x15a   : > { %v868_v24 = vsel %vm864_vm1, %v2358_v31, %v695_v28 }
 0x15c   : > { %v689_v30 = vpop.permute.xlu0 %688 }
 0x15d   : > { %840 = vrot.lane.b32.xlu1 %v668_v20, %s2182_s11  ;;  %838 = vrot.lane.b32.xlu0 %v667_v19, %s2182_s11  ;;  %v697_v32 = vpop.permute.xlu1 %696  ;;  %v865_v7 = vsel %vm864_vm1, %v2352_v25, %v689_v30  ;;  %v916_v25 = vld [vmem:[%s2337_s27 + $0x8] sm:$0xff]  ;;  %v919_v30 = vld [vmem:[%s2337_s27 + $0x20] sm:$0xff] }
 0x15e   : > { %v869_v26 = vsel %vm864_vm1, %v2360_v33, %v697_v32 }
 0x160   : > { %v2416_v34 = vpop.permute.xlu0 %698 }
 0x161   : > { %844 = vrot.lane.b32.xlu1 %v670_v22, %s2182_s11  ;;  %842 = vrot.lane.b32.xlu0 %v669_v21, %s2182_s11  ;;  %v2418_v36 = vpop.permute.xlu1 %700 }
 0x164   : > { %v2420_v38 = vpop.permute.xlu0 %702 }
 0x165   : > { %846 = vrot.lane.b32.xlu0 %v671_v23, %s2182_s11  ;;  %v2422_v40 = vpop.permute.xlu1 %704 }
 0x168   : > { %v2424_v42 = vpop.permute.xlu0 %706 }
 0x169   : > { %v2426_v44 = vpop.permute.xlu1 %708 }
 0x16c   : > { %v2428_v46 = vpop.permute.xlu0 %710 }
 0x16d   : > { %v2430_v48 = vpop.permute.xlu1 %712 }
 0x170   : > { %v2432_v50 = vpop.permute.xlu0 %714 }
 0x173   : > { %v2434_v52 = vpop.permute.xlu1 %716 }
 0x177   : > { %v2436_v54 = vpop.permute.xlu0 %718 }
 0x17b   : > { %v753_v56 = vpop.permute.xlu1 %752 }
 0x17c   : > { %v882_v9 = vsel %vm881_vm0, %v865_v7, %v753_v56  ;;  %v918_v56 = vld [vmem:[%s2337_s27 + $0x18] sm:$0xff] }
 0x17f   : > { %v755_v57 = vpop.permute.xlu0 %754 }
 0x180   : > { %v883_v17 = vsel %vm881_vm0, %v866_v14, %v755_v57 }
 0x183   : > { %v757_v58 = vpop.permute.xlu1 %756 }
 0x184   : > { %v884_v18 = vsel %vm881_vm0, %v867_v15, %v757_v58 }
 0x187   : > { %v759_v59 = vpop.permute.xlu0 %758 }
 0x188   : > { %v885_v57 = vsel %vm881_vm0, %v868_v24, %v759_v59 }
 0x18b   : > { %v761_v60 = vpop.permute.xlu1 %760 }
 0x18c   : > { %v886_v58 = vsel %vm881_vm0, %v869_v26, %v761_v60  ;;  %v870_v60 = vsel %vm864_vm1, %v2362_v35, %v2416_v34  ;;  %v874_v26 = vsel %vm864_vm1, %v2375_v43, %v2424_v42 }
 0x18f   : > { %v763_v61 = vpop.permute.xlu0 %762 }
 0x190   : > { %v887_v14 = vsel %vm881_vm0, %v870_v60, %v763_v61  ;;  %v927_v60 = vld [vmem:[%s2337_s27 + $0x60] sm:$0xff] }
 0x193   : > { %v765_v62 = vpop.permute.xlu1 %764 }
 0x197   : > { %v2438_v63 = vpop.permute.xlu0 %766 }
 0x19b   : > { %v2440_v0 = vpop.permute.xlu1 %768 }
 0x19f   : > { %v2442_v1 = vpop.permute.xlu0 %770 }
 0x1a3   : > { %v2444_v2 = vpop.permute.xlu1 %772 }
 0x1a7   : > { %v2446_v3 = vpop.permute.xlu0 %774 }
 0x1ab   : > { %v2448_v4 = vpop.permute.xlu1 %776 }
 0x1af   : > { %v2450_v5 = vpop.permute.xlu0 %778 }
 0x1b3   : > { %v2452_v6 = vpop.permute.xlu1 %780 }
 0x1b7   : > { %v817_v10 = vpop.permute.xlu1 %816  ;;  %v2458_v11 = vpop.permute.xlu0 %782 }
 0x1b8   : > { %v899_v12 = vsel %vm898_vm2, %v882_v9, %v817_v10  ;;  %v871_v9 = vsel %vm864_vm1, %v2365_v37, %v2418_v36  ;;  %v921_v10 = vld [vmem:[%s2337_s27 + $0x30] sm:$0xff] }
 0x1b9   : > { %v2461_v13 = vadd.f32 %v915_v8, %v899_v12  ;;  %v920_v12 = vld [vmem:[%s2337_s27 + $0x28] sm:$0xff]  ;;  %v888_v15 = vsel %vm881_vm0, %v871_v9, %v765_v62  ;;  %v926_v9 = vld [vmem:[%s2337_s27 + $0x58] sm:$0xff] }
 0x1bb   : > { %948 = vst.msk [vmem:[#allocation2] sm:$0xff] %vm947_vm3, %v2461_v13  ;;  %v821_v19 = vpop.permute.xlu1 %820  ;;  %v819_v20 = vpop.permute.xlu0 %818  ;;  %v964_v21 = vsel %vm947_vm3, %v2461_v13, 0.0 }
 0x1bc   : > { %v901_v27 = vsel %vm898_vm2, %v884_v18, %v821_v19  ;;  %v900_v29 = vsel %vm898_vm2, %v883_v17, %v819_v20  ;;  %965 = vadd.xlane.f32.xlu1 %v964_v21  ;;  %v872_v17 = vsel %vm864_vm1, %v2368_v39, %v2420_v38  ;;  %v873_v18 = vsel %vm864_vm1, %v2371_v41, %v2422_v40  ;;  %v923_v19 = vld [vmem:[%s2337_s27 + $0x40] sm:$0xff]  ;;  %v922_v20 = vld [vmem:[%s2337_s27 + $0x38] sm:$0xff] }
 0x1bd   : > { %v2477_v22 = vadd.f32 %v917_v16, %v901_v27  ;;  %v2479_v23 = vadd.f32 %v916_v25, %v900_v29  ;;  %v889_v21 = vsel %vm881_vm0, %v872_v17, %v2438_v63  ;;  %v890_v27 = vsel %vm881_vm0, %v873_v18, %v2440_v0 }
 0x1bf   : > { %950 = vst.msk [vmem:[#allocation2 + $0x10] sm:$0xff] %vm947_vm3, %v2477_v22  ;;  %949 = vst.msk [vmem:[#allocation2 + $0x8] sm:$0xff] %vm947_vm3, %v2479_v23  ;;  %v825_v7 = vpop.permute.xlu1 %824  ;;  %v823_v8 = vpop.permute.xlu0 %822  ;;  %v967_v31 = vsel %vm947_vm3, %v2479_v23, 0.0  ;;  %v970_v34 = vsel %vm947_vm3, %v2477_v22, 0.0 }
 0x1c0   : > { %v903_v33 = vsel %vm898_vm2, %v886_v58, %v825_v7  ;;  %v902_v28 = vsel %vm898_vm2, %v885_v57, %v823_v8  ;;  %968 = vadd.xlane.f32.xlu0 %v967_v31  ;;  %v924_v57 = vld [vmem:[%s2337_s27 + $0x48] sm:$0xff]  ;;  %v891_v58 = vsel %vm881_vm0, %v874_v26, %v2442_v1 }
 0x1c1   : > { %v2497_v32 = vadd.f32 %v919_v30, %v903_v33  ;;  %v2499_v59 = vadd.f32 %v918_v56, %v902_v28  ;;  %v875_v30 = vsel %vm864_vm1, %v2379_v45, %v2426_v44  ;;  %v925_v56 = vld [vmem:[%s2337_s27 + $0x50] sm:$0xff]  ;;  %v876_v33 = vsel %vm864_vm1, %v2383_v47, %v2428_v46 }
 0x1c2   : > { %v892_v7 = vsel %vm881_vm0, %v875_v30, %v2444_v2  ;;  %v877_v28 = vsel %vm864_vm1, %v2387_v49, %v2430_v48 }
 0x1c3   : > { %952 = vst.msk [vmem:[#allocation2 + $0x20] sm:$0xff] %vm947_vm3, %v2497_v32  ;;  %951 = vst.msk [vmem:[#allocation2 + $0x18] sm:$0xff] %vm947_vm3, %v2499_v59  ;;  %v829_v16 = vpop.permute.xlu1 %828  ;;  %v827_v35 = vpop.permute.xlu0 %826  ;;  %v973_v37 = vsel %vm947_vm3, %v2499_v59, 0.0  ;;  %v976_v41 = vsel %vm947_vm3, %v2497_v32, 0.0 }
 0x1c4   : > { %v905_v36 = vsel %vm898_vm2, %v888_v15, %v829_v16  ;;  %v904_v61 = vsel %vm898_vm2, %v887_v14, %v827_v35  ;;  %971 = vadd.xlane.f32.xlu0 %v970_v34  ;;  %974 = vadd.xlane.f32.xlu1 %v973_v37  ;;  %v878_v16 = vsel %vm864_vm1, %v2391_v51, %v2432_v50  ;;  %v929_v34 = vld [vmem:[%s2337_s27 + $0x70] sm:$0xff]  ;;  %v928_v37 = vld [vmem:[%s2337_s27 + $0x68] sm:$0xff] }
 0x1c5   : > { %v2521_v62 = vadd.f32 %v921_v10, %v905_v36  ;;  %v2523_v25 = vadd.f32 %v920_v12, %v904_v61  ;;  %v893_v10 = vsel %vm881_vm0, %v876_v33, %v2446_v3  ;;  %v894_v12 = vsel %vm881_vm0, %v877_v28, %v2448_v4 }
 0x1c6   : > { %v879_v35 = vsel %vm864_vm1, %v2394_v53, %v2434_v52  ;;  %v895_v36 = vsel %vm881_vm0, %v878_v16, %v2450_v5 }
 0x1c7   : > { %954 = vst.msk [vmem:[#allocation2 + $0x30] sm:$0xff] %vm947_vm3, %v2521_v62  ;;  %953 = vst.msk [vmem:[#allocation2 + $0x28] sm:$0xff] %vm947_vm3, %v2523_v25  ;;  %v833_v39 = vpop.permute.xlu1 %832  ;;  %v831_v38 = vpop.permute.xlu0 %830  ;;  %v979_v40 = vsel %vm947_vm3, %v2523_v25, 0.0  ;;  %v982_v45 = vsel %vm947_vm3, %v2521_v62, 0.0  ;;  %v896_v61 = vsel %vm881_vm0, %v879_v35, %v2452_v6 }
 0x1c8   : > { %v907_v63 = vsel %vm898_vm2, %v890_v27, %v833_v39  ;;  %v906_v29 = vsel %vm898_vm2, %v889_v21, %v831_v38  ;;  %977 = vadd.xlane.f32.xlu0 %v976_v41  ;;  %980 = vadd.xlane.f32.xlu1 %v979_v40 }
 0x1c9   : > { %v2547_v0 = vadd.f32 %v923_v19, %v907_v63  ;;  %v2549_v24 = vadd.f32 %v922_v20, %v906_v29  ;;  %v880_v19 = vsel %vm864_vm1, %v2397_v55, %v2436_v54  ;;  %v930_v20 = vld [vmem:[%s2337_s27 + $0x78] sm:$0xff] }
 0x1ca   : > { %v897_v21 = vsel %vm881_vm0, %v880_v19, %v2458_v11 }
 0x1cb   : > { %956 = vst.msk [vmem:[#allocation2 + $0x40] sm:$0xff] %vm947_vm3, %v2547_v0  ;;  %955 = vst.msk [vmem:[#allocation2 + $0x38] sm:$0xff] %vm947_vm3, %v2549_v24  ;;  %v837_v43 = vpop.permute.xlu1 %836  ;;  %v835_v42 = vpop.permute.xlu0 %834  ;;  %v985_v44 = vsel %vm947_vm3, %v2549_v24, 0.0  ;;  %v988_v49 = vsel %vm947_vm3, %v2547_v0, 0.0 }
 0x1cc   : > { %v909_v1 = vsel %vm898_vm2, %v892_v7, %v837_v43  ;;  %v908_v8 = vsel %vm898_vm2, %v891_v58, %v835_v42  ;;  %983 = vadd.xlane.f32.xlu0 %v982_v45  ;;  %986 = vadd.xlane.f32.xlu1 %v985_v44 }
 0x1cd   : > { %v2573_v2 = vadd.f32 %v925_v56, %v909_v1  ;;  %v2575_v31 = vadd.f32 %v924_v57, %v908_v8 }
 0x1cf   : > { %958 = vst.msk [vmem:[#allocation2 + $0x50] sm:$0xff] %vm947_vm3, %v2573_v2  ;;  %957 = vst.msk [vmem:[#allocation2 + $0x48] sm:$0xff] %vm947_vm3, %v2575_v31  ;;  %v841_v47 = vpop.permute.xlu1 %840  ;;  %v839_v46 = vpop.permute.xlu0 %838  ;;  %v991_v48 = vsel %vm947_vm3, %v2575_v31, 0.0  ;;  %v994_v53 = vsel %vm947_vm3, %v2573_v2, 0.0 }
 0x1d0   : > { %v911_v3 = vsel %vm898_vm2, %v894_v12, %v841_v47  ;;  %v910_v14 = vsel %vm898_vm2, %v893_v10, %v839_v46  ;;  %989 = vadd.xlane.f32.xlu0 %v988_v49  ;;  %992 = vadd.xlane.f32.xlu1 %v991_v48 }
 0x1d1   : > { %v2599_v4 = vadd.f32 %v927_v60, %v911_v3  ;;  %v2601_v15 = vadd.f32 %v926_v9, %v910_v14 }
 0x1d3   : > { %960 = vst.msk [vmem:[#allocation2 + $0x60] sm:$0xff] %vm947_vm3, %v2599_v4  ;;  %959 = vst.msk [vmem:[#allocation2 + $0x58] sm:$0xff] %vm947_vm3, %v2601_v15  ;;  %v845_v51 = vpop.permute.xlu1 %844  ;;  %v843_v50 = vpop.permute.xlu0 %842  ;;  %v997_v52 = vsel %vm947_vm3, %v2601_v15, 0.0  ;;  %v1000_v39 = vsel %vm947_vm3, %v2599_v4, 0.0 }
 0x1d4   : > { %v913_v17 = vsel %vm898_vm2, %v896_v61, %v845_v51  ;;  %v912_v5 = vsel %vm898_vm2, %v895_v36, %v843_v50  ;;  %995 = vadd.xlane.f32.xlu0 %v994_v53  ;;  %998 = vadd.xlane.f32.xlu1 %v997_v52 }
 0x1d5   : > { %v2625_v6 = vadd.f32 %v929_v34, %v913_v17  ;;  %v2627_v18 = vadd.f32 %v928_v37, %v912_v5 }
 0x1d7   : > { %962 = vst.msk [vmem:[#allocation2 + $0x70] sm:$0xff] %vm947_vm3, %v2625_v6  ;;  %961 = vst.msk [vmem:[#allocation2 + $0x68] sm:$0xff] %vm947_vm3, %v2627_v18  ;;  %v847_v27 = vpop.permute.xlu0 %846  ;;  %v1003_v38 = vsel %vm947_vm3, %v2627_v18, 0.0  ;;  %v1006_v54 = vsel %vm947_vm3, %v2625_v6, 0.0 }
 0x1d8   : > { %v914_v41 = vsel %vm898_vm2, %v897_v21, %v847_v27  ;;  %1001 = vadd.xlane.f32.xlu0 %v1000_v39  ;;  %1004 = vadd.xlane.f32.xlu1 %v1003_v38 }
 0x1d9   : > { %v2644_v55 = vadd.f32 %v930_v20, %v914_v41 }
 0x1db   : > { %963 = vst.msk [vmem:[#allocation2 + $0x78] sm:$0xff] %vm947_vm3, %v2644_v55  ;;  %v1009_v11 = vsel %vm947_vm3, %v2644_v55, 0.0 }
 0x1dc   : > { %1007 = vadd.xlane.f32.xlu0 %v1006_v54  ;;  %1010 = vadd.xlane.f32.xlu1 %v1009_v11 }
 0x249   : > { %v966_v40 = vpop.xlane.xlu1 %965 }
 0x24a   : > { %v1013_v63 = vmul.f32 0.015625, %v966_v40 }
 0x24c   : > { %v2653_v29 = vsub.f32 %v2461_v13, %v1013_v63 }
 0x24d   : > { %v969_v26 = vpop.xlane.xlu0 %968 }
 0x24e   : > { %v1014_v30 = vmul.f32 0.015625, %v969_v26  ;;  %v1045_v56 = vmul.f32 %v2653_v29, %v2653_v29 }
 0x250   : > { %v2658_v57 = vsub.f32 %v2479_v23, %v1014_v30  ;;  %v1061_v58 = vsel %vm947_vm3, %v1045_v56, 0.0 }
 0x251   : > { %1062 = vadd.xlane.f32.xlu0 %v1061_v58  ;;  %v975_v7 = vpop.xlane.xlu1 %974  ;;  %v972_v43 = vpop.xlane.xlu0 %971 }
 0x252   : > { %v1016_v42 = vmul.f32 0.015625, %v975_v7  ;;  %v1015_v45 = vmul.f32 0.015625, %v972_v43  ;;  %v1046_v44 = vmul.f32 %v2658_v57, %v2658_v57 }
 0x254   : > { %v2664_v13 = vsub.f32 %v2499_v59, %v1016_v42  ;;  %v2667_v1 = vsub.f32 %v2477_v22, %v1015_v45  ;;  %v1064_v8 = vsel %vm947_vm3, %v1046_v44, 0.0 }
 0x255   : > { %v981_v23 = vpop.xlane.xlu1 %980  ;;  %1065 = vadd.xlane.f32.xlu1 %v1064_v8  ;;  %v978_v33 = vpop.xlane.xlu0 %977 }
 0x256   : > { %v1018_v28 = vmul.f32 0.015625, %v981_v23  ;;  %v1017_v60 = vmul.f32 0.015625, %v978_v33  ;;  %v1048_v9 = vmul.f32 %v2664_v13, %v2664_v13  ;;  %v1047_v10 = vmul.f32 %v2667_v1, %v2667_v1 }
 0x258   : > { %v2675_v12 = vsub.f32 %v2523_v25, %v1018_v28  ;;  %v2678_v59 = vsub.f32 %v2497_v32, %v1017_v60  ;;  %v1070_v22 = vsel %vm947_vm3, %v1048_v9, 0.0  ;;  %v1067_v47 = vsel %vm947_vm3, %v1047_v10, 0.0 }
 0x259   : > { %v987_v46 = vpop.xlane.xlu1 %986  ;;  %1071 = vadd.xlane.f32.xlu1 %v1070_v22  ;;  %1068 = vadd.xlane.f32.xlu0 %v1067_v47  ;;  %v984_v49 = vpop.xlane.xlu0 %983 }
 0x25a   : > { %v1020_v48 = vmul.f32 0.015625, %v987_v46  ;;  %v1019_v3 = vmul.f32 0.015625, %v984_v49  ;;  %v1050_v14 = vmul.f32 %v2675_v12, %v2675_v12  ;;  %v1049_v25 = vmul.f32 %v2678_v59, %v2678_v59 }
 0x25c   : > { %v2687_v16 = vsub.f32 %v2549_v24, %v1020_v48  ;;  %v2690_v32 = vsub.f32 %v2521_v62, %v1019_v3  ;;  %v1076_v35 = vsel %vm947_vm3, %v1050_v14, 0.0  ;;  %v1073_v34 = vsel %vm947_vm3, %v1049_v25, 0.0 }
 0x25d   : > { %v993_v37 = vpop.xlane.xlu1 %992  ;;  %1077 = vadd.xlane.f32.xlu1 %v1076_v35  ;;  %1074 = vadd.xlane.f32.xlu0 %v1073_v34  ;;  %v990_v36 = vpop.xlane.xlu0 %989 }
 0x25e   : > { %v1022_v61 = vmul.f32 0.015625, %v993_v37  ;;  %v1021_v51 = vmul.f32 0.015625, %v990_v36  ;;  %v1052_v50 = vmul.f32 %v2687_v16, %v2687_v16  ;;  %v1051_v24 = vmul.f32 %v2690_v32, %v2690_v32 }
 0x260   : > { %v2699_v53 = vsub.f32 %v2575_v31, %v1022_v61  ;;  %v2702_v62 = vsub.f32 %v2547_v0, %v1021_v51  ;;  %v1082_v52 = vsel %vm947_vm3, %v1052_v50, 0.0  ;;  %v1079_v17 = vsel %vm947_vm3, %v1051_v24, 0.0  ;;  %v2751_v24 = vld [vmem:[%s2928_s2] ss:$0 sm:$0xff] }
 0x261   : > { %v999_v5 = vpop.xlane.xlu1 %998  ;;  %1083 = vadd.xlane.f32.xlu1 %v1082_v52  ;;  %1080 = vadd.xlane.f32.xlu0 %v1079_v17  ;;  %v996_v19 = vpop.xlane.xlu0 %995 }
 0x262   : > { %v1024_v20 = vmul.f32 0.015625, %v999_v5  ;;  %v1023_v21 = vmul.f32 0.015625, %v996_v19  ;;  %v1054_v27 = vmul.f32 %v2699_v53, %v2699_v53  ;;  %v1053_v31 = vmul.f32 %v2702_v62, %v2702_v62 }
 0x264   : > { %v2711_v39 = vsub.f32 %v2601_v15, %v1024_v20  ;;  %v2714_v0 = vsub.f32 %v2573_v2, %v1023_v21  ;;  %v1088_v38 = vsel %vm947_vm3, %v1054_v27, 0.0  ;;  %v1085_v41 = vsel %vm947_vm3, %v1053_v31, 0.0  ;;  %v2757_v21 = vld [vmem:[%s2929_s3] ss:$0 sm:$0xff] }
 0x265   : > { %v1005_v54 = vpop.xlane.xlu1 %1004  ;;  %1089 = vadd.xlane.f32.xlu1 %v1088_v38  ;;  %1086 = vadd.xlane.f32.xlu0 %v1085_v41  ;;  %v1002_v11 = vpop.xlane.xlu0 %1001 }
 0x266   : > { %v1026_v40 = vmul.f32 0.015625, %v1005_v54  ;;  %v1025_v63 = vmul.f32 0.015625, %v1002_v11  ;;  %v1056_v26 = vmul.f32 %v2711_v39, %v2711_v39  ;;  %v1055_v15 = vmul.f32 %v2714_v0, %v2714_v0 }
 0x268   : > { %v2723_v30 = vsub.f32 %v2627_v18, %v1026_v40  ;;  %v2726_v2 = vsub.f32 %v2599_v4, %v1025_v63  ;;  %v1094_v56 = vsel %vm947_vm3, %v1056_v26, 0.0  ;;  %v1091_v58 = vsel %vm947_vm3, %v1055_v15, 0.0 }
 0x269   : > { %v1011_v7 = vpop.xlane.xlu1 %1010  ;;  %1095 = vadd.xlane.f32.xlu1 %v1094_v56  ;;  %1092 = vadd.xlane.f32.xlu0 %v1091_v58  ;;  %v1008_v43 = vpop.xlane.xlu0 %1007 }
 0x26a   : > { %v1028_v42 = vmul.f32 0.015625, %v1011_v7  ;;  %v1027_v45 = vmul.f32 0.015625, %v1008_v43  ;;  %v1058_v44 = vmul.f32 %v2723_v30, %v2723_v30  ;;  %v1057_v18 = vmul.f32 %v2726_v2, %v2726_v2 }
 0x26c   : > { %v2735_v8 = vsub.f32 %v2644_v55, %v1028_v42  ;;  %v2738_v4 = vsub.f32 %v2625_v6, %v1027_v45  ;;  %v1100_v23 = vsel %vm947_vm3, %v1058_v44, 0.0  ;;  %v1097_v33 = vsel %vm947_vm3, %v1057_v18, 0.0 }
 0x26d   : > { %1101 = vadd.xlane.f32.xlu1 %v1100_v23  ;;  %1098 = vadd.xlane.f32.xlu0 %v1097_v33 }
 0x26e   : > { %v1060_v28 = vmul.f32 %v2735_v8, %v2735_v8  ;;  %v1059_v60 = vmul.f32 %v2738_v4, %v2738_v4 }
 0x270   : > { %v1106_v9 = vsel %vm947_vm3, %v1060_v28, 0.0  ;;  %v1103_v55 = vsel %vm947_vm3, %v1059_v60, 0.0 }
 0x271   : > { %1107 = vadd.xlane.f32.xlu1 %v1106_v9  ;;  %1104 = vadd.xlane.f32.xlu0 %v1103_v55 }
 0x2de   : > { %v1063_v6 = vpop.xlane.xlu0 %1062 }
 0x2df   : > { %v1109_v10 = vmul.f32 0.015625, %v1063_v6 }
 0x2e1   : > { %v1125_v22 = vadd.f32 1e-05, %v1109_v10 }
 0x2e2   : > { %v1066_v47 = vpop.xlane.xlu1 %1065 }
 0x2e3   : > { %2064 = vrsqrt.f32 %v1125_v22  ;;  %v1110_v46 = vmul.f32 0.015625, %v1066_v47 }
 0x2e5   : > { %v1126_v49 = vadd.f32 1e-05, %v1110_v46 }
 0x2e6   : > { %v1072_v48 = vpop.xlane.xlu1 %1071  ;;  %v1069_v3 = vpop.xlane.xlu0 %1068 }
 0x2e7   : > { %2066 = vrsqrt.f32 %v1126_v49  ;;  %v1112_v14 = vmul.f32 0.015625, %v1072_v48  ;;  %v1111_v25 = vmul.f32 0.015625, %v1069_v3 }
 0x2e9   : > { %v1128_v35 = vadd.f32 1e-05, %v1112_v14  ;;  %v1127_v34 = vadd.f32 1e-05, %v1111_v25 }
 0x2ea   : > { %v1078_v37 = vpop.xlane.xlu1 %1077  ;;  %v1075_v36 = vpop.xlane.xlu0 %1074 }
 0x2eb   : > { %2068 = vrsqrt.f32 %v1128_v35  ;;  %v1114_v61 = vmul.f32 0.015625, %v1078_v37  ;;  %v1113_v51 = vmul.f32 0.015625, %v1075_v36 }
 0x2ec   : > { %2070 = vrsqrt.f32 %v1127_v34 }
 0x2ed   : > { %v2065_v50 = vpop.eup %2064  ;;  %v1130_v52 = vadd.f32 1e-05, %v1114_v61  ;;  %v1129_v17 = vadd.f32 1e-05, %v1113_v51 }
 0x2ee   : > { %v1157_v5 = vmul.f32 %v2065_v50, %v2653_v29  ;;  %v1084_v19 = vpop.xlane.xlu1 %1083  ;;  %v1081_v20 = vpop.xlane.xlu0 %1080 }
 0x2ef   : > { %2072 = vrsqrt.f32 %v1130_v52  ;;  %v1116_v27 = vmul.f32 0.015625, %v1084_v19  ;;  %v1115_v31 = vmul.f32 0.015625, %v1081_v20 }
 0x2f0   : > { %v1180_v38 = vmul.f32 %v2751_v24, %v1157_v5  ;;  %2074 = vrsqrt.f32 %v1129_v17 }
 0x2f1   : > { %v2067_v41 = vpop.eup %2066  ;;  %v1132_v54 = vadd.f32 1e-05, %v1116_v27  ;;  %v1131_v11 = vadd.f32 1e-05, %v1115_v31 }
 0x2f2   : > { %v1203_v40 = vadd.f32 %v2757_v21, %v1180_v38  ;;  %v1158_v29 = vmul.f32 %v2067_v41, %v2658_v57  ;;  %v1090_v63 = vpop.xlane.xlu1 %1089  ;;  %v1087_v26 = vpop.xlane.xlu0 %1086 }
 0x2f3   : > { %2076 = vrsqrt.f32 %v1132_v54  ;;  %v1118_v15 = vmul.f32 0.015625, %v1090_v63  ;;  %v1117_v56 = vmul.f32 0.015625, %v1087_v26 }
 0x2f4   : > { %1219 = vst.msk [vmem:[#allocation3] sm:$0xff] %vm947_vm3, %v1203_v40  ;;  %v1181_v58 = vmul.f32 %v2751_v24, %v1158_v29  ;;  %2078 = vrsqrt.f32 %v1131_v11 }
 0x2f5   : > { %v2069_v7 = vpop.eup %2068  ;;  %v1134_v43 = vadd.f32 1e-05, %v1118_v15  ;;  %v1133_v42 = vadd.f32 1e-05, %v1117_v56 }
 0x2f6   : > { %v2071_v45 = vpop.eup %2070  ;;  %v1204_v44 = vadd.f32 %v2757_v21, %v1181_v58  ;;  %v1160_v18 = vmul.f32 %v2069_v7, %v2664_v13  ;;  %v1096_v23 = vpop.xlane.xlu1 %1095 }
 0x2f7   : > { %v1093_v57 = vpop.xlane.xlu0 %1092  ;;  %v1159_v33 = vmul.f32 %v2071_v45, %v2667_v1  ;;  %2080 = vrsqrt.f32 %v1134_v43  ;;  %v1120_v28 = vmul.f32 0.015625, %v1096_v23 }
 0x2f8   : > { %v1119_v60 = vmul.f32 0.015625, %v1093_v57  ;;  %1220 = vst.msk [vmem:[#allocation3 + $0x8] sm:$0xff] %vm947_vm3, %v1204_v44  ;;  %v1183_v9 = vmul.f32 %v2751_v24, %v1160_v18  ;;  %2082 = vrsqrt.f32 %v1133_v42 }
 0x2f9   : > { %v2073_v55 = vpop.eup %2072  ;;  %v1182_v6 = vmul.f32 %v2751_v24, %v1159_v33  ;;  %v1136_v10 = vadd.f32 1e-05, %v1120_v28 }
 0x2fa   : > { %v1135_v22 = vadd.f32 1e-05, %v1119_v60  ;;  %v2075_v47 = vpop.eup %2074  ;;  %v1206_v13 = vadd.f32 %v2757_v21, %v1183_v9  ;;  %v1162_v46 = vmul.f32 %v2073_v55, %v2675_v12  ;;  %v1102_v49 = vpop.xlane.xlu1 %1101 }
 0x2fb   : > { %v1099_v1 = vpop.xlane.xlu0 %1098  ;;  %v1205_v48 = vadd.f32 %v2757_v21, %v1182_v6  ;;  %v1161_v3 = vmul.f32 %v2075_v47, %v2678_v59  ;;  %2084 = vrsqrt.f32 %v1136_v10  ;;  %v1122_v14 = vmul.f32 0.015625, %v1102_v49 }
 0x2fc   : > { %1222 = vst.msk [vmem:[#allocation3 + $0x18] sm:$0xff] %vm947_vm3, %v1206_v13  ;;  %v1185_v25 = vmul.f32 %v2751_v24, %v1162_v46  ;;  %2086 = vrsqrt.f32 %v1135_v22  ;;  %v1121_v35 = vmul.f32 0.015625, %v1099_v1 }
 0x2fd   : > { %v2077_v34 = vpop.eup %2076  ;;  %1221 = vst.msk [vmem:[#allocation3 + $0x10] sm:$0xff] %vm947_vm3, %v1205_v48  ;;  %v1184_v37 = vmul.f32 %v2751_v24, %v1161_v3  ;;  %v1138_v12 = vadd.f32 1e-05, %v1122_v14 }
 0x2fe   : > { %v2079_v36 = vpop.eup %2078  ;;  %v1208_v61 = vadd.f32 %v2757_v21, %v1185_v25  ;;  %v1164_v51 = vmul.f32 %v2077_v34, %v2687_v16  ;;  %v1137_v59 = vadd.f32 1e-05, %v1121_v35  ;;  %v1108_v50 = vpop.xlane.xlu1 %1107 }
 0x2ff   : > { %v1105_v52 = vpop.xlane.xlu0 %1104  ;;  %v1207_v17 = vadd.f32 %v2757_v21, %v1184_v37  ;;  %v1163_v5 = vmul.f32 %v2079_v36, %v2690_v32  ;;  %2088 = vrsqrt.f32 %v1138_v12  ;;  %v1124_v19 = vmul.f32 0.015625, %v1108_v50 }
 0x300   : > { %1224 = vst.msk [vmem:[#allocation3 + $0x28] sm:$0xff] %vm947_vm3, %v1208_v61  ;;  %v1187_v20 = vmul.f32 %v2751_v24, %v1164_v51  ;;  %2090 = vrsqrt.f32 %v1137_v59  ;;  %v1123_v27 = vmul.f32 0.015625, %v1105_v52 }
 0x301   : > { %v2081_v31 = vpop.eup %2080  ;;  %1223 = vst.msk [vmem:[#allocation3 + $0x20] sm:$0xff] %vm947_vm3, %v1207_v17  ;;  %v1186_v16 = vmul.f32 %v2751_v24, %v1163_v5  ;;  %v1140_v38 = vadd.f32 1e-05, %v1124_v19 }
 0x302   : > { %v2083_v41 = vpop.eup %2082  ;;  %v1210_v54 = vadd.f32 %v2757_v21, %v1187_v20  ;;  %v1166_v11 = vmul.f32 %v2081_v31, %v2699_v53  ;;  %v1139_v32 = vadd.f32 1e-05, %v1123_v27 }
 0x303   : > { %v1209_v40 = vadd.f32 %v2757_v21, %v1186_v16  ;;  %v1165_v29 = vmul.f32 %v2083_v41, %v2702_v62  ;;  %2092 = vrsqrt.f32 %v1140_v38 }
 0x304   : > { %1226 = vst.msk [vmem:[#allocation3 + $0x38] sm:$0xff] %vm947_vm3, %v1210_v54  ;;  %v1189_v63 = vmul.f32 %v2751_v24, %v1166_v11  ;;  %2094 = vrsqrt.f32 %v1139_v32 }
 0x305   : > { %v2085_v26 = vpop.eup %2084  ;;  %1225 = vst.msk [vmem:[#allocation3 + $0x30] sm:$0xff] %vm947_vm3, %v1209_v40  ;;  %v1188_v15 = vmul.f32 %v2751_v24, %v1165_v29 }
 0x306   : > { %v2087_v56 = vpop.eup %2086  ;;  %v1212_v58 = vadd.f32 %v2757_v21, %v1189_v63  ;;  %v1168_v53 = vmul.f32 %v2085_v26, %v2711_v39 }
 0x307   : > { %v1211_v7 = vadd.f32 %v2757_v21, %v1188_v15  ;;  %v1167_v62 = vmul.f32 %v2087_v56, %v2714_v0 }
 0x308   : > { %1228 = vst.msk [vmem:[#allocation3 + $0x48] sm:$0xff] %vm947_vm3, %v1212_v58  ;;  %v1191_v43 = vmul.f32 %v2751_v24, %v1168_v53 }
 0x309   : > { %v2089_v42 = vpop.eup %2088  ;;  %1227 = vst.msk [vmem:[#allocation3 + $0x40] sm:$0xff] %vm947_vm3, %v1211_v7  ;;  %v1190_v45 = vmul.f32 %v2751_v24, %v1167_v62 }
 0x30a   : > { %v2091_v44 = vpop.eup %2090  ;;  %v1214_v18 = vadd.f32 %v2757_v21, %v1191_v43  ;;  %v1170_v23 = vmul.f32 %v2089_v42, %v2723_v30 }
 0x30b   : > { %v1213_v39 = vadd.f32 %v2757_v21, %v1190_v45  ;;  %v1169_v57 = vmul.f32 %v2091_v44, %v2726_v2 }
 0x30c   : > { %1230 = vst.msk [vmem:[#allocation3 + $0x58] sm:$0xff] %vm947_vm3, %v1214_v18  ;;  %v1193_v0 = vmul.f32 %v2751_v24, %v1170_v23 }
 0x30d   : > { %v2093_v33 = vpop.eup %2092  ;;  %1229 = vst.msk [vmem:[#allocation3 + $0x50] sm:$0xff] %vm947_vm3, %v1213_v39  ;;  %v1192_v28 = vmul.f32 %v2751_v24, %v1169_v57 }
 0x30e   : > { %v2095_v60 = vpop.eup %2094  ;;  %v1216_v9 = vadd.f32 %v2757_v21, %v1193_v0  ;;  %v1172_v55 = vmul.f32 %v2093_v33, %v2735_v8 }
 0x30f   : > { %v1215_v30 = vadd.f32 %v2757_v21, %v1192_v28  ;;  %v1171_v6 = vmul.f32 %v2095_v60, %v2738_v4 }
 0x310   : > { %1232 = vst.msk [vmem:[#allocation3 + $0x68] sm:$0xff] %vm947_vm3, %v1216_v9  ;;  %v1195_v2 = vmul.f32 %v2751_v24, %v1172_v55 }
 0x311   : > { %1231 = vst.msk [vmem:[#allocation3 + $0x60] sm:$0xff] %vm947_vm3, %v1215_v30  ;;  %v1194_v10 = vmul.f32 %v2751_v24, %v1171_v6 }
 0x312   : > { %v1218_v22 = vadd.f32 %v2757_v21, %v1195_v2 }
 0x313   : > { %v1217_v47 = vadd.f32 %v2757_v21, %v1194_v10 }
 0x314   : > { %1234 = vst.msk [vmem:[#allocation3 + $0x78] sm:$0xff] %vm947_vm3, %v1218_v22 }
 0x315   : > { %1233 = vst.msk [vmem:[#allocation3 + $0x70] sm:$0xff] %vm947_vm3, %v1217_v47 }
 0x316 PF: > { %v2096_v8 = vld [vmem:[%s2349_s18] sm:$0xff]   ;;  %v2097_v4 = vld [vmem:[%s2349_s18 + $0x8] sm:$0xff]   ;;  %v2098_v24 = vld [vmem:[%s2349_s18 + $0x10] sm:$0xff]   ;;  %vm1298_vm4 = vcmask 523264   ;;  %p1884_p3 = scmp.ne.s32.totalorder %s2162_s9, 1 }
 0x317   : > { %1916 = vmatprep.subr.bf16.mxu0 %v2096_v8  ;;  %v1235_v13 = vld [vmem:[#allocation3] sm:$0xff]  ;;  %v1236_v46 = vld [vmem:[#allocation3 + $0x8] sm:$0xff]  ;;  %v2099_v49 = vld [vmem:[%s2349_s18 + $0x18] sm:$0xff]  }
 0x318   : > { %1917 = vmatpush3.bf16.msra.mxu0 %v2096_v8  ;;  %v1251_v21 = vpack.c.bf16 %v1236_v46, %v1235_v13  ;;  %v1237_v1 = vld [vmem:[#allocation3 + $0x10] sm:$0xff]  ;;  %v1238_v48 = vld [vmem:[#allocation3 + $0x18] sm:$0xff]  ;;  %v1239_v3 = vld [vmem:[#allocation3 + $0x20] sm:$0xff] }
 0x319   : > { %1918 = vmatprep.subr.bf16.mxu0 %v2097_v4  ;;  %v2100_v14 = vld [vmem:[%s2347_s23] sm:$0xff]   ;;  %v1240_v25 = vld [vmem:[#allocation3 + $0x28] sm:$0xff]  ;;  %v1252_v34 = vpack.c.bf16 %v1238_v48, %v1237_v1  ;;  %v2102_v12 = vld [vmem:[%s2347_s23 + $0x10] sm:$0xff]  }
 0x31a   : > { %1924 = vmatprep.mubr.msk.bf16.mxu0 %vm1298_vm4, %v1251_v21  ;;  %v2101_v35 = vld [vmem:[%s2347_s23 + $0x8] sm:$0xff]   ;;  %1972 = vmatprep.subr.bf16.mxu1 %v2100_v14  ;;  %v1253_v37 = vpack.c.bf16 %v1240_v25, %v1239_v3  ;;  %v1241_v36 = vld [vmem:[#allocation3 + $0x30] sm:$0xff]  ;;  %v1242_v61 = vld [vmem:[#allocation3 + $0x38] sm:$0xff] }
 0x31b   : > { %1980 = vmatpush3.bf16.msra.mxu1 %v2100_v14  ;;  %v1243_v51 = vld [vmem:[#allocation3 + $0x40] sm:$0xff]  ;;  %v1244_v59 = vld [vmem:[#allocation3 + $0x48] sm:$0xff]  ;;  %v2103_v50 = vld [vmem:[%s2347_s23 + $0x18] sm:$0xff]   ;;  %v1254_v52 = vpack.c.bf16 %v1242_v61, %v1241_v36 }
 0x31c   : > { %1919 = vmatpush3.bf16.msra.mxu0 %v2097_v4  ;;  %1973 = vmatprep.subr.bf16.mxu1 %v2101_v35  ;;  %v1255_v17 = vpack.c.bf16 %v1244_v59, %v1243_v51  ;;  %v2104_v5 = vld [vmem:[%s2347_s23 + $0x20] sm:$0xff]   ;;  %v1245_v19 = vld [vmem:[#allocation3 + $0x50] sm:$0xff]  ;;  %v1246_v20 = vld [vmem:[#allocation3 + $0x58] sm:$0xff] }
 0x31d   : > { %1920 = vmatprep.subr.bf16.mxu0 %v2098_v24  ;;  %v1247_v27 = vld [vmem:[#allocation3 + $0x60] sm:$0xff]  ;;  %v1248_v31 = vld [vmem:[#allocation3 + $0x68] sm:$0xff]  ;;  %v1256_v38 = vpack.c.bf16 %v1246_v20, %v1245_v19  ;;  %v1249_v54 = vld [vmem:[#allocation3 + $0x70] sm:$0xff] }
 0x31e   : > { %v2105_v16 = vld [vmem:[%s2347_s23 + $0x28] sm:$0xff]   ;;  %v1257_v41 = vpack.c.bf16 %v1248_v31, %v1247_v27  ;;  %v1250_v11 = vld [vmem:[#allocation3 + $0x78] sm:$0xff]  ;;  %v2106_v40 = vld [vmem:[%s2347_s23 + $0x30] sm:$0xff]  }
 0x31f   : > { %1981 = vmatpush3.bf16.msra.mxu1 %v2101_v35  ;;  %v1258_v32 = vpack.c.bf16 %v1250_v11, %v1249_v54  ;;  %v2107_v29 = vld [vmem:[%s2347_s23 + $0x38] sm:$0xff]   ;;  %v1863_v63 = vld [vmem:[%s515_s19] ss:$0 sm:$0xff] }
 0x320   : > { %1921 = vmatpush3.bf16.msra.mxu0 %v2098_v24  ;;  %1974 = vmatprep.subr.bf16.mxu1 %v2102_v12  ;;  %v1439_v11 = vld [vmem:[#allocation2 + $0x18] sm:$0xff] }
 0x321   : > { %1922 = vmatprep.subr.bf16.mxu0 %v2099_v49 }
 0x323   : > { %1982 = vmatpush3.bf16.msra.mxu1 %v2102_v12 }
 0x324   : > { %1923 = vmatpush3.bf16.msra.mxu0 %v2099_v49  ;;  %1975 = vmatprep.subr.bf16.mxu1 %v2103_v50 }
 0x325   : > { %1940 = vmatprep.subr.bf16.mxu0 %v2100_v14 }
 0x327   : > { %1925 = vmatmul.mubr.msk.bf16.vlgmr.msra.gmra.mrb[0].mxu0 %vm1298_vm4, %v1252_v34  ;;  %1983 = vmatpush3.bf16.msra.mxu1 %v2103_v50 }
 0x328   : > { %1928 = vmatprep.mubr.msk.bf16.mxu0 %vm1298_vm4, %v1253_v37  ;;  %1941 = vmatpush3.bf16.msra.mxu0 %v2100_v14 }
 0x329   : > { %1942 = vmatprep.subr.bf16.mxu0 %v2101_v35  ;;  %1976 = vmatprep.subr.bf16.mxu1 %v2104_v5 }
 0x32b   : > { %1984 = vmatpush3.bf16.msra.mxu1 %v2104_v5 }
 0x32c   : > { %1943 = vmatpush3.bf16.msra.mxu0 %v2101_v35  ;;  %1977 = vmatprep.subr.bf16.mxu1 %v2105_v16 }
 0x32d   : > { %1944 = vmatprep.subr.bf16.mxu0 %v2102_v12 }
 0x32f   : > { %1929 = vmatmul.mubr.msk.bf16.gmra.mrb[4].mxu0 %vm1298_vm4, %v1254_v52  ;;  %1985 = vmatpush3.bf16.msra.mxu1 %v2105_v16 }
 0x330   : > { %1932 = vmatprep.mubr.msk.bf16.mxu0 %vm1298_vm4, %v1255_v17  ;;  %1945 = vmatpush3.bf16.msra.mxu0 %v2102_v12 }
 0x331   : > { %1946 = vmatprep.subr.bf16.mxu0 %v2103_v50  ;;  %1978 = vmatprep.subr.bf16.mxu1 %v2106_v40 }
 0x333   : > { %1986 = vmatpush3.bf16.msra.mxu1 %v2106_v40 }
 0x334   : > { %1947 = vmatpush3.bf16.msra.mxu0 %v2103_v50  ;;  %1979 = vmatprep.subr.bf16.mxu1 %v2107_v29 }
 0x335   : > { %1948 = vmatprep.subr.bf16.mxu0 %v2104_v5 }
 0x337   : > { %1933 = vmatmul.mubr.msk.bf16.gmra.mrb[8].mxu0 %vm1298_vm4, %v1256_v38  ;;  %1987 = vmatpush3.bf16.msra.mxu1 %v2107_v29  ;;  %v1438_v38 = vld [vmem:[#allocation2 + $0x10] sm:$0xff] }
 0x338   : > { %1936 = vmatprep.mubr.msk.bf16.mxu0 %vm1298_vm4, %v1257_v41  ;;  %1949 = vmatpush3.bf16.msra.mxu0 %v2104_v5  ;;  %v1436_v41 = vld [vmem:[#allocation2] sm:$0xff] }
 0x339   : > { %1950 = vmatprep.subr.bf16.mxu0 %v2105_v16 }
 0x33c   : > { %1951 = vmatpush3.bf16.msra.mxu0 %v2105_v16 }
 0x33d   : > { %1952 = vmatprep.subr.bf16.mxu0 %v2106_v40 }
 0x33f   : > { %1937 = vmatmul.mubr.msk.bf16.gmra.mrb[12].mxu0 %vm1298_vm4, %v1258_v32 }
 0x340   : > { %1953 = vmatpush3.bf16.msra.mxu0 %v2106_v40 }
 0x341   : > { %1954 = vmatprep.subr.bf16.mxu0 %v2107_v29 }
 0x344   : > { %1955 = vmatpush3.bf16.msra.mxu0 %v2107_v29  ;;  %v1437_v29 = vld [vmem:[#allocation2 + $0x8] sm:$0xff] }
 0x3fa   : > { %v1926_v26 = vpop.f32.mrb[0].mxu0 }
 0x3fb   : > { %v1366_v15 = vadd.f32 %v1926_v26, %v1863_v63  ;;  %v1357_v56 = vpop.f32.mrb[1].mxu0 }
 0x3fc   : > { %v1358_v58 = vadd.f32 %v1863_v63, %v1357_v56  ;;  %v1927_v53 = vpop.f32.mrb[2].mxu0 }
 0x3fd   : > { %v1369_v7 = vadd.f32 %v1927_v53, %v1863_v63  ;;  %v1360_v62 = vpop.f32.mrb[3].mxu0  ;;  %v1422_v42 = vmax.f32 %v1366_v15, 0.0  ;;  %v1442_v53 = vld [vmem:[#allocation2 + $0x30] sm:$0xff] }
 0x3fe   : > { %v1361_v43 = vadd.f32 %v1863_v63, %v1360_v62  ;;  %v1420_v44 = vmax.f32 %v1358_v58, 0.0 }
 0x3ff   : > { %v1423_v45 = vmax.f32 %v1369_v7, 0.0  ;;  %v1440_v7 = vld [vmem:[#allocation2 + $0x20] sm:$0xff] }
 0x400   : > { %v1421_v18 = vmax.f32 %v1361_v43, 0.0  ;;  %v1443_v43 = vld [vmem:[#allocation2 + $0x38] sm:$0xff] }
 0x401   : > { %v1453_v23 = vpack.c.bf16 %v1423_v45, %v1422_v42 }
 0x402   : > { %v1452_v39 = vpack.c.bf16 %v1421_v18, %v1420_v44  ;;  %v1930_v57 = vpop.f32.mrb[4].mxu0  ;;  %v1441_v44 = vld [vmem:[#allocation2 + $0x28] sm:$0xff] }
 0x403   : > { %v1382_v0 = vadd.f32 %v1930_v57, %v1863_v63  ;;  %v1373_v33 = vpop.f32.mrb[5].mxu0 }
 0x404   : > { %v1374_v28 = vadd.f32 %v1863_v63, %v1373_v33  ;;  %v1931_v60 = vpop.f32.mrb[6].mxu0  ;;  %1956 = vmatprep.mubr.bf16.mxu0 %v1452_v39  ;;  %v1446_v33 = vld [vmem:[#allocation2 + $0x50] sm:$0xff] }
 0x405   : > { %v1385_v9 = vadd.f32 %v1931_v60, %v1863_v63  ;;  %v1376_v55 = vpop.f32.mrb[7].mxu0  ;;  %1957 = vmatmul.mubr.bf16.vlgmr.msra.gmra.mrb[16].mxu0 %v1453_v23  ;;  %v1426_v6 = vmax.f32 %v1382_v0, 0.0 }
 0x406   : > { %v1377_v30 = vadd.f32 %v1863_v63, %v1376_v55  ;;  %v1424_v10 = vmax.f32 %v1374_v28, 0.0  ;;  %v1444_v28 = vld [vmem:[#allocation2 + $0x40] sm:$0xff] }
 0x407   : > { %v1427_v2 = vmax.f32 %v1385_v9, 0.0  ;;  %v1447_v9 = vld [vmem:[#allocation2 + $0x58] sm:$0xff] }
 0x408   : > { %v1425_v22 = vmax.f32 %v1377_v30, 0.0 }
 0x409   : > { %v1455_v47 = vpack.c.bf16 %v1427_v2, %v1426_v6  ;;  %v1445_v6 = vld [vmem:[#allocation2 + $0x48] sm:$0xff] }
 0x40a   : > { %v1934_v8 = vpop.f32.mrb[8].mxu0  ;;  %v1454_v4 = vpack.c.bf16 %v1425_v22, %v1424_v10 }
 0x40b   : > { %v1398_v24 = vadd.f32 %v1934_v8, %v1863_v63  ;;  %v1389_v13 = vpop.f32.mrb[9].mxu0 }
 0x40c   : > { %v1390_v46 = vadd.f32 %v1863_v63, %v1389_v13  ;;  %v1935_v21 = vpop.f32.mrb[10].mxu0  ;;  %1960 = vmatprep.mubr.bf16.mxu1 %v1454_v4  ;;  %v1450_v4 = vld [vmem:[#allocation2 + $0x70] sm:$0xff] }
 0x40d   : > { %v1401_v49 = vadd.f32 %v1935_v21, %v1863_v63  ;;  %v1392_v1 = vpop.f32.mrb[11].mxu0  ;;  %1961 = vmatmul.mubr.bf16.vlgmr.msra.gmra.mrb[0].mxu1 %v1455_v47  ;;  %v1430_v3 = vmax.f32 %v1398_v24, 0.0  ;;  %v1448_v24 = vld [vmem:[#allocation2 + $0x60] sm:$0xff] }
 0x40e   : > { %v1393_v48 = vadd.f32 %v1863_v63, %v1392_v1  ;;  %v1428_v25 = vmax.f32 %v1390_v46, 0.0  ;;  %v1451_v46 = vld [vmem:[#allocation2 + $0x78] sm:$0xff]  ;;  %v1449_v1 = vld [vmem:[#allocation2 + $0x68] sm:$0xff] }
 0x40f   : > { %v1431_v14 = vmax.f32 %v1401_v49, 0.0 }
 0x410   : > { %v1429_v35 = vmax.f32 %v1393_v48, 0.0 }
 0x411   : > { %v1457_v34 = vpack.c.bf16 %v1431_v14, %v1430_v3 }
 0x412   : > { %v1456_v37 = vpack.c.bf16 %v1429_v35, %v1428_v25  ;;  %v1938_v12 = vpop.f32.mrb[12].mxu0 }
 0x413   : > { %v1414_v36 = vadd.f32 %v1938_v12, %v1863_v63  ;;  %v1405_v61 = vpop.f32.mrb[13].mxu0 }
 0x414   : > { %v1406_v51 = vadd.f32 %v1863_v63, %v1405_v61  ;;  %v1939_v59 = vpop.f32.mrb[14].mxu0  ;;  %1964 = vmatprep.mubr.bf16.mxu1 %v1456_v37  ;;  %v1885_v37 = vld [vmem:[%s2933_s7] ss:$0 sm:$0xff] (!%p1884_p3) }
 0x415   : > { %v1417_v50 = vadd.f32 %v1939_v59, %v1863_v63  ;;  %v1408_v52 = vpop.f32.mrb[15].mxu0  ;;  %1965 = vmatmul.mubr.bf16.gmra.mrb[4].mxu1 %v1457_v34  ;;  %v1434_v5 = vmax.f32 %v1414_v36, 0.0 }
 0x416   : > { %v1409_v17 = vadd.f32 %v1863_v63, %v1408_v52  ;;  %v1432_v20 = vmax.f32 %v1406_v51, 0.0 }
 0x417   : > { %v1435_v19 = vmax.f32 %v1417_v50, 0.0 }
 0x418   : > { %v1433_v27 = vmax.f32 %v1409_v17, 0.0 }
 0x419   : > { %v1459_v31 = vpack.c.bf16 %v1435_v19, %v1434_v5 }
 0x41a   : > { %v1458_v16 = vpack.c.bf16 %v1433_v27, %v1432_v20 }
 0x41c   : > { %1968 = vmatprep.mubr.bf16.mxu1 %v1458_v16 }
 0x41d   : > { %1969 = vmatmul.mubr.bf16.gmra.mrb[8].mxu1 %v1459_v31 }
 0x4d8   : > { %v1958_v54 = vpop.f32.mrb[16].mxu0 }
 0x4d9   : > { %v1623_v32 = vadd.f32 %v1958_v54, %v1438_v38  ;;  %v1558_v40 = vpop.f32.mrb[17].mxu0 }
 0x4da   : > { %v1621_v26 = vadd.f32 %v1558_v40, %v1436_v41  ;;  %v1959_v15 = vpop.f32.mrb[18].mxu0 }
 0x4db   : > { %1639 = vst.msk [vmem:[#allocation2 + $0x10] sm:$0xff] %vm1298_vm4, %v1623_v32  ;;  %v1624_v63 = vadd.f32 %v1959_v15, %v1439_v11  ;;  %v1561_v56 = vpop.f32.mrb[19].mxu0 }
 0x4dc   : > { %1637 = vst.msk [vmem:[#allocation2] sm:$0xff] %vm1298_vm4, %v1621_v26  ;;  %v1622_v58 = vadd.f32 %v1561_v56, %v1437_v29 }
 0x4dd   : > { %1640 = vst.msk [vmem:[#allocation2 + $0x18] sm:$0xff] %vm1298_vm4, %v1624_v63 }
 0x4de   : > { %1638 = vst.msk [vmem:[#allocation2 + $0x8] sm:$0xff] %vm1298_vm4, %v1622_v58 }
 0x4e0   : > { %v1962_v62 = vpop.f32.mrb[0].mxu1 }
 0x4e1   : > { %v1627_v42 = vadd.f32 %v1962_v62, %v1442_v53  ;;  %v1574_v45 = vpop.f32.mrb[1].mxu1 }
 0x4e2   : > { %v1625_v18 = vadd.f32 %v1574_v45, %v1440_v7  ;;  %v1963_v23 = vpop.f32.mrb[2].mxu1  ;;  %v1659_v51 = vld [vmem:[#allocation2 + $0x10] sm:$0xff] (!%p1884_p3) }
 0x4e3   : > { %1643 = vst.msk [vmem:[#allocation2 + $0x30] sm:$0xff] %vm1298_vm4, %v1627_v42  ;;  %v1628_v39 = vadd.f32 %v1963_v23, %v1443_v43  ;;  %v1577_v57 = vpop.f32.mrb[3].mxu1  ;;  %v1657_v34 = vld [vmem:[#allocation2] sm:$0xff] (!%p1884_p3)  ;;  %v1682_v52 = vadd.f32 (!%p1884_p3), %v1885_v37, %v1659_v51 }
 0x4e4   : > { %1641 = vst.msk [vmem:[#allocation2 + $0x20] sm:$0xff] %vm1298_vm4, %v1625_v18  ;;  %v1626_v0 = vadd.f32 %v1577_v57, %v1441_v44  ;;  %v1680_v36 = vadd.f32 (!%p1884_p3), %v1885_v37, %v1657_v34  ;;  %v1660_v59 = vld [vmem:[#allocation2 + $0x18] sm:$0xff] (!%p1884_p3) }
 0x4e5   : > { %1644 = vst.msk [vmem:[#allocation2 + $0x38] sm:$0xff] %vm1298_vm4, %v1628_v39  ;;  %v1658_v12 = vld [vmem:[#allocation2 + $0x8] sm:$0xff] (!%p1884_p3)  ;;  %v1683_v17 = vadd.f32 (!%p1884_p3), %v1885_v37, %v1660_v59  ;;  %1698 = vst.msk [vmem:[%s2342_s15 + $0x10] sm:$0xff] (!%p1884_p3), %vm1298_vm4, %v1682_v52 }
 0x4e6   : > { %1642 = vst.msk [vmem:[#allocation2 + $0x28] sm:$0xff] %vm1298_vm4, %v1626_v0  ;;  %v1681_v61 = vadd.f32 (!%p1884_p3), %v1885_v37, %v1658_v12  ;;  %1696 = vst.msk [vmem:[%s2342_s15] sm:$0xff] (!%p1884_p3), %vm1298_vm4, %v1680_v36 }
 0x4e7   : > { %1699 = vst.msk [vmem:[%s2342_s15 + $0x18] sm:$0xff] (!%p1884_p3), %vm1298_vm4, %v1683_v17 }
 0x4e8   : > { %v1966_v60 = vpop.f32.mrb[4].mxu1  ;;  %1697 = vst.msk [vmem:[%s2342_s15 + $0x8] sm:$0xff] (!%p1884_p3), %vm1298_vm4, %v1681_v61 }
 0x4e9   : > { %v1631_v55 = vadd.f32 %v1966_v60, %v1446_v33  ;;  %v1590_v30 = vpop.f32.mrb[5].mxu1 }
 0x4ea   : > { %v1629_v2 = vadd.f32 %v1590_v30, %v1444_v28  ;;  %v1967_v10 = vpop.f32.mrb[6].mxu1  ;;  %v1663_v20 = vld [vmem:[#allocation2 + $0x30] sm:$0xff] (!%p1884_p3) }
 0x4eb   : > { %1647 = vst.msk [vmem:[#allocation2 + $0x50] sm:$0xff] %vm1298_vm4, %v1631_v55  ;;  %v1632_v22 = vadd.f32 %v1967_v10, %v1447_v9  ;;  %v1593_v47 = vpop.f32.mrb[7].mxu1  ;;  %v1661_v50 = vld [vmem:[#allocation2 + $0x20] sm:$0xff] (!%p1884_p3)  ;;  %v1686_v16 = vadd.f32 (!%p1884_p3), %v1885_v37, %v1663_v20 }
 0x4ec   : > { %1645 = vst.msk [vmem:[#allocation2 + $0x40] sm:$0xff] %vm1298_vm4, %v1629_v2  ;;  %v1630_v8 = vadd.f32 %v1593_v47, %v1445_v6  ;;  %v1684_v5 = vadd.f32 (!%p1884_p3), %v1885_v37, %v1661_v50  ;;  %v1664_v27 = vld [vmem:[#allocation2 + $0x38] sm:$0xff] (!%p1884_p3) }
 0x4ed   : > { %1648 = vst.msk [vmem:[#allocation2 + $0x58] sm:$0xff] %vm1298_vm4, %v1632_v22  ;;  %v1662_v19 = vld [vmem:[#allocation2 + $0x28] sm:$0xff] (!%p1884_p3)  ;;  %v1687_v38 = vadd.f32 (!%p1884_p3), %v1885_v37, %v1664_v27  ;;  %1702 = vst.msk [vmem:[%s2342_s15 + $0x30] sm:$0xff] (!%p1884_p3), %vm1298_vm4, %v1686_v16 }
 0x4ee   : > { %1646 = vst.msk [vmem:[#allocation2 + $0x48] sm:$0xff] %vm1298_vm4, %v1630_v8  ;;  %v1685_v31 = vadd.f32 (!%p1884_p3), %v1885_v37, %v1662_v19  ;;  %1700 = vst.msk [vmem:[%s2342_s15 + $0x20] sm:$0xff] (!%p1884_p3), %vm1298_vm4, %v1684_v5 }
 0x4ef   : > { %1703 = vst.msk [vmem:[%s2342_s15 + $0x38] sm:$0xff] (!%p1884_p3), %vm1298_vm4, %v1687_v38 }
 0x4f0   : > { %v1970_v13 = vpop.f32.mrb[8].mxu1  ;;  %1656 = sbr.rel (%p1884_p3) target bundleno = 1281 (0x501), region = 139  ;;  %1701 = vst.msk [vmem:[%s2342_s15 + $0x28] sm:$0xff] (!%p1884_p3), %vm1298_vm4, %v1685_v31 }
 0x4f1   : > { %v1635_v21 = vadd.f32 %v1970_v13, %v1450_v4  ;;  %v1606_v49 = vpop.f32.mrb[9].mxu1 }
 0x4f2   : > { %v1633_v48 = vadd.f32 %v1606_v49, %v1448_v24  ;;  %v1971_v3 = vpop.f32.mrb[10].mxu1  ;;  %v1667_v11 = vld [vmem:[#allocation2 + $0x50] sm:$0xff] (!%p1884_p3) }
 0x4f3   : > { %1651 = vst.msk [vmem:[#allocation2 + $0x70] sm:$0xff] %vm1298_vm4, %v1635_v21  ;;  %v1636_v14 = vadd.f32 %v1971_v3, %v1451_v46  ;;  %v1609_v25 = vpop.f32.mrb[11].mxu1  ;;  %v1665_v41 = vld [vmem:[#allocation2 + $0x40] sm:$0xff] (!%p1884_p3)  ;;  %v1690_v29 = vadd.f32 (!%p1884_p3), %v1885_v37, %v1667_v11 }
 0x4f4   : > { %1649 = vst.msk [vmem:[#allocation2 + $0x60] sm:$0xff] %vm1298_vm4, %v1633_v48  ;;  %v1634_v35 = vadd.f32 %v1609_v25, %v1449_v1  ;;  %v1688_v32 = vadd.f32 (!%p1884_p3), %v1885_v37, %v1665_v41  ;;  %v1668_v26 = vld [vmem:[#allocation2 + $0x58] sm:$0xff] (!%p1884_p3) }
 0x4f5   : > { %1652 = vst.msk [vmem:[#allocation2 + $0x78] sm:$0xff] %vm1298_vm4, %v1636_v14  ;;  %v1666_v54 = vld [vmem:[#allocation2 + $0x48] sm:$0xff] (!%p1884_p3)  ;;  %v1691_v56 = vadd.f32 (!%p1884_p3), %v1885_v37, %v1668_v26  ;;  %1706 = vst.msk [vmem:[%s2342_s15 + $0x50] sm:$0xff] (!%p1884_p3), %vm1298_vm4, %v1690_v29 }
 0x4f6   : > { %1650 = vst.msk [vmem:[#allocation2 + $0x68] sm:$0xff] %vm1298_vm4, %v1634_v35  ;;  %v1689_v40 = vadd.f32 (!%p1884_p3), %v1885_v37, %v1666_v54  ;;  %1704 = vst.msk [vmem:[%s2342_s15 + $0x40] sm:$0xff] (!%p1884_p3), %vm1298_vm4, %v1688_v32 }
 0x4f7   : > { %1707 = vst.msk [vmem:[%s2342_s15 + $0x58] sm:$0xff] %vm1298_vm4, %v1691_v56 }
 0x4f8   : > { %1705 = vst.msk [vmem:[%s2342_s15 + $0x48] sm:$0xff] %vm1298_vm4, %v1689_v40 }
 0x4fa   : > { %v1671_v7 = vld [vmem:[#allocation2 + $0x70] sm:$0xff] }
 0x4fb   : > { %v1669_v15 = vld [vmem:[#allocation2 + $0x60] sm:$0xff]  ;;  %v1694_v43 = vadd.f32 %v1885_v37, %v1671_v7 }
 0x4fc   : > { %v1692_v58 = vadd.f32 %v1885_v37, %v1669_v15  ;;  %v1672_v62 = vld [vmem:[#allocation2 + $0x78] sm:$0xff] }
 0x4fd   : > { %v1670_v63 = vld [vmem:[#allocation2 + $0x68] sm:$0xff]  ;;  %v1695_v42 = vadd.f32 %v1885_v37, %v1672_v62  ;;  %1710 = vst.msk [vmem:[%s2342_s15 + $0x70] sm:$0xff] %vm1298_vm4, %v1694_v43 }
 0x4fe   : > { %v1693_v53 = vadd.f32 %v1885_v37, %v1670_v63  ;;  %1708 = vst.msk [vmem:[%s2342_s15 + $0x60] sm:$0xff] %vm1298_vm4, %v1692_v58 }
 0x4ff   : > { %1711 = vst.msk [vmem:[%s2342_s15 + $0x78] sm:$0xff] %vm1298_vm4, %v1695_v42 }
 0x500   : > { %1709 = vst.msk [vmem:[%s2342_s15 + $0x68] sm:$0xff] %vm1298_vm4, %v1693_v53 }
 0x501 PF: > { %s18_s13 = sadd.s32 1, %s2178_s13   ;;  %s2950_s9 = sld [smem:[#allocation10_spill]] }
 0x502   : > { %p15_p4 = scmp.ge.s32.totalorder %s18_s13, 6   ;;  %s2951_s19 = sld [smem:[#allocation6_spill]] }
 0x503   : > { %s2952_s10 = sld [smem:[#allocation7_spill]]  ;;  %s2953_s11 = sld [smem:[#allocation8_spill]] }
 0x504   : > { %s2954_s12 = sld [smem:[#allocation9_spill]]  ;;  %s2955_s27 = smov %s2150_s28 }
 0x505   : > { %s2956_s28 = smov %s2294_s20  ;;  %s2957_s29 = smov %s2158_s30 }
 0x506   :  { %17 = sbr.rel (!%p15_p4) target bundleno = 8 (0x8), region = 194 }
 0x507   : > { %s2958_s30 = smov %s2950_s9 }
 0x508   : > { %s2959_s9 = smov %s2951_s19 }

</bundles_post_ra>
